<compile_context>
chip_gen: v6e
topology: v6e:2x2x1
jax: 0.10.0
libtpu: 0.0.40
codegen_flags: <defaults>
</compile_context>

<pallas_src>
import jax
import jax.numpy as jnp
from jax import lax
from jax.experimental import pallas as pl
from jax.experimental.pallas import tpu as pltpu

# Conv hyper-params for a representative GoogLeNet conv_block usage
# (kwargs in the PyTorch module: kernel_size=3, stride=1, padding=1).
KH, KW = 3, 3
STRIDE = 1
PAD = 1

# LocalResponseNorm params (fixed in the module)
LRN_SIZE = 5
LRN_ALPHA = 1e-4
LRN_BETA = 0.75
LRN_K = 2.0


def _round_up(a, b):
    return ((a + b - 1) // b) * b


def conv_block_kernel(patches_ref, w_ref, b_ref, o_ref):
    # patches: (TM, K) [f32 or bf16]   w: (K, O_pad) [same dtype]
    # b: (1, O_pad) f32                out: (TM, O_pad) f32
    y = jnp.dot(patches_ref[...], w_ref[...], preferred_element_type=jnp.float32)
    y = y + b_ref[...]                 # broadcast bias over rows
    y = jnp.maximum(y, 0.0)            # ReLU

    # LRN window sum over channels (size=5 -> offsets -2..+2) via lane rotations (XLU).
    # Circular wrap is harmless: the tail of the channel dim holds >= 2 zero-padded
    # channels (zero weights & bias -> zero activations), so wrapped lanes add 0.
    sq = y * y
    o_pad = sq.shape[-1]
    s = sq
    for d in (1, 2):
        s = s + pltpu.roll(sq, shift=d, axis=1)
        s = s + pltpu.roll(sq, shift=o_pad - d, axis=1)

    denom = LRN_K + (LRN_ALPHA / LRN_SIZE) * s
    # denom ** (-beta) with beta = 0.75: d^-0.5 * d^-0.25, entirely on the EUP.
    inv = lax.rsqrt(denom) * lax.rsqrt(jnp.sqrt(denom))
    o_ref[...] = y * inv


def conv_block_forward(x, weight, bias, *, matmul_dtype=jnp.bfloat16, block_m=512):
    """x: (N, C, H, W) f32; weight: (O, C, KH, KW); bias: (O,). Returns (N, O, Hout, Wout)."""
    N, C, H, W = x.shape
    O, Cw, kh_, kw_ = weight.shape
    assert Cw == C
    Hout = (H + 2 * PAD - kh_) // STRIDE + 1
    Wout = (W + 2 * PAD - kw_) // STRIDE + 1
    M = N * Hout * Wout
    K = C * kh_ * kw_

    # ---- im2col (glue, plain JAX) ----
    x_pad = jnp.pad(x, ((0, 0), (0, 0), (PAD, PAD), (PAD, PAD)))
    cols = []
    for kh in range(kh_):
        for kw in range(kw_):
            cols.append(x_pad[:, :, kh:kh + Hout * STRIDE:STRIDE, kw:kw + Wout * STRIDE:STRIDE])
    patches = jnp.stack(cols, axis=2)                       # (N, C, KH*KW, Hout, Wout)
    patches = patches.transpose(0, 3, 4, 1, 2).reshape(M, K)

    # Lane-dense output channels: pad O up to a multiple of 128, leaving at least
    # LRN_SIZE//2 zero channels at the tail for the circular-roll LRN window sum.
    half = LRN_SIZE // 2
    o_pad = _round_up(O + half, 128)

    w_t = weight.reshape(O, K).T                            # (K, O); K-order matches patches
    w_t = jnp.pad(w_t, ((0, 0), (0, o_pad - O)))
    bias2d = jnp.pad(bias, (0, o_pad - O)).reshape(1, o_pad).astype(jnp.float32)

    # Row tiling: TM rows per grid step (multiple of 8); pad M up to whole tiles.
    tm = min(block_m, _round_up(M, 8))
    m_pad = _round_up(M, tm)
    if m_pad != M:
        patches = jnp.pad(patches, ((0, m_pad - M), (0, 0)))

    # Narrow MXU operands (bf16 fast path) or exact f32; accumulate is always f32.
    patches = patches.astype(matmul_dtype)
    w_t = w_t.astype(matmul_dtype)

    # VMEM budget per grid step (f32 worst case, double-buffered streamed/output tiles):
    #   2*TM*K*4 + 2*TM*O_pad*4 + K*O_pad*4 + O_pad*4
    # e.g. TM=512, K=1728, O_pad=512 -> ~13 MiB: well under the 32 MiB scoped default and
    # v7x's 64 MiB physical VMEM, so no vmem_limit_bytes override is needed.
    out_flat = pl.pallas_call(
        conv_block_kernel,
        out_shape=jax.ShapeDtypeStruct((m_pad, o_pad), jnp.float32),
        grid=(m_pad // tm,),
        in_specs=[
            pl.BlockSpec((tm, K), lambda i: (i, 0)),        # streamed im2col rows (pipelined)
            pl.BlockSpec((K, o_pad), lambda i: (0, 0)),     # resident weights
            pl.BlockSpec((1, o_pad), lambda i: (0, 0)),     # resident bias
        ],
        out_specs=pl.BlockSpec((tm, o_pad), lambda i: (i, 0)),
        compiler_params=pltpu.CompilerParams(
            dimension_semantics=("parallel",)),             # v7x: shard row-tiles over 2 TCs
    )(patches, w_t, bias2d)

    # (M_pad, O_pad) -> slice valid rows/channels -> (N, Hout, Wout, O) -> NCHW
    return out_flat[:M, :O].reshape(N, Hout, Wout, O).transpose(0, 3, 1, 2)


def conv_block_reference(x, weight, bias):
    """Pure-JAX reference matching PyTorch semantics (for verification)."""
    y = lax.conv_general_dilated(
        x, weight, window_strides=(STRIDE, STRIDE),
        padding=((PAD, PAD), (PAD, PAD)),
        dimension_numbers=("NCHW", "OIHW", "NCHW"))
    y = y + bias[None, :, None, None]
    y = jnp.maximum(y, 0.0)
    sq = y * y
    O = y.shape[1]
    half = LRN_SIZE // 2
    sq_pad = jnp.pad(sq, ((0, 0), (half, half), (0, 0), (0, 0)))
    s = sum(sq_pad[:, d:d + O] for d in range(LRN_SIZE))
    denom = (LRN_K + (LRN_ALPHA / LRN_SIZE) * s) ** LRN_BETA
    return y / denom


if __name__ == "__main__":
    key = jax.random.PRNGKey(0)
    kx, kw, kb = jax.random.split(key, 3)

    N, C, H, W = 2, 4, 16, 16
    OUT_C = 8

    x = jax.random.normal(kx, (N, C, H, W), dtype=jnp.float32)
    weight = jax.random.normal(kw, (OUT_C, C, KH, KW), dtype=jnp.float32) * 0.1
    bias = jax.random.normal(kb, (OUT_C,), dtype=jnp.float32) * 0.1

    ref = jax.block_until_ready(conv_block_reference(x, weight, bias))

    # Exact-structure check: f32 matmul path must match the module tightly.
    out_f32 = jax.block_until_ready(
        conv_block_forward(x, weight, bias, matmul_dtype=jnp.float32))
    assert out_f32.shape == (N, OUT_C, H, W), out_f32.shape
    assert jnp.allclose(out_f32, ref, rtol=1e-4, atol=1e-4), "f32 path mismatch vs reference"

    # bf16 MXU fast path (v5e/v6e/v7x): operands rounded to bf16, f32 accumulate.
    out_bf16 = jax.block_until_ready(
        conv_block_forward(x, weight, bias, matmul_dtype=jnp.bfloat16))
    assert out_bf16.shape == (N, OUT_C, H, W), out_bf16.shape
    assert jnp.allclose(out_bf16, ref, rtol=2e-2, atol=2e-2), "bf16 path mismatch vs reference"

    print("KERNEL_OK")
</pallas_src>

<mosaic_0001>
module attributes {stable_mosaic.version = 11 : i64} {
  func.func @conv_block_kernel(%arg0: i32, %arg1: memref<512x36xf32, #tpu.memory_space<vmem>>, %arg2: memref<36x128xf32, #tpu.memory_space<vmem>>, %arg3: memref<1x128xf32, #tpu.memory_space<vmem>>, %arg4: memref<512x128xf32, #tpu.memory_space<vmem>>) attributes {dimension_semantics = [#tpu.dimension_semantics<parallel>], iteration_bounds = array<i64: 1>, scalar_prefetch = 0 : i64, scratch_operands = 0 : i64, tpu.core_type = #tpu.core_type<tc>, window_params = [{transform_indices = @transform_0, window_bounds = array<i64: 512, 36>}, {pipeline_mode = #tpu.pipeline_mode<synchronous>, transform_indices = @transform_1, window_bounds = array<i64: 36, 128>}, {pipeline_mode = #tpu.pipeline_mode<synchronous>, transform_indices = @transform_2, window_bounds = array<i64: 1, 128>}, {transform_indices = @transform_3, window_bounds = array<i64: 512, 128>}]} {
    %c0 = arith.constant 0 : index
    %c0_0 = arith.constant 0 : index
    %0 = vector.load %arg1[%c0, %c0_0] : memref<512x36xf32, #tpu.memory_space<vmem>>, vector<512x36xf32>
    %c0_1 = arith.constant 0 : index
    %c0_2 = arith.constant 0 : index
    %1 = vector.load %arg2[%c0_1, %c0_2] : memref<36x128xf32, #tpu.memory_space<vmem>>, vector<36x128xf32>
    %cst = arith.constant dense<0.000000e+00> : vector<512x128xf32>
    %2 = tpu.matmul %0, %1, %cst {dimension_numbers = #tpu.dot_dimension_numbers<[1], [0], [0], [1], [0, 0, 1, 1], [], []>} : vector<512x36xf32>, vector<36x128xf32>, vector<512x128xf32> -> vector<512x128xf32>
    %c0_3 = arith.constant 0 : index
    %c0_4 = arith.constant 0 : index
    %3 = vector.load %arg3[%c0_3, %c0_4] : memref<1x128xf32, #tpu.memory_space<vmem>>, vector<1x128xf32>
    %4 = vector.broadcast %3 : vector<1x128xf32> to vector<512x128xf32>
    %5 = arith.addf %2, %4 : vector<512x128xf32>
    %cst_5 = arith.constant 0.000000e+00 : f32
    %6 = vector.broadcast %cst_5 : f32 to vector<512x128xf32>
    %7 = arith.maximumf %5, %6 : vector<512x128xf32>
    %8 = arith.mulf %7, %7 : vector<512x128xf32>
    %c1_i32 = arith.constant 1 : i32
    %9 = tpu.dynamic_rotate %8 by %c1_i32 dim 1 : vector<512x128xf32>, i32 -> vector<512x128xf32>
    %10 = arith.addf %8, %9 : vector<512x128xf32>
    %c127_i32 = arith.constant 127 : i32
    %11 = tpu.dynamic_rotate %8 by %c127_i32 dim 1 : vector<512x128xf32>, i32 -> vector<512x128xf32>
    %12 = arith.addf %10, %11 : vector<512x128xf32>
    %c2_i32 = arith.constant 2 : i32
    %13 = tpu.dynamic_rotate %8 by %c2_i32 dim 1 : vector<512x128xf32>, i32 -> vector<512x128xf32>
    %14 = arith.addf %12, %13 : vector<512x128xf32>
    %c126_i32 = arith.constant 126 : i32
    %15 = tpu.dynamic_rotate %8 by %c126_i32 dim 1 : vector<512x128xf32>, i32 -> vector<512x128xf32>
    %16 = arith.addf %14, %15 : vector<512x128xf32>
    %cst_6 = arith.constant 2.000000e-05 : f32
    %17 = vector.broadcast %cst_6 : f32 to vector<512x128xf32>
    %18 = arith.mulf %17, %16 : vector<512x128xf32>
    %cst_7 = arith.constant 2.000000e+00 : f32
    %19 = vector.broadcast %cst_7 : f32 to vector<512x128xf32>
    %20 = arith.addf %19, %18 : vector<512x128xf32>
    %21 = math.rsqrt %20 : vector<512x128xf32>
    %22 = math.sqrt %20 : vector<512x128xf32>
    %23 = math.rsqrt %22 : vector<512x128xf32>
    %24 = arith.mulf %21, %23 : vector<512x128xf32>
    %25 = arith.mulf %7, %24 : vector<512x128xf32>
    %c0_8 = arith.constant 0 : index
    %c0_9 = arith.constant 0 : index
    %26 = vector.load %arg4[%c0_8, %c0_9] : memref<512x128xf32, #tpu.memory_space<vmem>>, vector<512x128xf32>
    tpu.vector_store %arg4[%c0_8, %c0_9], %25 {strides = array<i32>} : memref<512x128xf32, #tpu.memory_space<vmem>>, vector<512x128xf32>,
    return
  }
  func.func @transform_0(%arg0: i32) -> (i32, i32) {
    %c0_i32 = arith.constant 0 : i32
    %c0_i32_0 = arith.constant 0 : i32
    return %arg0, %c0_i32 : i32, i32
  }
  func.func @transform_1(%arg0: i32) -> (i32, i32) {
    %c0_i32 = arith.constant 0 : i32
    %c0_i32_0 = arith.constant 0 : i32
    %c0_i32_1 = arith.constant 0 : i32
    return %c0_i32, %c0_i32_0 : i32, i32
  }
  func.func @transform_2(%arg0: i32) -> (i32, i32) {
    %c0_i32 = arith.constant 0 : i32
    %c0_i32_0 = arith.constant 0 : i32
    %c0_i32_1 = arith.constant 0 : i32
    return %c0_i32, %c0_i32_0 : i32, i32
  }
  func.func @transform_3(%arg0: i32) -> (i32, i32) {
    %c0_i32 = arith.constant 0 : i32
    %c0_i32_0 = arith.constant 0 : i32
    return %arg0, %c0_i32 : i32, i32
  }
}

</mosaic_0001>

<bundles_post_ra>
// kernel: tpu_custom_call.1
= control target key start
LH: loop header
LB: loop body
LE: loop exit
PB: predicated region body
PF: predicated region fallthrough
CT: control target
= control target key end

     0   :  { %vm284_vm0 = vcmask 1043456   ;;  %vm91_vm1 = vcmask 293888   ;;  %s6262_s0 = inlined_call_operand.vmem [shape: f32[512,36], index: 0, kind: input, shape index: {}]   ;;  %s6263_s1 = inlined_call_operand.vmem [shape: f32[36,128], index: 1, kind: input, shape index: {}]   ;;  %s6264_s2 = inlined_call_operand.vmem [shape: f32[1,128], index: 2, kind: input, shape index: {}]   ;;  %s6265_s3 = inlined_call_operand.hbm [shape: f32[512,128], index: 3, kind: output, shape index: {}]  }
   0x1   :  { %v83_v0 = vld [vmem:[%s6263_s1 + $0x20] sm:$0xf]  ;;  %v82_v1 = vld [vmem:[%s6263_s1 + $0x18] sm:$0xff]  ;;  %v81_v2 = vld [vmem:[%s6263_s1 + $0x10] sm:$0xff] }
   0x2   :  { %2616 = vmatprep.subr.msk.mxu0 %vm284_vm0, %v83_v0  ;;  %2722 = vmatprep.subr.msk.mxu1 %vm284_vm0, %v83_v0  ;;  %v80_v3 = vld [vmem:[%s6263_s1 + $0x8] sm:$0xff]  ;;  %v79_v4 = vld [vmem:[%s6263_s1] sm:$0xff]  ;;  %v17_v9 = vld [vmem:[%s6262_s0 + $0x10] sm:$0xff] }
   0x3   :  { %2617 = vmatpush3.msk.msra.mxu0 %vm284_vm0, %v83_v0  ;;  %2727 = vmatpush3.msk.msra.mxu1 %vm284_vm0, %v83_v0  ;;  %v15_v5 = vld [vmem:[%s6262_s0] sm:$0xff]  ;;  %v16_v7 = vld [vmem:[%s6262_s0 + $0x8] sm:$0xff]  ;;  %v49_v10 = vld [vmem:[%s6262_s0 + $0x110] sm:$0xff] }
   0x4   :  { %2618 = vmatprep.subr.mxu0 %v82_v1  ;;  %2723 = vmatprep.subr.mxu1 %v82_v1  ;;  %v47_v6 = vld [vmem:[%s6262_s0 + $0x100] sm:$0xff]  ;;  %v48_v8 = vld [vmem:[%s6262_s0 + $0x108] sm:$0xff]  ;;  %v18_v11 = vld [vmem:[%s6262_s0 + $0x18] sm:$0xff] }
   0x5   :  { %2619 = vmatpush3.msra.mxu0 %v82_v1  ;;  %2728 = vmatpush3.msra.mxu1 %v82_v1  ;;  %v50_v12 = vld [vmem:[%s6262_s0 + $0x118] sm:$0xff]  ;;  %v19_v13 = vld [vmem:[%s6262_s0 + $0x20] sm:$0xff]  ;;  %v20_v15 = vld [vmem:[%s6262_s0 + $0x28] sm:$0xff] }
   0x6   :  { %2620 = vmatprep.subr.mxu0 %v81_v2  ;;  %2724 = vmatprep.subr.mxu1 %v81_v2  ;;  %v51_v14 = vld [vmem:[%s6262_s0 + $0x120] sm:$0xff]  ;;  %v52_v16 = vld [vmem:[%s6262_s0 + $0x128] sm:$0xff] }
   0x7   :  { %2621 = vmatpush3.msra.mxu0 %v81_v2  ;;  %2729 = vmatpush3.msra.mxu1 %v81_v2 }
   0x8   :  { %2622 = vmatprep.subr.mxu0 %v80_v3  ;;  %2725 = vmatprep.subr.mxu1 %v80_v3 }
   0x9   :  { %2623 = vmatpush3.msra.mxu0 %v80_v3  ;;  %2730 = vmatpush3.msra.mxu1 %v80_v3 }
   0xa   :  { %2624 = vmatprep.subr.mxu0 %v79_v4  ;;  %2726 = vmatprep.subr.mxu1 %v79_v4 }
   0xb   :  { %2625 = vmatpush3.msra.mxu0 %v79_v4  ;;  %2731 = vmatpush3.msra.mxu1 %v79_v4 }
   0xc   :  { %2626 = vmatprep.mubr.msk.f32.mxu0 %vm91_vm1, %v15_v5  ;;  %2674 = vmatprep.mubr.msk.f32.mxu1 %vm91_vm1, %v47_v6 }
   0xd   :  { %2627 = vmatmul.mubr.msk.f32.vlgmr.msra.gmra.mxu0 %vm91_vm1, %v16_v7  ;;  %2675 = vmatmul.mubr.msk.f32.vlgmr.msra.gmra.mxu1 %vm91_vm1, %v48_v8 }
   0xe   :  { %2629 = vmatprep.mubr.msk.f32.mxu0 %vm91_vm1, %v17_v9  ;;  %2677 = vmatprep.mubr.msk.f32.mxu1 %vm91_vm1, %v49_v10 }
  0x11   :  { %2630 = vmatmul.mubr.msk.f32.gmra.mxu0 %vm91_vm1, %v18_v11  ;;  %2678 = vmatmul.mubr.msk.f32.gmra.mxu1 %vm91_vm1, %v50_v12 }
  0x12   :  { %2632 = vmatprep.mubr.msk.f32.mxu0 %vm91_vm1, %v19_v13  ;;  %2680 = vmatprep.mubr.msk.f32.mxu1 %vm91_vm1, %v51_v14 }
  0x13   :  { %8 = vsyncpa [#allocation3], 0  ;;  %v21_v17 = vld [vmem:[%s6262_s0 + $0x30] sm:$0xff]  ;;  %v22_v19 = vld [vmem:[%s6262_s0 + $0x38] sm:$0xff]  ;;  %s3019_s12 = smov 2   ;;  %s3020_s13 = smov 126  }
  0x14   :  { %v53_v18 = vld [vmem:[%s6262_s0 + $0x130] sm:$0xff]  ;;  %v54_v20 = vld [vmem:[%s6262_s0 + $0x138] sm:$0xff]  ;;  %v23_v21 = vld [vmem:[%s6262_s0 + $0x40] sm:$0xff]  ;;  %s3021_s14 = smov [#allocation2]  }
  0x15   :  { %2633 = vmatmul.mubr.msk.f32.gmra.mxu0 %vm91_vm1, %v20_v15  ;;  %2681 = vmatmul.mubr.msk.f32.gmra.mxu1 %vm91_vm1, %v52_v16  ;;  %v55_v22 = vld [vmem:[%s6262_s0 + $0x140] sm:$0xff]  ;;  %v24_v23 = vld [vmem:[%s6262_s0 + $0x48] sm:$0xff]  ;;  %v25_v25 = vld [vmem:[%s6262_s0 + $0x50] sm:$0xff]  ;;  %s2470_s15 = sshll.u32 %s3021_s14, 4  ;;  %s2471_s15 = int_to_ptr.vmem [resolvable:$true] %s2470_s15 }
  0x16   :  { %2635 = vmatprep.mubr.msk.f32.mxu0 %vm91_vm1, %v21_v17  ;;  %2683 = vmatprep.mubr.msk.f32.mxu1 %vm91_vm1, %v53_v18  ;;  %v56_v24 = vld [vmem:[%s6262_s0 + $0x148] sm:$0xff]  ;;  %v57_v26 = vld [vmem:[%s6262_s0 + $0x150] sm:$0xff]  ;;  %v26_v27 = vld [vmem:[%s6262_s0 + $0x58] sm:$0xff]  ;;  %s2995_s16 = scalar_lea.vmem %s2471_s15, 8192  ;;  %p3000_p1 = scmp.lt.s32.totalorder %s2471_s15, %s2471_s15 }
  0x17   :  { %v58_v28 = vld [vmem:[%s6262_s0 + $0x158] sm:$0xff]  ;;  %v27_v29 = vld [vmem:[%s6262_s0 + $0x60] sm:$0xff]  ;;  %v28_v31 = vld [vmem:[%s6262_s0 + $0x68] sm:$0xff]  ;;  %p2996_p0 = scmp.ne.s32.totalorder %s2471_s15, %s2995_s16  ;;  %p3001_p2 = scmp.lt.s32.totalorder %s2995_s16, %s2995_s16 }
  0x18   :  { %v59_v30 = vld [vmem:[%s6262_s0 + $0x160] sm:$0xff]  ;;  %v60_v32 = vld [vmem:[%s6262_s0 + $0x168] sm:$0xff]  ;;  %v29_v33 = vld [vmem:[%s6262_s0 + $0x70] sm:$0xff] }
  0x19   :  { %2636 = vmatmul.mubr.msk.f32.gmra.mxu0 %vm91_vm1, %v22_v19  ;;  %2684 = vmatmul.mubr.msk.f32.gmra.mxu1 %vm91_vm1, %v54_v20  ;;  %v61_v34 = vld [vmem:[%s6262_s0 + $0x170] sm:$0xff]  ;;  %v30_v35 = vld [vmem:[%s6262_s0 + $0x78] sm:$0xff]  ;;  %v31_v37 = vld [vmem:[%s6262_s0 + $0x80] sm:$0xff]  ;;  %p3002_p3 = por %p3001_p2, %p3000_p1 }
  0x1a   :  { %2638 = vmatprep.mubr.msk.f32.mxu0 %vm91_vm1, %v23_v21  ;;  %2686 = vmatprep.mubr.msk.f32.mxu1 %vm91_vm1, %v55_v22  ;;  %v62_v36 = vld [vmem:[%s6262_s0 + $0x178] sm:$0xff]  ;;  %v63_v38 = vld [vmem:[%s6262_s0 + $0x180] sm:$0xff]  ;;  %v32_v39 = vld [vmem:[%s6262_s0 + $0x88] sm:$0xff] }
  0x1b   :  { %v64_v40 = vld [vmem:[%s6262_s0 + $0x188] sm:$0xff]  ;;  %v33_v41 = vld [vmem:[%s6262_s0 + $0x90] sm:$0xff]  ;;  %v34_v43 = vld [vmem:[%s6262_s0 + $0x98] sm:$0xff]  ;;  %p3003_p4 = pnand %p3002_p3, %p2996_p0 }
  0x1c   :  { %v65_v42 = vld [vmem:[%s6262_s0 + $0x190] sm:$0xff]  ;;  %v66_v44 = vld [vmem:[%s6262_s0 + $0x198] sm:$0xff]  ;;  %v35_v45 = vld [vmem:[%s6262_s0 + $0xa0] sm:$0xff] }
  0x1d   :  { %2639 = vmatmul.mubr.msk.f32.gmra.mxu0 %vm91_vm1, %v24_v23  ;;  %2687 = vmatmul.mubr.msk.f32.gmra.mxu1 %vm91_vm1, %v56_v24  ;;  %v67_v46 = vld [vmem:[%s6262_s0 + $0x1a0] sm:$0xff]  ;;  %v36_v47 = vld [vmem:[%s6262_s0 + $0xa8] sm:$0xff]  ;;  %v37_v49 = vld [vmem:[%s6262_s0 + $0xb0] sm:$0xff] }
  0x1e   :  { %2641 = vmatprep.mubr.msk.f32.mxu0 %vm91_vm1, %v25_v25  ;;  %2689 = vmatprep.mubr.msk.f32.mxu1 %vm91_vm1, %v57_v26  ;;  %v68_v48 = vld [vmem:[%s6262_s0 + $0x1a8] sm:$0xff]  ;;  %v38_v50 = vld [vmem:[%s6262_s0 + $0xb8] sm:$0xff]  ;;  %v69_v51 = vld [vmem:[%s6262_s0 + $0x1b0] sm:$0xff] }
  0x1f   :  { %v70_v52 = vld [vmem:[%s6262_s0 + $0x1b8] sm:$0xff]  ;;  %v39_v53 = vld [vmem:[%s6262_s0 + $0xc0] sm:$0xff]  ;;  %v40_v54 = vld [vmem:[%s6262_s0 + $0xc8] sm:$0xff] }
  0x20   :  { %v71_v55 = vld [vmem:[%s6262_s0 + $0x1c0] sm:$0xff]  ;;  %v72_v56 = vld [vmem:[%s6262_s0 + $0x1c8] sm:$0xff]  ;;  %v41_v57 = vld [vmem:[%s6262_s0 + $0xd0] sm:$0xff] }
  0x21   :  { %2642 = vmatmul.mubr.msk.f32.gmra.mxu0 %vm91_vm1, %v26_v27  ;;  %2690 = vmatmul.mubr.msk.f32.gmra.mxu1 %vm91_vm1, %v58_v28  ;;  %v42_v58 = vld [vmem:[%s6262_s0 + $0xd8] sm:$0xff]  ;;  %v73_v59 = vld [vmem:[%s6262_s0 + $0x1d0] sm:$0xff]  ;;  %v43_v61 = vld [vmem:[%s6262_s0 + $0xe0] sm:$0xff] }
  0x22   :  { %2644 = vmatprep.mubr.msk.f32.mxu0 %vm91_vm1, %v27_v29  ;;  %2692 = vmatprep.mubr.msk.f32.mxu1 %vm91_vm1, %v59_v30  ;;  %v74_v60 = vld [vmem:[%s6262_s0 + $0x1d8] sm:$0xff]  ;;  %v44_v62 = vld [vmem:[%s6262_s0 + $0xe8] sm:$0xff]  ;;  %v75_v63 = vld [vmem:[%s6262_s0 + $0x1e0] sm:$0xff] }
  0x23   :  { %v76_v0 = vld [vmem:[%s6262_s0 + $0x1e8] sm:$0xff]  ;;  %v45_v1 = vld [vmem:[%s6262_s0 + $0xf0] sm:$0xff]  ;;  %v46_v2 = vld [vmem:[%s6262_s0 + $0xf8] sm:$0xff] }
  0x24   :  { %v77_v3 = vld [vmem:[%s6262_s0 + $0x1f0] sm:$0xff]  ;;  %v78_v4 = vld [vmem:[%s6262_s0 + $0x1f8] sm:$0xff]  ;;  %v3318_v5 = vld [vmem:[%s6264_s2] ss:$0 sm:$0xff]  ;;  %s3017_s0 = smov 1   ;;  %s3018_s2 = smov 127  }
  0x25   :  { %2645 = vmatmul.mubr.msk.f32.gmra.mxu0 %vm91_vm1, %v28_v31  ;;  %2693 = vmatmul.mubr.msk.f32.gmra.mxu1 %vm91_vm1, %v60_v32 }
  0x26   :  { %2647 = vmatprep.mubr.msk.f32.mxu0 %vm91_vm1, %v29_v33  ;;  %2695 = vmatprep.mubr.msk.f32.mxu1 %vm91_vm1, %v61_v34 }
  0x29   :  { %2648 = vmatmul.mubr.msk.f32.gmra.mxu0 %vm91_vm1, %v30_v35  ;;  %2696 = vmatmul.mubr.msk.f32.gmra.mxu1 %vm91_vm1, %v62_v36 }
  0x2a   :  { %2650 = vmatprep.mubr.msk.f32.mxu0 %vm91_vm1, %v31_v37  ;;  %2698 = vmatprep.mubr.msk.f32.mxu1 %vm91_vm1, %v63_v38 }
  0x2d   :  { %2651 = vmatmul.mubr.msk.f32.gmra.mxu0 %vm91_vm1, %v32_v39  ;;  %2699 = vmatmul.mubr.msk.f32.gmra.mxu1 %vm91_vm1, %v64_v40 }
  0x2e   :  { %2653 = vmatprep.mubr.msk.f32.mxu0 %vm91_vm1, %v33_v41  ;;  %2701 = vmatprep.mubr.msk.f32.mxu1 %vm91_vm1, %v65_v42 }
  0x31   :  { %2654 = vmatmul.mubr.msk.f32.gmra.mxu0 %vm91_vm1, %v34_v43  ;;  %2702 = vmatmul.mubr.msk.f32.gmra.mxu1 %vm91_vm1, %v66_v44 }
  0x32   :  { %2656 = vmatprep.mubr.msk.f32.mxu0 %vm91_vm1, %v35_v45  ;;  %2704 = vmatprep.mubr.msk.f32.mxu1 %vm91_vm1, %v67_v46 }
  0x35   :  { %2657 = vmatmul.mubr.msk.f32.gmra.mxu0 %vm91_vm1, %v36_v47  ;;  %2705 = vmatmul.mubr.msk.f32.gmra.mxu1 %vm91_vm1, %v68_v48 }
  0x36   :  { %2659 = vmatprep.mubr.msk.f32.mxu0 %vm91_vm1, %v37_v49  ;;  %2707 = vmatprep.mubr.msk.f32.mxu1 %vm91_vm1, %v69_v51 }
  0x39   :  { %2660 = vmatmul.mubr.msk.f32.gmra.mxu0 %vm91_vm1, %v38_v50  ;;  %2708 = vmatmul.mubr.msk.f32.gmra.mxu1 %vm91_vm1, %v70_v52 }
  0x3a   :  { %2662 = vmatprep.mubr.msk.f32.mxu0 %vm91_vm1, %v39_v53  ;;  %2710 = vmatprep.mubr.msk.f32.mxu1 %vm91_vm1, %v71_v55 }
  0x3d   :  { %2663 = vmatmul.mubr.msk.f32.gmra.mxu0 %vm91_vm1, %v40_v54  ;;  %2711 = vmatmul.mubr.msk.f32.gmra.mxu1 %vm91_vm1, %v72_v56 }
  0x3e   :  { %2665 = vmatprep.mubr.msk.f32.mxu0 %vm91_vm1, %v41_v57  ;;  %2713 = vmatprep.mubr.msk.f32.mxu1 %vm91_vm1, %v73_v59 }
  0x41   :  { %2666 = vmatmul.mubr.msk.f32.gmra.mxu0 %vm91_vm1, %v42_v58  ;;  %2714 = vmatmul.mubr.msk.f32.gmra.mxu1 %vm91_vm1, %v74_v60 }
  0x42   :  { %2668 = vmatprep.mubr.msk.f32.mxu0 %vm91_vm1, %v43_v61  ;;  %2716 = vmatprep.mubr.msk.f32.mxu1 %vm91_vm1, %v75_v63 }
  0x45   :  { %2669 = vmatmul.mubr.msk.f32.gmra.mxu0 %vm91_vm1, %v44_v62  ;;  %2717 = vmatmul.mubr.msk.f32.gmra.mxu1 %vm91_vm1, %v76_v0 }
  0x46   :  { %2671 = vmatprep.mubr.msk.f32.mxu0 %vm91_vm1, %v45_v1  ;;  %2719 = vmatprep.mubr.msk.f32.mxu1 %vm91_vm1, %v77_v3 }
  0x49   :  { %2672 = vmatmul.mubr.msk.f32.gmra.mxu0 %vm91_vm1, %v46_v2  ;;  %2720 = vmatmul.mubr.msk.f32.gmra.mxu1 %vm91_vm1, %v78_v4 }
  0xcd   :  { %v2628_v6 = vpop.f32.mrf.mxu0  ;;  %v2676_v7 = vpop.f32.mrf.mxu1 }
  0xce   :  { %v360_v8 = vadd.f32 %v2628_v6, %v3318_v5  ;;  %v520_v9 = vadd.f32 %v2676_v7, %v3318_v5 }
  0xcf   :  { %v354_v10 = vpop.f32.mrf.mxu0  ;;  %v514_v11 = vpop.f32.mrf.mxu1 }
  0xd0   :  { %v3322_v12 = vmax.f32 %v360_v8, 0.0  ;;  %v3324_v13 = vmax.f32 %v520_v9, 0.0  ;;  %v355_v14 = vadd.f32 %v3318_v5, %v354_v10  ;;  %v515_v18 = vadd.f32 %v3318_v5, %v514_v11 }
  0xd1   :  { %v2631_v21 = vpop.f32.mrf.mxu0  ;;  %v2679_v24 = vpop.f32.mrf.mxu1 }
  0xd2   :  { %6373 = vst [vmem:[#allocation5_spill] sm:$0xff] %v3322_v12  ;;  %6374 = vst [vmem:[#allocation6_spill] sm:$0xff] %v3324_v13  ;;  %v3329_v15 = vmul.f32 %v3322_v12, %v3322_v12  ;;  %v3333_v16 = vmul.f32 %v3324_v13, %v3324_v13  ;;  %v3335_v17 = vmax.f32 %v355_v14, 0.0  ;;  %v3346_v20 = vmax.f32 %v515_v18, 0.0 }
  0xd3   :  { %v370_v22 = vadd.f32 %v2631_v21, %v3318_v5  ;;  %v530_v26 = vadd.f32 %v2679_v24, %v3318_v5  ;;  %v524_v27 = vpop.f32.mrf.mxu1  ;;  %v364_v31 = vpop.f32.mrf.mxu0 }
  0xd4   :  { %6375 = vst [vmem:[#allocation7_spill] sm:$0xff] %v3335_v17  ;;  %867 = vrot.lane.b32.xlu1 %v3333_v16, %s3017_s0  ;;  %803 = vrot.lane.b32.xlu0 %v3329_v15, %s3017_s0  ;;  %v3344_v19 = vmul.f32 %v3335_v17, %v3335_v17  ;;  %6376 = vst [vmem:[#allocation8_spill] sm:$0xff] %v3346_v20  ;;  %v3355_v23 = vmul.f32 %v3346_v20, %v3346_v20 }
  0xd5   :  { %v3357_v25 = vmax.f32 %v370_v22, 0.0  ;;  %v3368_v29 = vmax.f32 %v530_v26, 0.0  ;;  %v525_v30 = vadd.f32 %v3318_v5, %v524_v27  ;;  %v365_v33 = vadd.f32 %v3318_v5, %v364_v31  ;;  %v2634_v37 = vpop.f32.mrf.mxu0  ;;  %v2682_v40 = vpop.f32.mrf.mxu1 }
  0xd6   :  { %v380_v41 = vadd.f32 %v2634_v37, %v3318_v5  ;;  %v540_v46 = vadd.f32 %v2682_v40, %v3318_v5 }
  0xd7   :  { %6377 = vst [vmem:[#allocation9_spill] sm:$0xff] %v3357_v25  ;;  %v3366_v28 = vmul.f32 %v3357_v25, %v3357_v25  ;;  %6379 = vst [vmem:[#allocation11_spill] sm:$0xff] %v3368_v29  ;;  %v3377_v32 = vmul.f32 %v3368_v29, %v3368_v29  ;;  %v3384_v34 = vmax.f32 %v525_v30, 0.0  ;;  %v3390_v35 = vmax.f32 %v365_v33, 0.0  ;;  %v374_v39 = vpop.f32.mrf.mxu0  ;;  %v534_v43 = vpop.f32.mrf.mxu1 }
  0xd8   :  { %995 = vrot.lane.b32.xlu1 %v3329_v15, %s3018_s2  ;;  %801 = vrot.lane.b32.xlu0 %v3344_v19, %s3017_s0  ;;  %v375_v42 = vadd.f32 %v3318_v5, %v374_v39  ;;  %v3414_v44 = vmax.f32 %v380_v41, 0.0  ;;  %v535_v47 = vadd.f32 %v3318_v5, %v534_v43  ;;  %v3432_v50 = vmax.f32 %v540_v46, 0.0 }
  0xd9   :  { %6378 = vst [vmem:[#allocation10_spill] sm:$0xff] %v3366_v28  ;;  %6380 = vst [vmem:[#allocation12_spill] sm:$0xff] %v3384_v34  ;;  %v3394_v36 = vmul.f32 %v3384_v34, %v3384_v34  ;;  %v3402_v38 = vmul.f32 %v3390_v35, %v3390_v35  ;;  %v2637_v54 = vpop.f32.mrf.mxu0  ;;  %v2685_v56 = vpop.f32.mrf.mxu1 }
  0xda   :  { %6381 = vst [vmem:[#allocation13_spill] sm:$0xff] %v3390_v35  ;;  %6383 = vst [vmem:[#allocation15_spill] sm:$0xff] %v3414_v44  ;;  %v3416_v45 = vmax.f32 %v375_v42, 0.0  ;;  %v3426_v48 = vmul.f32 %v3414_v44, %v3414_v44  ;;  %v3434_v51 = vmax.f32 %v535_v47, 0.0  ;;  %v3442_v52 = vmul.f32 %v3432_v50, %v3432_v50 }
  0xdb   :  { %6382 = vst [vmem:[#allocation14_spill] sm:$0xff] %v3402_v38  ;;  %6387 = vst [vmem:[#allocation19_spill] sm:$0xff] %v3432_v50  ;;  %v384_v55 = vpop.f32.mrf.mxu0  ;;  %v390_v57 = vadd.f32 %v2637_v54, %v3318_v5  ;;  %v544_v59 = vpop.f32.mrf.mxu1  ;;  %v550_v62 = vadd.f32 %v2685_v56, %v3318_v5 }
  0xdc   :  { %1059 = vrot.lane.b32.xlu1 %v3333_v16, %s3018_s2  ;;  %865 = vrot.lane.b32.xlu0 %v3355_v23, %s3017_s0  ;;  %6384 = vst [vmem:[#allocation16_spill] sm:$0xff] %v3416_v45  ;;  %6385 = vst [vmem:[#allocation17_spill] sm:$0xff] %v3426_v48  ;;  %v3430_v49 = vmul.f32 %v3416_v45, %v3416_v45  ;;  %v3446_v53 = vmul.f32 %v3434_v51, %v3434_v51 }
  0xdd   :  { %6388 = vst [vmem:[#allocation20_spill] sm:$0xff] %v3434_v51  ;;  %v385_v58 = vadd.f32 %v3318_v5, %v384_v55  ;;  %v3462_v60 = vmax.f32 %v390_v57, 0.0  ;;  %v545_v63 = vadd.f32 %v3318_v5, %v544_v59  ;;  %v3480_v2 = vmax.f32 %v550_v62, 0.0  ;;  %v2640_v7 = vpop.f32.mrf.mxu0  ;;  %v2688_v9 = vpop.f32.mrf.mxu1 }
  0xde   :  { %6386 = vst [vmem:[#allocation18_spill] sm:$0xff] %v3430_v49  ;;  %v400_v10 = vadd.f32 %v2640_v7, %v3318_v5  ;;  %v560_v22 = vadd.f32 %v2688_v9, %v3318_v5 }
  0xdf   :  { %6389 = vst [vmem:[#allocation21_spill] sm:$0xff] %v3462_v60  ;;  %v3464_v61 = vmax.f32 %v385_v58, 0.0  ;;  %v3474_v0 = vmul.f32 %v3462_v60, %v3462_v60  ;;  %6393 = vst [vmem:[#allocation25_spill] sm:$0xff] %v3480_v2  ;;  %v3482_v3 = vmax.f32 %v545_v63, 0.0  ;;  %v3490_v4 = vmul.f32 %v3480_v2, %v3480_v2  ;;  %v394_v8 = vpop.f32.mrf.mxu0  ;;  %v554_v14 = vpop.f32.mrf.mxu1 }
  0xe0   :  { %1187 = vrot.lane.b32.xlu1 %v3329_v15, %s3019_s12  ;;  %993 = vrot.lane.b32.xlu0 %v3344_v19, %s3018_s2  ;;  %v395_v11 = vadd.f32 %v3318_v5, %v394_v8  ;;  %v3510_v18 = vmax.f32 %v400_v10, 0.0  ;;  %v555_v24 = vadd.f32 %v3318_v5, %v554_v14  ;;  %v3528_v30 = vmax.f32 %v560_v22, 0.0 }
  0xe1   :  { %6390 = vst [vmem:[#allocation22_spill] sm:$0xff] %v3464_v61  ;;  %6391 = vst [vmem:[#allocation23_spill] sm:$0xff] %v3474_v0  ;;  %v3478_v1 = vmul.f32 %v3464_v61, %v3464_v61  ;;  %v3494_v6 = vmul.f32 %v3482_v3, %v3482_v3  ;;  %v2643_v39 = vpop.f32.mrf.mxu0  ;;  %v2691_v42 = vpop.f32.mrf.mxu1 }
  0xe2   :  { %6394 = vst [vmem:[#allocation26_spill] sm:$0xff] %v3482_v3  ;;  %6395 = vst [vmem:[#allocation27_spill] sm:$0xff] %v3510_v18  ;;  %v3512_v21 = vmax.f32 %v395_v11, 0.0  ;;  %v3522_v26 = vmul.f32 %v3510_v18, %v3510_v18  ;;  %v3530_v31 = vmax.f32 %v555_v24, 0.0  ;;  %v3538_v33 = vmul.f32 %v3528_v30, %v3528_v30 }
  0xe3   :  { %6392 = vst [vmem:[#allocation24_spill] sm:$0xff] %v3478_v1  ;;  %6398 = vst [vmem:[#allocation30_spill] sm:$0xff] %v3528_v30  ;;  %v410_v40 = vadd.f32 %v2643_v39, %v3318_v5  ;;  %v404_v41 = vpop.f32.mrf.mxu0  ;;  %v570_v46 = vadd.f32 %v2691_v42, %v3318_v5  ;;  %v564_v54 = vpop.f32.mrf.mxu1 }
  0xe4   :  { %807 = vrot.lane.b32.xlu1 %v3366_v28, %s3017_s0  ;;  %1057 = vrot.lane.b32.xlu0 %v3355_v23, %s3018_s2  ;;  %6396 = vst [vmem:[#allocation28_spill] sm:$0xff] %v3512_v21  ;;  %v3526_v27 = vmul.f32 %v3512_v21, %v3512_v21  ;;  %6399 = vst [vmem:[#allocation31_spill] sm:$0xff] %v3530_v31  ;;  %v3542_v37 = vmul.f32 %v3530_v31, %v3530_v31 }
  0xe5   :  { %v3549_v43 = vmax.f32 %v410_v40, 0.0  ;;  %v405_v47 = vadd.f32 %v3318_v5, %v404_v41  ;;  %v3561_v56 = vmax.f32 %v570_v46, 0.0  ;;  %v565_v58 = vadd.f32 %v3318_v5, %v564_v54  ;;  %v2646_v7 = vpop.f32.mrf.mxu0  ;;  %v2694_v11 = vpop.f32.mrf.mxu1 }
  0xe6   :  { %6397 = vst [vmem:[#allocation29_spill] sm:$0xff] %v3526_v27  ;;  %v420_v8 = vadd.f32 %v2646_v7, %v3318_v5  ;;  %v580_v22 = vadd.f32 %v2694_v11, %v3318_v5 }
  0xe7   :  { %6400 = vst [vmem:[#allocation32_spill] sm:$0xff] %v3549_v43  ;;  %v3559_v55 = vmul.f32 %v3549_v43, %v3549_v43  ;;  %6401 = vst [vmem:[#allocation33_spill] sm:$0xff] %v3561_v56  ;;  %v3567_v57 = vmax.f32 %v405_v47, 0.0  ;;  %v3572_v59 = vmul.f32 %v3561_v56, %v3561_v56  ;;  %v3582_v63 = vmax.f32 %v565_v58, 0.0  ;;  %v414_v10 = vpop.f32.mrf.mxu0  ;;  %v574_v39 = vpop.f32.mrf.mxu1 }
  0xe8   :  { %871 = vrot.lane.b32.xlu1 %v3377_v32, %s3017_s0  ;;  %1185 = vrot.lane.b32.xlu0 %v3344_v19, %s3019_s12  ;;  %v3593_v14 = vmax.f32 %v420_v8, 0.0  ;;  %v415_v24 = vadd.f32 %v3318_v5, %v414_v10  ;;  %v3605_v41 = vmax.f32 %v580_v22, 0.0  ;;  %v575_v46 = vadd.f32 %v3318_v5, %v574_v39 }
  0xe9   :  { %6402 = vst [vmem:[#allocation34_spill] sm:$0xff] %v3567_v57  ;;  %v3580_v62 = vmul.f32 %v3567_v57, %v3567_v57  ;;  %6403 = vst [vmem:[#allocation35_spill] sm:$0xff] %v3582_v63  ;;  %v3591_v9 = vmul.f32 %v3582_v63, %v3582_v63  ;;  %v2649_v10 = vpop.f32.mrf.mxu0 }
  0xea   :  { %6404 = vst [vmem:[#allocation36_spill] sm:$0xff] %v3593_v14  ;;  %v3603_v40 = vmul.f32 %v3593_v14, %v3593_v14  ;;  %6405 = vst [vmem:[#allocation37_spill] sm:$0xff] %v3605_v41  ;;  %v3611_v42 = vmax.f32 %v415_v24, 0.0  ;;  %v3616_v47 = vmul.f32 %v3605_v41, %v3605_v41  ;;  %v3626_v58 = vmax.f32 %v575_v46, 0.0  ;;  %v2697_v41 = vpop.f32.mrf.mxu1 }
  0xeb   :  { %v430_v11 = vadd.f32 %v2649_v10, %v3318_v5  ;;  %v424_v46 = vpop.f32.mrf.mxu0  ;;  %v590_v10 = vadd.f32 %v2697_v41, %v3318_v5 }
  0xec   :  { %999 = vrot.lane.b32.xlu1 %v3366_v28, %s3018_s2  ;;  %869 = vrot.lane.b32.xlu0 %v3394_v36, %s3017_s0  ;;  %6406 = vst [vmem:[#allocation38_spill] sm:$0xff] %v3611_v42  ;;  %v3624_v54 = vmul.f32 %v3611_v42, %v3611_v42  ;;  %6407 = vst [vmem:[#allocation39_spill] sm:$0xff] %v3626_v58  ;;  %v3639_v22 = vmul.f32 %v3626_v58, %v3626_v58  ;;  %v584_v30 = vpop.f32.mrf.mxu1 }
  0xed   :  { %v3645_v63 = vmax.f32 %v430_v11, 0.0  ;;  %v425_v56 = vadd.f32 %v3318_v5, %v424_v46  ;;  %v3661_v11 = vmax.f32 %v590_v10, 0.0  ;;  %v585_v46 = vadd.f32 %v3318_v5, %v584_v30  ;;  %v2652_v29 = vpop.f32.mrf.mxu0 }
  0xef   :  { %6412 = vst [vmem:[#allocation44_spill] sm:$0xff] %v3645_v63  ;;  %v3659_v3 = vmul.f32 %v3645_v63, %v3645_v63  ;;  %6415 = vst [vmem:[#allocation47_spill] sm:$0xff] %v3661_v11  ;;  %v3667_v41 = vmax.f32 %v425_v56, 0.0  ;;  %v3676_v50 = vmul.f32 %v3661_v11, %v3661_v11  ;;  %v3686_v10 = vmax.f32 %v585_v46, 0.0  ;;  %v2700_v63 = vpop.f32.mrf.mxu1 }
  0xf0   :  { %1063 = vrot.lane.b32.xlu1 %v3377_v32, %s3018_s2  ;;  %997 = vrot.lane.b32.xlu0 %v3402_v38, %s3018_s2  ;;  %v440_v11 = vadd.f32 %v2652_v29, %v3318_v5  ;;  %v600_v29 = vadd.f32 %v2700_v63, %v3318_v5 }
  0xf1   :  { %6416 = vst [vmem:[#allocation48_spill] sm:$0xff] %v3667_v41  ;;  %v3684_v56 = vmul.f32 %v3667_v41, %v3667_v41  ;;  %6419 = vst [vmem:[#allocation51_spill] sm:$0xff] %v3686_v10  ;;  %v3699_v20 = vmul.f32 %v3686_v10, %v3686_v10  ;;  %v434_v41 = vpop.f32.mrf.mxu0  ;;  %v594_v43 = vpop.f32.mrf.mxu1 }
  0xf2   :  { %v3705_v42 = vmax.f32 %v440_v11, 0.0  ;;  %v435_v14 = vadd.f32 %v3318_v5, %v434_v41  ;;  %v3721_v11 = vmax.f32 %v600_v29, 0.0  ;;  %v595_v41 = vadd.f32 %v3318_v5, %v594_v43 }
  0xf3   :  { %v2655_v45 = vpop.f32.mrf.mxu0  ;;  %v2703_v25 = vpop.f32.mrf.mxu1 }
  0xf4   :  { %1191 = vrot.lane.b32.xlu1 %v3366_v28, %s3019_s12  ;;  %1061 = vrot.lane.b32.xlu0 %v3394_v36, %s3018_s2  ;;  %6424 = vst [vmem:[#allocation56_spill] sm:$0xff] %v3705_v42  ;;  %v3719_v21 = vmul.f32 %v3705_v42, %v3705_v42  ;;  %6427 = vst [vmem:[#allocation59_spill] sm:$0xff] %v3721_v11  ;;  %v3727_v63 = vmax.f32 %v435_v14, 0.0  ;;  %v3736_v42 = vmul.f32 %v3721_v11, %v3721_v11 }
  0xf5   :  { %v3746_v29 = vmax.f32 %v595_v41, 0.0  ;;  %v450_v11 = vadd.f32 %v2655_v45, %v3318_v5  ;;  %v444_v35 = vpop.f32.mrf.mxu0  ;;  %v610_v45 = vadd.f32 %v2703_v25, %v3318_v5 }
  0xf6   :  { %6428 = vst [vmem:[#allocation60_spill] sm:$0xff] %v3727_v63  ;;  %v3744_v14 = vmul.f32 %v3727_v63, %v3727_v63  ;;  %v445_v12 = vadd.f32 %v3318_v5, %v444_v35 }
  0xf7   :  { %6431 = vst [vmem:[#allocation63_spill] sm:$0xff] %v3746_v29  ;;  %v3759_v44 = vmul.f32 %v3746_v29, %v3746_v29  ;;  %v3765_v17 = vmax.f32 %v450_v11, 0.0  ;;  %v3781_v11 = vmax.f32 %v610_v45, 0.0 }
  0xf8   :  { %805 = vrot.lane.b32.xlu1 %v3402_v38, %s3017_s0  ;;  %1189 = vrot.lane.b32.xlu0 %v3402_v38, %s3019_s12  ;;  %v3787_v25 = vmax.f32 %v445_v12, 0.0 }
  0xf9   :  { %6436 = vst [vmem:[#allocation68_spill] sm:$0xff] %v3765_v17  ;;  %6439 = vst [vmem:[#allocation71_spill] sm:$0xff] %v3781_v11 }
  0xfa   :  { %6440 = vst [vmem:[#allocation72_spill] sm:$0xff] %v3787_v25  ;;  %v3804_v12 = vmul.f32 %v3787_v25, %v3787_v25 }
  0xfc   :  { %811 = vrot.lane.b32.xlu1 %v3426_v48, %s3017_s0  ;;  %809 = vrot.lane.b32.xlu0 %v3430_v49, %s3017_s0 }
 0x100   :  { %875 = vrot.lane.b32.xlu1 %v3442_v52, %s3017_s0  ;;  %873 = vrot.lane.b32.xlu0 %v3446_v53, %s3017_s0 }
 0x104   :  { %1003 = vrot.lane.b32.xlu1 %v3426_v48, %s3018_s2  ;;  %1001 = vrot.lane.b32.xlu0 %v3430_v49, %s3018_s2 }
 0x108   :  { %1067 = vrot.lane.b32.xlu1 %v3442_v52, %s3018_s2  ;;  %1065 = vrot.lane.b32.xlu0 %v3446_v53, %s3018_s2 }
 0x10c   :  { %1195 = vrot.lane.b32.xlu1 %v3426_v48, %s3019_s12  ;;  %1193 = vrot.lane.b32.xlu0 %v3430_v49, %s3019_s12 }
 0x110   :  { %815 = vrot.lane.b32.xlu1 %v3474_v0, %s3017_s0  ;;  %813 = vrot.lane.b32.xlu0 %v3478_v1, %s3017_s0 }
 0x114   :  { %879 = vrot.lane.b32.xlu1 %v3490_v4, %s3017_s0  ;;  %877 = vrot.lane.b32.xlu0 %v3494_v6, %s3017_s0 }
 0x118   :  { %1007 = vrot.lane.b32.xlu1 %v3474_v0, %s3018_s2  ;;  %1005 = vrot.lane.b32.xlu0 %v3478_v1, %s3018_s2 }
 0x11c   :  { %1071 = vrot.lane.b32.xlu1 %v3490_v4, %s3018_s2  ;;  %1069 = vrot.lane.b32.xlu0 %v3494_v6, %s3018_s2 }
 0x120   :  { %1199 = vrot.lane.b32.xlu1 %v3474_v0, %s3019_s12  ;;  %1197 = vrot.lane.b32.xlu0 %v3478_v1, %s3019_s12 }
 0x124   :  { %819 = vrot.lane.b32.xlu1 %v3522_v26, %s3017_s0  ;;  %817 = vrot.lane.b32.xlu0 %v3526_v27, %s3017_s0 }
 0x128   :  { %883 = vrot.lane.b32.xlu1 %v3538_v33, %s3017_s0  ;;  %881 = vrot.lane.b32.xlu0 %v3542_v37, %s3017_s0 }
 0x12c   :  { %1011 = vrot.lane.b32.xlu1 %v3522_v26, %s3018_s2  ;;  %1009 = vrot.lane.b32.xlu0 %v3526_v27, %s3018_s2 }
 0x130   :  { %1075 = vrot.lane.b32.xlu1 %v3538_v33, %s3018_s2  ;;  %1073 = vrot.lane.b32.xlu0 %v3542_v37, %s3018_s2 }
 0x134   :  { %823 = vrot.lane.b32.xlu1 %v3559_v55, %s3017_s0  ;;  %1201 = vrot.lane.b32.xlu0 %v3526_v27, %s3019_s12 }
 0x138   :  { %887 = vrot.lane.b32.xlu1 %v3572_v59, %s3017_s0  ;;  %821 = vrot.lane.b32.xlu0 %v3580_v62, %s3017_s0 }
 0x13c   :  { %1015 = vrot.lane.b32.xlu1 %v3559_v55, %s3018_s2  ;;  %885 = vrot.lane.b32.xlu0 %v3591_v9, %s3017_s0 }
 0x140   :  { %1079 = vrot.lane.b32.xlu1 %v3572_v59, %s3018_s2  ;;  %1013 = vrot.lane.b32.xlu0 %v3580_v62, %s3018_s2 }
 0x144   :  { %827 = vrot.lane.b32.xlu1 %v3603_v40, %s3017_s0  ;;  %1077 = vrot.lane.b32.xlu0 %v3591_v9, %s3018_s2 }
 0x146   :  { %v3628_v7 = vpop.permute.xlu1 %867  ;;  %v3630_v8 = vpop.permute.xlu0 %803 }
 0x147   :  { %6408 = vst [vmem:[#allocation40_spill] sm:$0xff] %v3628_v7  ;;  %6409 = vst [vmem:[#allocation41_spill] sm:$0xff] %v3630_v8 }
 0x148   :  { %891 = vrot.lane.b32.xlu1 %v3616_v47, %s3017_s0  ;;  %825 = vrot.lane.b32.xlu0 %v3624_v54, %s3017_s0 }
 0x14a   :  { %v3641_v24 = vpop.permute.xlu1 %995  ;;  %v3643_v39 = vpop.permute.xlu0 %801 }
 0x14b   :  { %6410 = vst [vmem:[#allocation42_spill] sm:$0xff] %v3641_v24  ;;  %6411 = vst [vmem:[#allocation43_spill] sm:$0xff] %v3643_v39 }
 0x14c   :  { %1019 = vrot.lane.b32.xlu1 %v3603_v40, %s3018_s2  ;;  %889 = vrot.lane.b32.xlu0 %v3639_v22, %s3017_s0 }
 0x14e   :  { %v3653_v58 = vpop.permute.xlu1 %1059  ;;  %v3655_v31 = vpop.permute.xlu0 %865 }
 0x14f   :  { %6413 = vst [vmem:[#allocation45_spill] sm:$0xff] %v3653_v58  ;;  %6414 = vst [vmem:[#allocation46_spill] sm:$0xff] %v3655_v31 }
 0x150   :  { %1083 = vrot.lane.b32.xlu1 %v3616_v47, %s3018_s2  ;;  %1017 = vrot.lane.b32.xlu0 %v3624_v54, %s3018_s2 }
 0x152   :  { %v3670_v2 = vpop.permute.xlu1 %1187  ;;  %v3672_v51 = vpop.permute.xlu0 %993 }
 0x153   :  { %6417 = vst [vmem:[#allocation49_spill] sm:$0xff] %v3670_v2  ;;  %6418 = vst [vmem:[#allocation50_spill] sm:$0xff] %v3672_v51 }
 0x154   :  { %831 = vrot.lane.b32.xlu1 %v3659_v3, %s3017_s0  ;;  %1081 = vrot.lane.b32.xlu0 %v3639_v22, %s3018_s2 }
 0x156   :  { %v3688_v30 = vpop.permute.xlu1 %807  ;;  %v3690_v34 = vpop.permute.xlu0 %1057 }
 0x157   :  { %6420 = vst [vmem:[#allocation52_spill] sm:$0xff] %v3688_v30  ;;  %6421 = vst [vmem:[#allocation53_spill] sm:$0xff] %v3690_v34 }
 0x158   :  { %895 = vrot.lane.b32.xlu1 %v3676_v50, %s3017_s0  ;;  %829 = vrot.lane.b32.xlu0 %v3684_v56, %s3017_s0 }
 0x15a   :  { %v3701_v13 = vpop.permute.xlu1 %871  ;;  %v3703_v46 = vpop.permute.xlu0 %1185 }
 0x15b   :  { %6422 = vst [vmem:[#allocation54_spill] sm:$0xff] %v3701_v13  ;;  %6423 = vst [vmem:[#allocation55_spill] sm:$0xff] %v3703_v46 }
 0x15c   :  { %1023 = vrot.lane.b32.xlu1 %v3659_v3, %s3018_s2  ;;  %893 = vrot.lane.b32.xlu0 %v3699_v20, %s3017_s0 }
 0x15e   :  { %v3713_v10 = vpop.permute.xlu1 %999  ;;  %v3715_v57 = vpop.permute.xlu0 %869 }
 0x15f   :  { %6425 = vst [vmem:[#allocation57_spill] sm:$0xff] %v3713_v10  ;;  %6426 = vst [vmem:[#allocation58_spill] sm:$0xff] %v3715_v57 }
 0x160   :  { %1087 = vrot.lane.b32.xlu1 %v3676_v50, %s3018_s2  ;;  %1021 = vrot.lane.b32.xlu0 %v3684_v56, %s3018_s2 }
 0x162   :  { %v3730_v18 = vpop.permute.xlu1 %1063  ;;  %v3732_v61 = vpop.permute.xlu0 %997 }
 0x163   :  { %6429 = vst [vmem:[#allocation61_spill] sm:$0xff] %v3730_v18  ;;  %6430 = vst [vmem:[#allocation62_spill] sm:$0xff] %v3732_v61 }
 0x164   :  { %835 = vrot.lane.b32.xlu1 %v3719_v21, %s3017_s0  ;;  %1085 = vrot.lane.b32.xlu0 %v3699_v20, %s3018_s2 }
 0x166   :  { %v3748_v43 = vpop.permute.xlu1 %1191  ;;  %v3750_v60 = vpop.permute.xlu0 %1061 }
 0x167   :  { %6432 = vst [vmem:[#allocation64_spill] sm:$0xff] %v3748_v43  ;;  %6433 = vst [vmem:[#allocation65_spill] sm:$0xff] %v3750_v60  ;;  %v604_v43 = vpop.f32.mrf.mxu1 }
 0x168   :  { %899 = vrot.lane.b32.xlu1 %v3736_v42, %s3017_s0  ;;  %833 = vrot.lane.b32.xlu0 %v3744_v14, %s3017_s0  ;;  %v605_v35 = vadd.f32 %v3318_v5, %v604_v43 }
 0x169   :  { %v2706_v46 = vpop.f32.mrf.mxu1 }
 0x16a   :  { %v3761_v63 = vpop.permute.xlu1 %805  ;;  %v3763_v41 = vpop.permute.xlu0 %1189  ;;  %v3806_v45 = vmax.f32 %v605_v35, 0.0 }
 0x16b   :  { %6434 = vst [vmem:[#allocation66_spill] sm:$0xff] %v3761_v63  ;;  %6435 = vst [vmem:[#allocation67_spill] sm:$0xff] %v3763_v41  ;;  %v3779_v41 = vmul.f32 %v3765_v17, %v3765_v17  ;;  %v3796_v17 = vmul.f32 %v3781_v11, %v3781_v11 }
 0x16c   :  { %1027 = vrot.lane.b32.xlu1 %v3719_v21, %s3018_s2  ;;  %897 = vrot.lane.b32.xlu0 %v3759_v44, %s3017_s0  ;;  %6443 = vst [vmem:[#allocation75_spill] sm:$0xff] %v3806_v45  ;;  %v3819_v18 = vmul.f32 %v3806_v45, %v3806_v45 }
 0x16e   :  { %v3773_v29 = vpop.permute.xlu1 %811  ;;  %v3775_v60 = vpop.permute.xlu0 %809 }
 0x16f   :  { %6437 = vst [vmem:[#allocation69_spill] sm:$0xff] %v3773_v29  ;;  %6438 = vst [vmem:[#allocation70_spill] sm:$0xff] %v3775_v60 }
 0x170   :  { %1091 = vrot.lane.b32.xlu1 %v3736_v42, %s3018_s2  ;;  %1025 = vrot.lane.b32.xlu0 %v3744_v14, %s3018_s2 }
 0x172   :  { %v3790_v29 = vpop.permute.xlu1 %875  ;;  %v3792_v60 = vpop.permute.xlu0 %873 }
 0x173   :  { %6441 = vst [vmem:[#allocation73_spill] sm:$0xff] %v3790_v29  ;;  %6442 = vst [vmem:[#allocation74_spill] sm:$0xff] %v3792_v60  ;;  %v2658_v60 = vpop.f32.mrf.mxu0 }
 0x174   :  { %839 = vrot.lane.b32.xlu1 %v3779_v41, %s3017_s0  ;;  %1089 = vrot.lane.b32.xlu0 %v3759_v44, %s3018_s2  ;;  %v460_v11 = vadd.f32 %v2658_v60, %v3318_v5  ;;  %v620_v60 = vadd.f32 %v2706_v46, %v3318_v5 }
 0x176   :  { %v3808_v43 = vpop.permute.xlu1 %1003  ;;  %v3810_v29 = vpop.permute.xlu0 %1001 }
 0x177   :  { %6444 = vst [vmem:[#allocation76_spill] sm:$0xff] %v3808_v43  ;;  %6445 = vst [vmem:[#allocation77_spill] sm:$0xff] %v3810_v29  ;;  %v454_v43 = vpop.f32.mrf.mxu0  ;;  %v3825_v29 = vmax.f32 %v460_v11, 0.0  ;;  %v3841_v11 = vmax.f32 %v620_v60, 0.0 }
 0x178   :  { %903 = vrot.lane.b32.xlu1 %v3796_v17, %s3017_s0  ;;  %837 = vrot.lane.b32.xlu0 %v3804_v12, %s3017_s0  ;;  %v455_v57 = vadd.f32 %v3318_v5, %v454_v43 }
 0x179   :  { %6448 = vst [vmem:[#allocation80_spill] sm:$0xff] %v3825_v29  ;;  %6451 = vst [vmem:[#allocation83_spill] sm:$0xff] %v3841_v11 }
 0x17a   :  { %v3821_v25 = vpop.permute.xlu1 %1067  ;;  %v3823_v35 = vpop.permute.xlu0 %1065  ;;  %v3847_v46 = vmax.f32 %v455_v57, 0.0 }
 0x17b   :  { %6446 = vst [vmem:[#allocation78_spill] sm:$0xff] %v3821_v25  ;;  %6447 = vst [vmem:[#allocation79_spill] sm:$0xff] %v3823_v35  ;;  %v614_v25 = vpop.f32.mrf.mxu1  ;;  %v3839_v35 = vmul.f32 %v3825_v29, %v3825_v29  ;;  %v3856_v29 = vmul.f32 %v3841_v11, %v3841_v11 }
 0x17c   :  { %1031 = vrot.lane.b32.xlu1 %v3779_v41, %s3018_s2  ;;  %901 = vrot.lane.b32.xlu0 %v3819_v18, %s3017_s0  ;;  %6452 = vst [vmem:[#allocation84_spill] sm:$0xff] %v3847_v46  ;;  %v615_v43 = vadd.f32 %v3318_v5, %v614_v25  ;;  %v3864_v57 = vmul.f32 %v3847_v46, %v3847_v46 }
 0x17d   :  { %v2709_v58 = vpop.f32.mrf.mxu1 }
 0x17e   :  { %v3833_v45 = vpop.permute.xlu1 %1195  ;;  %v3835_v34 = vpop.permute.xlu0 %1193  ;;  %v3866_v60 = vmax.f32 %v615_v43, 0.0 }
 0x17f   :  { %6449 = vst [vmem:[#allocation81_spill] sm:$0xff] %v3833_v45  ;;  %6450 = vst [vmem:[#allocation82_spill] sm:$0xff] %v3835_v34 }
 0x180   :  { %1095 = vrot.lane.b32.xlu1 %v3796_v17, %s3018_s2  ;;  %1029 = vrot.lane.b32.xlu0 %v3804_v12, %s3018_s2  ;;  %6455 = vst [vmem:[#allocation87_spill] sm:$0xff] %v3866_v60  ;;  %v3879_v2 = vmul.f32 %v3866_v60, %v3866_v60 }
 0x182   :  { %v3850_v45 = vpop.permute.xlu1 %815  ;;  %v3852_v34 = vpop.permute.xlu0 %813 }
 0x183   :  { %6453 = vst [vmem:[#allocation85_spill] sm:$0xff] %v3850_v45  ;;  %6454 = vst [vmem:[#allocation86_spill] sm:$0xff] %v3852_v34  ;;  %v2661_v34 = vpop.f32.mrf.mxu0 }
 0x184   :  { %843 = vrot.lane.b32.xlu1 %v3839_v35, %s3017_s0  ;;  %1093 = vrot.lane.b32.xlu0 %v3819_v18, %s3018_s2  ;;  %v470_v11 = vadd.f32 %v2661_v34, %v3318_v5  ;;  %v630_v34 = vadd.f32 %v2709_v58, %v3318_v5 }
 0x186   :  { %v3868_v25 = vpop.permute.xlu1 %879  ;;  %v3870_v45 = vpop.permute.xlu0 %877 }
 0x187   :  { %6456 = vst [vmem:[#allocation88_spill] sm:$0xff] %v3868_v25  ;;  %6457 = vst [vmem:[#allocation89_spill] sm:$0xff] %v3870_v45  ;;  %v464_v25 = vpop.f32.mrf.mxu0  ;;  %v3885_v45 = vmax.f32 %v470_v11, 0.0  ;;  %v3901_v11 = vmax.f32 %v630_v34, 0.0 }
 0x188   :  { %907 = vrot.lane.b32.xlu1 %v3856_v29, %s3017_s0  ;;  %841 = vrot.lane.b32.xlu0 %v3864_v57, %s3017_s0  ;;  %v465_v61 = vadd.f32 %v3318_v5, %v464_v25 }
 0x189   :  { %6460 = vst [vmem:[#allocation92_spill] sm:$0xff] %v3885_v45  ;;  %6463 = vst [vmem:[#allocation95_spill] sm:$0xff] %v3901_v11 }
 0x18a   :  { %v3881_v46 = vpop.permute.xlu1 %1007  ;;  %v3883_v43 = vpop.permute.xlu0 %1005  ;;  %v3907_v58 = vmax.f32 %v465_v61, 0.0 }
 0x18b   :  { %6458 = vst [vmem:[#allocation90_spill] sm:$0xff] %v3881_v46  ;;  %6459 = vst [vmem:[#allocation91_spill] sm:$0xff] %v3883_v43  ;;  %v624_v46 = vpop.f32.mrf.mxu1  ;;  %v3899_v43 = vmul.f32 %v3885_v45, %v3885_v45  ;;  %v3916_v45 = vmul.f32 %v3901_v11, %v3901_v11 }
 0x18c   :  { %1035 = vrot.lane.b32.xlu1 %v3839_v35, %s3018_s2  ;;  %905 = vrot.lane.b32.xlu0 %v3879_v2, %s3017_s0  ;;  %6464 = vst [vmem:[#allocation96_spill] sm:$0xff] %v3907_v58  ;;  %v625_v25 = vadd.f32 %v3318_v5, %v624_v46  ;;  %v3924_v61 = vmul.f32 %v3907_v58, %v3907_v58 }
 0x18d   :  { %6467 = vst [vmem:[#allocation99_spill] sm:$0xff] %v3916_v45  ;;  %v2712_v51 = vpop.f32.mrf.mxu1 }
 0x18e   :  { %v3893_v60 = vpop.permute.xlu1 %1071  ;;  %v3895_v10 = vpop.permute.xlu0 %1069  ;;  %6468 = vst [vmem:[#allocation100_spill] sm:$0xff] %v3924_v61  ;;  %v3926_v34 = vmax.f32 %v625_v25, 0.0 }
 0x18f   :  { %6461 = vst [vmem:[#allocation93_spill] sm:$0xff] %v3893_v60  ;;  %6462 = vst [vmem:[#allocation94_spill] sm:$0xff] %v3895_v10 }
 0x190   :  { %1099 = vrot.lane.b32.xlu1 %v3856_v29, %s3018_s2  ;;  %1033 = vrot.lane.b32.xlu0 %v3864_v57, %s3018_s2  ;;  %6469 = vst [vmem:[#allocation101_spill] sm:$0xff] %v3926_v34  ;;  %v3939_v13 = vmul.f32 %v3926_v34, %v3926_v34 }
 0x192   :  { %v3910_v60 = vpop.permute.xlu1 %1199  ;;  %v3912_v10 = vpop.permute.xlu0 %1197  ;;  %6472 = vst [vmem:[#allocation104_spill] sm:$0xff] %v3939_v13 }
 0x193   :  { %6465 = vst [vmem:[#allocation97_spill] sm:$0xff] %v3910_v60  ;;  %6466 = vst [vmem:[#allocation98_spill] sm:$0xff] %v3912_v10  ;;  %v2664_v10 = vpop.f32.mrf.mxu0 }
 0x194   :  { %847 = vrot.lane.b32.xlu1 %v3899_v43, %s3017_s0  ;;  %1097 = vrot.lane.b32.xlu0 %v3879_v2, %s3018_s2  ;;  %v480_v11 = vadd.f32 %v2664_v10, %v3318_v5  ;;  %v640_v10 = vadd.f32 %v2712_v51, %v3318_v5 }
 0x196   :  { %v3928_v46 = vpop.permute.xlu1 %819  ;;  %v3930_v60 = vpop.permute.xlu0 %817 }
 0x197   :  { %6470 = vst [vmem:[#allocation102_spill] sm:$0xff] %v3928_v46  ;;  %6471 = vst [vmem:[#allocation103_spill] sm:$0xff] %v3930_v60  ;;  %v474_v46 = vpop.f32.mrf.mxu0  ;;  %v3945_v60 = vmax.f32 %v480_v11, 0.0  ;;  %v3961_v11 = vmax.f32 %v640_v10, 0.0 }
 0x198   :  { %911 = vrot.lane.b32.xlu1 %v3916_v45, %s3017_s0  ;;  %845 = vrot.lane.b32.xlu0 %v3924_v61, %s3017_s0  ;;  %v475_v31 = vadd.f32 %v3318_v5, %v474_v46 }
 0x199   :  { %6475 = vst [vmem:[#allocation107_spill] sm:$0xff] %v3945_v60  ;;  %6479 = vst [vmem:[#allocation111_spill] sm:$0xff] %v3961_v11 }
 0x19a   :  { %v3941_v58 = vpop.permute.xlu1 %883  ;;  %v3943_v25 = vpop.permute.xlu0 %881  ;;  %v3967_v51 = vmax.f32 %v475_v31, 0.0 }
 0x19b   :  { %6473 = vst [vmem:[#allocation105_spill] sm:$0xff] %v3941_v58  ;;  %6474 = vst [vmem:[#allocation106_spill] sm:$0xff] %v3943_v25  ;;  %v634_v58 = vpop.f32.mrf.mxu1  ;;  %v3959_v25 = vmul.f32 %v3945_v60, %v3945_v60  ;;  %v3976_v60 = vmul.f32 %v3961_v11, %v3961_v11 }
 0x19c   :  { %1039 = vrot.lane.b32.xlu1 %v3899_v43, %s3018_s2  ;;  %909 = vrot.lane.b32.xlu0 %v3939_v13, %s3017_s0  ;;  %6480 = vst [vmem:[#allocation112_spill] sm:$0xff] %v3967_v51  ;;  %v635_v46 = vadd.f32 %v3318_v5, %v634_v58  ;;  %v3984_v31 = vmul.f32 %v3967_v51, %v3967_v51 }
 0x19d   :  { %6478 = vst [vmem:[#allocation110_spill] sm:$0xff] %v3959_v25  ;;  %6483 = vst [vmem:[#allocation115_spill] sm:$0xff] %v3976_v60  ;;  %v2715_v30 = vpop.f32.mrf.mxu1 }
 0x19e   :  { %v3953_v34 = vpop.permute.xlu1 %1011  ;;  %v3955_v24 = vpop.permute.xlu0 %1009  ;;  %6484 = vst [vmem:[#allocation116_spill] sm:$0xff] %v3984_v31  ;;  %v3986_v10 = vmax.f32 %v635_v46, 0.0 }
 0x19f   :  { %6476 = vst [vmem:[#allocation108_spill] sm:$0xff] %v3953_v34  ;;  %6477 = vst [vmem:[#allocation109_spill] sm:$0xff] %v3955_v24 }
 0x1a0   :  { %1103 = vrot.lane.b32.xlu1 %v3916_v45, %s3018_s2  ;;  %1037 = vrot.lane.b32.xlu0 %v3924_v61, %s3018_s2  ;;  %6485 = vst [vmem:[#allocation117_spill] sm:$0xff] %v3986_v10  ;;  %v3999_v7 = vmul.f32 %v3986_v10, %v3986_v10 }
 0x1a2   :  { %v3970_v34 = vpop.permute.xlu1 %1075  ;;  %v3972_v24 = vpop.permute.xlu0 %1073  ;;  %6488 = vst [vmem:[#allocation120_spill] sm:$0xff] %v3999_v7 }
 0x1a3   :  { %6481 = vst [vmem:[#allocation113_spill] sm:$0xff] %v3970_v34  ;;  %6482 = vst [vmem:[#allocation114_spill] sm:$0xff] %v3972_v24  ;;  %v2667_v24 = vpop.f32.mrf.mxu0 }
 0x1a4   :  { %851 = vrot.lane.b32.xlu1 %v3959_v25, %s3017_s0  ;;  %1101 = vrot.lane.b32.xlu0 %v3939_v13, %s3018_s2  ;;  %v490_v11 = vadd.f32 %v2667_v24, %v3318_v5  ;;  %v650_v24 = vadd.f32 %v2715_v30, %v3318_v5 }
 0x1a6   :  { %v3988_v58 = vpop.permute.xlu1 %823  ;;  %v3990_v34 = vpop.permute.xlu0 %1201 }
 0x1a7   :  { %6486 = vst [vmem:[#allocation118_spill] sm:$0xff] %v3988_v58  ;;  %6487 = vst [vmem:[#allocation119_spill] sm:$0xff] %v3990_v34  ;;  %v484_v58 = vpop.f32.mrf.mxu0  ;;  %v4005_v34 = vmax.f32 %v490_v11, 0.0  ;;  %v4021_v11 = vmax.f32 %v650_v24, 0.0 }
 0x1a8   :  { %915 = vrot.lane.b32.xlu1 %v3976_v60, %s3017_s0  ;;  %849 = vrot.lane.b32.xlu0 %v3984_v31, %s3017_s0  ;;  %v485_v39 = vadd.f32 %v3318_v5, %v484_v58 }
 0x1a9   :  { %6491 = vst [vmem:[#allocation123_spill] sm:$0xff] %v4005_v34  ;;  %6495 = vst [vmem:[#allocation127_spill] sm:$0xff] %v4021_v11 }
 0x1aa   :  { %v4001_v51 = vpop.permute.xlu1 %887  ;;  %v4003_v46 = vpop.permute.xlu0 %821  ;;  %v4027_v30 = vmax.f32 %v485_v39, 0.0 }
 0x1ab   :  { %6489 = vst [vmem:[#allocation121_spill] sm:$0xff] %v4001_v51  ;;  %6490 = vst [vmem:[#allocation122_spill] sm:$0xff] %v4003_v46  ;;  %v644_v51 = vpop.f32.mrf.mxu1  ;;  %v4019_v46 = vmul.f32 %v4005_v34, %v4005_v34  ;;  %v4036_v34 = vmul.f32 %v4021_v11, %v4021_v11 }
 0x1ac   :  { %1043 = vrot.lane.b32.xlu1 %v3959_v25, %s3018_s2  ;;  %913 = vrot.lane.b32.xlu0 %v3999_v7, %s3017_s0  ;;  %6496 = vst [vmem:[#allocation128_spill] sm:$0xff] %v4027_v30  ;;  %v645_v58 = vadd.f32 %v3318_v5, %v644_v51  ;;  %v4044_v39 = vmul.f32 %v4027_v30, %v4027_v30 }
 0x1ad   :  { %6494 = vst [vmem:[#allocation126_spill] sm:$0xff] %v4019_v46  ;;  %6499 = vst [vmem:[#allocation131_spill] sm:$0xff] %v4036_v34  ;;  %v2718_v27 = vpop.f32.mrf.mxu1 }
 0x1ae   :  { %v4013_v10 = vpop.permute.xlu1 %1015  ;;  %v4015_v8 = vpop.permute.xlu0 %885  ;;  %6500 = vst [vmem:[#allocation132_spill] sm:$0xff] %v4044_v39  ;;  %v4046_v24 = vmax.f32 %v645_v58, 0.0 }
 0x1af   :  { %6492 = vst [vmem:[#allocation124_spill] sm:$0xff] %v4013_v10  ;;  %6493 = vst [vmem:[#allocation125_spill] sm:$0xff] %v4015_v8 }
 0x1b0   :  { %1107 = vrot.lane.b32.xlu1 %v3976_v60, %s3018_s2  ;;  %1041 = vrot.lane.b32.xlu0 %v3984_v31, %s3018_s2  ;;  %6501 = vst [vmem:[#allocation133_spill] sm:$0xff] %v4046_v24  ;;  %v4059_v63 = vmul.f32 %v4046_v24, %v4046_v24 }
 0x1b2   :  { %v4030_v10 = vpop.permute.xlu1 %1079  ;;  %v4032_v8 = vpop.permute.xlu0 %1013  ;;  %6504 = vst [vmem:[#allocation136_spill] sm:$0xff] %v4059_v63 }
 0x1b3   :  { %6497 = vst [vmem:[#allocation129_spill] sm:$0xff] %v4030_v10  ;;  %6498 = vst [vmem:[#allocation130_spill] sm:$0xff] %v4032_v8  ;;  %v2670_v8 = vpop.f32.mrf.mxu0 }
 0x1b4   :  { %855 = vrot.lane.b32.xlu1 %v4019_v46, %s3017_s0  ;;  %1105 = vrot.lane.b32.xlu0 %v3999_v7, %s3018_s2  ;;  %v500_v11 = vadd.f32 %v2670_v8, %v3318_v5  ;;  %v660_v8 = vadd.f32 %v2718_v27, %v3318_v5 }
 0x1b6   :  { %v4048_v51 = vpop.permute.xlu1 %827  ;;  %v4050_v10 = vpop.permute.xlu0 %1077 }
 0x1b7   :  { %6502 = vst [vmem:[#allocation134_spill] sm:$0xff] %v4048_v51  ;;  %6503 = vst [vmem:[#allocation135_spill] sm:$0xff] %v4050_v10  ;;  %v494_v51 = vpop.f32.mrf.mxu0  ;;  %v4065_v10 = vmax.f32 %v500_v11, 0.0  ;;  %v4081_v11 = vmax.f32 %v660_v8, 0.0 }
 0x1b8   :  { %919 = vrot.lane.b32.xlu1 %v4036_v34, %s3017_s0  ;;  %853 = vrot.lane.b32.xlu0 %v4044_v39, %s3017_s0  ;;  %v495_v1 = vadd.f32 %v3318_v5, %v494_v51 }
 0x1b9   :  { %6507 = vst [vmem:[#allocation139_spill] sm:$0xff] %v4065_v10  ;;  %6511 = vst [vmem:[#allocation143_spill] sm:$0xff] %v4081_v11 }
 0x1ba   :  { %v4061_v30 = vpop.permute.xlu1 %891  ;;  %v4063_v58 = vpop.permute.xlu0 %825  ;;  %v4087_v27 = vmax.f32 %v495_v1, 0.0 }
 0x1bb   :  { %6505 = vst [vmem:[#allocation137_spill] sm:$0xff] %v4061_v30  ;;  %6506 = vst [vmem:[#allocation138_spill] sm:$0xff] %v4063_v58  ;;  %v654_v30 = vpop.f32.mrf.mxu1  ;;  %v4079_v58 = vmul.f32 %v4065_v10, %v4065_v10  ;;  %v4096_v10 = vmul.f32 %v4081_v11, %v4081_v11 }
 0x1bc   :  { %1047 = vrot.lane.b32.xlu1 %v4019_v46, %s3018_s2  ;;  %917 = vrot.lane.b32.xlu0 %v4059_v63, %s3017_s0  ;;  %6512 = vst [vmem:[#allocation144_spill] sm:$0xff] %v4087_v27  ;;  %v655_v51 = vadd.f32 %v3318_v5, %v654_v30  ;;  %v4104_v1 = vmul.f32 %v4087_v27, %v4087_v27 }
 0x1bd   :  { %6510 = vst [vmem:[#allocation142_spill] sm:$0xff] %v4079_v58  ;;  %6515 = vst [vmem:[#allocation147_spill] sm:$0xff] %v4096_v10  ;;  %v2721_v48 = vpop.f32.mrf.mxu1 }
 0x1be   :  { %v4073_v24 = vpop.permute.xlu1 %1019  ;;  %v4075_v0 = vpop.permute.xlu0 %889  ;;  %6516 = vst [vmem:[#allocation148_spill] sm:$0xff] %v4104_v1  ;;  %v4106_v8 = vmax.f32 %v655_v51, 0.0 }
 0x1bf   :  { %6508 = vst [vmem:[#allocation140_spill] sm:$0xff] %v4073_v24  ;;  %6509 = vst [vmem:[#allocation141_spill] sm:$0xff] %v4075_v0 }
 0x1c0   :  { %1111 = vrot.lane.b32.xlu1 %v4036_v34, %s3018_s2  ;;  %1045 = vrot.lane.b32.xlu0 %v4044_v39, %s3018_s2  ;;  %6517 = vst [vmem:[#allocation149_spill] sm:$0xff] %v4106_v8  ;;  %v4119_v49 = vmul.f32 %v4106_v8, %v4106_v8 }
 0x1c2   :  { %v4090_v24 = vpop.permute.xlu1 %1083  ;;  %v4092_v0 = vpop.permute.xlu0 %1017  ;;  %6520 = vst [vmem:[#allocation152_spill] sm:$0xff] %v4119_v49 }
 0x1c3   :  { %6513 = vst [vmem:[#allocation145_spill] sm:$0xff] %v4090_v24  ;;  %6514 = vst [vmem:[#allocation146_spill] sm:$0xff] %v4092_v0  ;;  %v2673_v0 = vpop.f32.mrf.mxu0 }
 0x1c4   :  { %859 = vrot.lane.b32.xlu1 %v4079_v58, %s3017_s0  ;;  %1109 = vrot.lane.b32.xlu0 %v4059_v63, %s3018_s2  ;;  %v510_v11 = vadd.f32 %v2673_v0, %v3318_v5  ;;  %v670_v0 = vadd.f32 %v2721_v48, %v3318_v5 }
 0x1c6   :  { %v4108_v30 = vpop.permute.xlu1 %831  ;;  %v4110_v24 = vpop.permute.xlu0 %1081 }
 0x1c7   :  { %6518 = vst [vmem:[#allocation150_spill] sm:$0xff] %v4108_v30  ;;  %6519 = vst [vmem:[#allocation151_spill] sm:$0xff] %v4110_v24  ;;  %v504_v30 = vpop.f32.mrf.mxu0  ;;  %v4125_v24 = vmax.f32 %v510_v11, 0.0  ;;  %v4141_v11 = vmax.f32 %v670_v0, 0.0 }
 0x1c8   :  { %923 = vrot.lane.b32.xlu1 %v4096_v10, %s3017_s0  ;;  %857 = vrot.lane.b32.xlu0 %v4104_v1, %s3017_s0  ;;  %v505_v38 = vadd.f32 %v3318_v5, %v504_v30 }
 0x1c9   :  { %6523 = vst [vmem:[#allocation155_spill] sm:$0xff] %v4125_v24  ;;  %6527 = vst [vmem:[#allocation159_spill] sm:$0xff] %v4141_v11 }
 0x1ca   :  { %v4121_v27 = vpop.permute.xlu1 %895  ;;  %v4123_v51 = vpop.permute.xlu0 %829  ;;  %v4147_v48 = vmax.f32 %v505_v38, 0.0 }
 0x1cb   :  { %6521 = vst [vmem:[#allocation153_spill] sm:$0xff] %v4121_v27  ;;  %6522 = vst [vmem:[#allocation154_spill] sm:$0xff] %v4123_v51  ;;  %v664_v27 = vpop.f32.mrf.mxu1  ;;  %v4139_v51 = vmul.f32 %v4125_v24, %v4125_v24  ;;  %v4156_v24 = vmul.f32 %v4141_v11, %v4141_v11 }
 0x1cc   :  { %1051 = vrot.lane.b32.xlu1 %v4079_v58, %s3018_s2  ;;  %921 = vrot.lane.b32.xlu0 %v4119_v49, %s3017_s0  ;;  %6528 = vst [vmem:[#allocation160_spill] sm:$0xff] %v4147_v48  ;;  %v665_v30 = vadd.f32 %v3318_v5, %v664_v27  ;;  %v4164_v38 = vmul.f32 %v4147_v48, %v4147_v48 }
 0x1cd   :  { %6526 = vst [vmem:[#allocation158_spill] sm:$0xff] %v4139_v51  ;;  %6530 = vst [vmem:[#allocation162_spill] sm:$0xff] %v4156_v24 }
 0x1ce   :  { %v4133_v8 = vpop.permute.xlu1 %1023  ;;  %v4135_v28 = vpop.permute.xlu0 %893  ;;  %6531 = vst [vmem:[#allocation163_spill] sm:$0xff] %v4164_v38  ;;  %v4166_v0 = vmax.f32 %v665_v30, 0.0 }
 0x1cf   :  { %6524 = vst [vmem:[#allocation156_spill] sm:$0xff] %v4133_v8  ;;  %6525 = vst [vmem:[#allocation157_spill] sm:$0xff] %v4135_v28 }
 0x1d0   :  { %1115 = vrot.lane.b32.xlu1 %v4096_v10, %s3018_s2  ;;  %1049 = vrot.lane.b32.xlu0 %v4104_v1, %s3018_s2  ;;  %6532 = vst [vmem:[#allocation164_spill] sm:$0xff] %v4166_v0  ;;  %v4178_v11 = vmul.f32 %v4166_v0, %v4166_v0 }
 0x1d2   :  { %v4150_v8 = vpop.permute.xlu1 %1087  ;;  %v4152_v28 = vpop.permute.xlu0 %1021  ;;  %6534 = vst [vmem:[#allocation166_spill] sm:$0xff] %v4178_v11 }
 0x1d3   :  { %6529 = vst [vmem:[#allocation161_spill] sm:$0xff] %v4152_v28 }
 0x1d4   :  { %863 = vrot.lane.b32.xlu1 %v4139_v51, %s3017_s0  ;;  %1113 = vrot.lane.b32.xlu0 %v4119_v49, %s3018_s2 }
 0x1d6   :  { %v4168_v5 = vpop.permute.xlu1 %835  ;;  %v4170_v27 = vpop.permute.xlu0 %1085 }
 0x1d7   :  { %6533 = vst [vmem:[#allocation165_spill] sm:$0xff] %v4170_v27 }
 0x1d8   :  { %927 = vrot.lane.b32.xlu1 %v4156_v24, %s3017_s0  ;;  %861 = vrot.lane.b32.xlu0 %v4164_v38, %s3017_s0 }
 0x1da   :  { %v4180_v28 = vpop.permute.xlu1 %899  ;;  %v4182_v48 = vpop.permute.xlu0 %833 }
 0x1db   :  { %6535 = vst [vmem:[#allocation167_spill] sm:$0xff] %v4180_v28  ;;  %6536 = vst [vmem:[#allocation168_spill] sm:$0xff] %v4182_v48 }
 0x1dc   :  { %1055 = vrot.lane.b32.xlu1 %v4139_v51, %s3018_s2  ;;  %925 = vrot.lane.b32.xlu0 %v4178_v11, %s3017_s0 }
 0x1de   :  { %v4188_v30 = vpop.permute.xlu1 %1027  ;;  %v4190_v27 = vpop.permute.xlu0 %897 }
 0x1df   :  { %6537 = vst [vmem:[#allocation169_spill] sm:$0xff] %v4188_v30  ;;  %6538 = vst [vmem:[#allocation170_spill] sm:$0xff] %v4190_v27 }
 0x1e0   :  { %1119 = vrot.lane.b32.xlu1 %v4156_v24, %s3018_s2  ;;  %1053 = vrot.lane.b32.xlu0 %v4164_v38, %s3018_s2 }
 0x1e2   :  { %v4196_v0 = vpop.permute.xlu1 %1091  ;;  %v4198_v28 = vpop.permute.xlu0 %1025 }
 0x1e3   :  { %6539 = vst [vmem:[#allocation171_spill] sm:$0xff] %v4196_v0  ;;  %6540 = vst [vmem:[#allocation172_spill] sm:$0xff] %v4198_v28 }
 0x1e4   :  { %1203 = vrot.lane.b32.xlu1 %v3522_v26, %s3019_s12  ;;  %1117 = vrot.lane.b32.xlu0 %v4178_v11, %s3018_s2 }
 0x1e6   :  { %v4204_v48 = vpop.permute.xlu1 %839  ;;  %v4206_v30 = vpop.permute.xlu0 %1089 }
 0x1e7   :  { %6541 = vst [vmem:[#allocation173_spill] sm:$0xff] %v4204_v48  ;;  %6542 = vst [vmem:[#allocation174_spill] sm:$0xff] %v4206_v30 }
 0x1e8   :  { %1207 = vrot.lane.b32.xlu1 %v3559_v55, %s3019_s12  ;;  %1205 = vrot.lane.b32.xlu0 %v3580_v62, %s3019_s12 }
 0x1ea   :  { %v4212_v27 = vpop.permute.xlu1 %903  ;;  %v4214_v0 = vpop.permute.xlu0 %837 }
 0x1eb   :  { %6543 = vst [vmem:[#allocation175_spill] sm:$0xff] %v4212_v27  ;;  %6544 = vst [vmem:[#allocation176_spill] sm:$0xff] %v4214_v0 }
 0x1ec   :  { %1211 = vrot.lane.b32.xlu1 %v3603_v40, %s3019_s12  ;;  %1209 = vrot.lane.b32.xlu0 %v3624_v54, %s3019_s12 }
 0x1ee   :  { %v4220_v28 = vpop.permute.xlu1 %1031  ;;  %v4222_v48 = vpop.permute.xlu0 %901 }
 0x1ef   :  { %6545 = vst [vmem:[#allocation177_spill] sm:$0xff] %v4220_v28  ;;  %6546 = vst [vmem:[#allocation178_spill] sm:$0xff] %v4222_v48 }
 0x1f0   :  { %1215 = vrot.lane.b32.xlu1 %v3659_v3, %s3019_s12  ;;  %1213 = vrot.lane.b32.xlu0 %v3684_v56, %s3019_s12 }
 0x1f2   :  { %v4228_v30 = vpop.permute.xlu1 %1095  ;;  %v4230_v27 = vpop.permute.xlu0 %1029 }
 0x1f3   :  { %6547 = vst [vmem:[#allocation179_spill] sm:$0xff] %v4228_v30  ;;  %6548 = vst [vmem:[#allocation180_spill] sm:$0xff] %v4230_v27 }
 0x1f4   :  { %1219 = vrot.lane.b32.xlu1 %v3719_v21, %s3019_s12  ;;  %1217 = vrot.lane.b32.xlu0 %v3744_v14, %s3019_s12 }
 0x1f6   :  { %v4236_v0 = vpop.permute.xlu1 %843  ;;  %v4238_v28 = vpop.permute.xlu0 %1093 }
 0x1f7   :  { %6549 = vst [vmem:[#allocation181_spill] sm:$0xff] %v4236_v0  ;;  %6550 = vst [vmem:[#allocation182_spill] sm:$0xff] %v4238_v28 }
 0x1f8   :  { %1223 = vrot.lane.b32.xlu1 %v3779_v41, %s3019_s12  ;;  %1221 = vrot.lane.b32.xlu0 %v3804_v12, %s3019_s12 }
 0x1fa   :  { %v4244_v48 = vpop.permute.xlu1 %907  ;;  %v4246_v30 = vpop.permute.xlu0 %841 }
 0x1fb   :  { %6551 = vst [vmem:[#allocation183_spill] sm:$0xff] %v4244_v48  ;;  %6552 = vst [vmem:[#allocation184_spill] sm:$0xff] %v4246_v30 }
 0x1fc   :  { %1227 = vrot.lane.b32.xlu1 %v3839_v35, %s3019_s12  ;;  %1225 = vrot.lane.b32.xlu0 %v3864_v57, %s3019_s12 }
 0x1fe   :  { %v4252_v27 = vpop.permute.xlu1 %1035  ;;  %v4254_v0 = vpop.permute.xlu0 %905 }
 0x1ff   :  { %6553 = vst [vmem:[#allocation185_spill] sm:$0xff] %v4252_v27  ;;  %6554 = vst [vmem:[#allocation186_spill] sm:$0xff] %v4254_v0 }
 0x200   :  { %1231 = vrot.lane.b32.xlu1 %v3899_v43, %s3019_s12  ;;  %1229 = vrot.lane.b32.xlu0 %v3924_v61, %s3019_s12 }
 0x202   :  { %v4260_v28 = vpop.permute.xlu1 %1099  ;;  %v4262_v48 = vpop.permute.xlu0 %1033 }
 0x203   :  { %6555 = vst [vmem:[#allocation187_spill] sm:$0xff] %v4260_v28  ;;  %6556 = vst [vmem:[#allocation188_spill] sm:$0xff] %v4262_v48 }
 0x204   :  { %1235 = vrot.lane.b32.xlu1 %v3959_v25, %s3019_s12  ;;  %1233 = vrot.lane.b32.xlu0 %v3984_v31, %s3019_s12 }
 0x206   :  { %v4268_v30 = vpop.permute.xlu1 %847  ;;  %v4270_v27 = vpop.permute.xlu0 %1097 }
 0x207   :  { %6557 = vst [vmem:[#allocation189_spill] sm:$0xff] %v4268_v30  ;;  %6558 = vst [vmem:[#allocation190_spill] sm:$0xff] %v4270_v27 }
 0x208   :  { %1239 = vrot.lane.b32.xlu1 %v4019_v46, %s3019_s12  ;;  %1237 = vrot.lane.b32.xlu0 %v4044_v39, %s3019_s12 }
 0x20a   :  { %v4276_v0 = vpop.permute.xlu1 %911  ;;  %v4278_v28 = vpop.permute.xlu0 %845 }
 0x20b   :  { %6559 = vst [vmem:[#allocation191_spill] sm:$0xff] %v4276_v0  ;;  %6560 = vst [vmem:[#allocation192_spill] sm:$0xff] %v4278_v28 }
 0x20c   :  { %1243 = vrot.lane.b32.xlu1 %v4079_v58, %s3019_s12  ;;  %1241 = vrot.lane.b32.xlu0 %v4104_v1, %s3019_s12 }
 0x20e   :  { %v4284_v48 = vpop.permute.xlu1 %1039  ;;  %v4286_v30 = vpop.permute.xlu0 %909 }
 0x20f   :  { %6561 = vst [vmem:[#allocation193_spill] sm:$0xff] %v4284_v48  ;;  %6562 = vst [vmem:[#allocation194_spill] sm:$0xff] %v4286_v30 }
 0x210   :  { %1247 = vrot.lane.b32.xlu1 %v4139_v51, %s3019_s12  ;;  %1245 = vrot.lane.b32.xlu0 %v4164_v38, %s3019_s12 }
 0x212   :  { %v4292_v27 = vpop.permute.xlu1 %1103  ;;  %v4294_v0 = vpop.permute.xlu0 %1037 }
 0x213   :  { %6563 = vst [vmem:[#allocation195_spill] sm:$0xff] %v4292_v27  ;;  %6564 = vst [vmem:[#allocation196_spill] sm:$0xff] %v4294_v0 }
 0x214   :  { %1251 = vrot.lane.b32.xlu1 %v3333_v16, %s3019_s12  ;;  %1249 = vrot.lane.b32.xlu0 %v3355_v23, %s3019_s12 }
 0x216   :  { %v4300_v28 = vpop.permute.xlu1 %851  ;;  %v4302_v48 = vpop.permute.xlu0 %1101 }
 0x217   :  { %6565 = vst [vmem:[#allocation197_spill] sm:$0xff] %v4300_v28  ;;  %6566 = vst [vmem:[#allocation198_spill] sm:$0xff] %v4302_v48 }
 0x218   :  { %1255 = vrot.lane.b32.xlu1 %v3377_v32, %s3019_s12  ;;  %1253 = vrot.lane.b32.xlu0 %v3394_v36, %s3019_s12 }
 0x21a   :  { %v4308_v30 = vpop.permute.xlu1 %915  ;;  %v4310_v27 = vpop.permute.xlu0 %849 }
 0x21b   :  { %6567 = vst [vmem:[#allocation199_spill] sm:$0xff] %v4308_v30  ;;  %6568 = vst [vmem:[#allocation200_spill] sm:$0xff] %v4310_v27 }
 0x21c   :  { %1259 = vrot.lane.b32.xlu1 %v3442_v52, %s3019_s12  ;;  %1257 = vrot.lane.b32.xlu0 %v3446_v53, %s3019_s12 }
 0x21e   :  { %v4316_v0 = vpop.permute.xlu1 %1043  ;;  %v4318_v28 = vpop.permute.xlu0 %913 }
 0x21f   :  { %6569 = vst [vmem:[#allocation201_spill] sm:$0xff] %v4316_v0  ;;  %6570 = vst [vmem:[#allocation202_spill] sm:$0xff] %v4318_v28 }
 0x220   :  { %1263 = vrot.lane.b32.xlu1 %v3490_v4, %s3019_s12  ;;  %1261 = vrot.lane.b32.xlu0 %v3494_v6, %s3019_s12 }
 0x222   :  { %v4324_v48 = vpop.permute.xlu1 %1107  ;;  %v4326_v30 = vpop.permute.xlu0 %1041 }
 0x223   :  { %6571 = vst [vmem:[#allocation203_spill] sm:$0xff] %v4324_v48  ;;  %6572 = vst [vmem:[#allocation204_spill] sm:$0xff] %v4326_v30 }
 0x224   :  { %1267 = vrot.lane.b32.xlu1 %v3538_v33, %s3019_s12  ;;  %1265 = vrot.lane.b32.xlu0 %v3542_v37, %s3019_s12 }
 0x226   :  { %v4332_v27 = vpop.permute.xlu1 %855  ;;  %v4334_v0 = vpop.permute.xlu0 %1105 }
 0x227   :  { %6573 = vst [vmem:[#allocation205_spill] sm:$0xff] %v4332_v27  ;;  %6574 = vst [vmem:[#allocation206_spill] sm:$0xff] %v4334_v0 }
 0x228   :  { %1271 = vrot.lane.b32.xlu1 %v3572_v59, %s3019_s12  ;;  %1269 = vrot.lane.b32.xlu0 %v3591_v9, %s3019_s12 }
 0x22a   :  { %v4340_v28 = vpop.permute.xlu1 %919  ;;  %v4342_v48 = vpop.permute.xlu0 %853 }
 0x22b   :  { %6575 = vst [vmem:[#allocation207_spill] sm:$0xff] %v4340_v28  ;;  %6576 = vst [vmem:[#allocation208_spill] sm:$0xff] %v4342_v48 }
 0x22c   :  { %1275 = vrot.lane.b32.xlu1 %v3616_v47, %s3019_s12  ;;  %1273 = vrot.lane.b32.xlu0 %v3639_v22, %s3019_s12 }
 0x22e   :  { %v4348_v30 = vpop.permute.xlu1 %1047  ;;  %v4350_v27 = vpop.permute.xlu0 %917 }
 0x22f   :  { %6577 = vst [vmem:[#allocation209_spill] sm:$0xff] %v4348_v30  ;;  %6578 = vst [vmem:[#allocation210_spill] sm:$0xff] %v4350_v27 }
 0x230   :  { %1279 = vrot.lane.b32.xlu1 %v3676_v50, %s3019_s12  ;;  %1277 = vrot.lane.b32.xlu0 %v3699_v20, %s3019_s12 }
 0x232   :  { %v4356_v0 = vpop.permute.xlu1 %1111  ;;  %v4358_v28 = vpop.permute.xlu0 %1045 }
 0x233   :  { %6579 = vst [vmem:[#allocation211_spill] sm:$0xff] %v4356_v0  ;;  %6580 = vst [vmem:[#allocation212_spill] sm:$0xff] %v4358_v28 }
 0x234   :  { %1283 = vrot.lane.b32.xlu1 %v3736_v42, %s3019_s12  ;;  %1281 = vrot.lane.b32.xlu0 %v3759_v44, %s3019_s12 }
 0x236   :  { %v4364_v48 = vpop.permute.xlu1 %859  ;;  %v4366_v30 = vpop.permute.xlu0 %1109 }
 0x237   :  { %6581 = vst [vmem:[#allocation213_spill] sm:$0xff] %v4364_v48  ;;  %6582 = vst [vmem:[#allocation214_spill] sm:$0xff] %v4366_v30 }
 0x238   :  { %1287 = vrot.lane.b32.xlu1 %v3796_v17, %s3019_s12  ;;  %1285 = vrot.lane.b32.xlu0 %v3819_v18, %s3019_s12 }
 0x23a   :  { %v4372_v27 = vpop.permute.xlu1 %923  ;;  %v4374_v0 = vpop.permute.xlu0 %857 }
 0x23b   :  { %6583 = vst [vmem:[#allocation215_spill] sm:$0xff] %v4372_v27  ;;  %6584 = vst [vmem:[#allocation216_spill] sm:$0xff] %v4374_v0 }
 0x23c   :  { %1291 = vrot.lane.b32.xlu1 %v3856_v29, %s3019_s12  ;;  %1289 = vrot.lane.b32.xlu0 %v3879_v2, %s3019_s12 }
 0x23e   :  { %v4380_v28 = vpop.permute.xlu1 %1051  ;;  %v4382_v48 = vpop.permute.xlu0 %921 }
 0x23f   :  { %6585 = vst [vmem:[#allocation217_spill] sm:$0xff] %v4380_v28  ;;  %6586 = vst [vmem:[#allocation218_spill] sm:$0xff] %v4382_v48 }
 0x240   :  { %1295 = vrot.lane.b32.xlu1 %v3916_v45, %s3019_s12  ;;  %1293 = vrot.lane.b32.xlu0 %v3939_v13, %s3019_s12  ;;  %v6655_v45 = vld [vmem:[#allocation45_spill] sm:$0xff] }
 0x242   :  { %v4388_v30 = vpop.permute.xlu1 %1115  ;;  %v4390_v27 = vpop.permute.xlu0 %1049 }
 0x243   :  { %6587 = vst [vmem:[#allocation219_spill] sm:$0xff] %v4388_v30  ;;  %6588 = vst [vmem:[#allocation220_spill] sm:$0xff] %v4390_v27 }
 0x244   :  { %1299 = vrot.lane.b32.xlu1 %v3976_v60, %s3019_s12  ;;  %1297 = vrot.lane.b32.xlu0 %v3999_v7, %s3019_s12  ;;  %v6652_v60 = vld [vmem:[#allocation62_spill] sm:$0xff] }
 0x246   :  { %v4396_v0 = vpop.permute.xlu1 %863  ;;  %v4398_v28 = vpop.permute.xlu0 %1113 }
 0x247   :  { %6589 = vst [vmem:[#allocation221_spill] sm:$0xff] %v4396_v0  ;;  %6590 = vst [vmem:[#allocation222_spill] sm:$0xff] %v4398_v28 }
 0x248   :  { %1303 = vrot.lane.b32.xlu1 %v4036_v34, %s3019_s12  ;;  %1301 = vrot.lane.b32.xlu0 %v4059_v63, %s3019_s12  ;;  %v6608_v63 = vld [vmem:[#allocation24_spill] sm:$0xff] }
 0x24a   :  { %v4404_v48 = vpop.permute.xlu1 %927  ;;  %v4406_v30 = vpop.permute.xlu0 %861 }
 0x24b   :  { %6591 = vst [vmem:[#allocation223_spill] sm:$0xff] %v4404_v48  ;;  %6592 = vst [vmem:[#allocation224_spill] sm:$0xff] %v4406_v30  ;;  %v6599_v30 = vld [vmem:[#allocation10_spill] sm:$0xff] }
 0x24c   :  { %1307 = vrot.lane.b32.xlu1 %v4096_v10, %s3019_s12  ;;  %1305 = vrot.lane.b32.xlu0 %v4119_v49, %s3019_s12  ;;  %v6604_v49 = vld [vmem:[#allocation18_spill] sm:$0xff] }
 0x24e   :  { %v4412_v27 = vpop.permute.xlu1 %1055  ;;  %v4414_v0 = vpop.permute.xlu0 %925 }
 0x24f   :  { %6593 = vst [vmem:[#allocation225_spill] sm:$0xff] %v4412_v27  ;;  %6594 = vst [vmem:[#allocation226_spill] sm:$0xff] %v4414_v0 }
 0x250   :  { %1311 = vrot.lane.b32.xlu1 %v4156_v24, %s3019_s12  ;;  %1309 = vrot.lane.b32.xlu0 %v4178_v11, %s3019_s12  ;;  %v6600_v11 = vld [vmem:[#allocation14_spill] sm:$0xff]  ;;  %v6603_v24 = vld [vmem:[#allocation17_spill] sm:$0xff] }
 0x252   :  { %v4420_v28 = vpop.permute.xlu1 %1119  ;;  %v4422_v48 = vpop.permute.xlu0 %1053 }
 0x253   :  { %6595 = vst [vmem:[#allocation227_spill] sm:$0xff] %v4420_v28  ;;  %6596 = vst [vmem:[#allocation228_spill] sm:$0xff] %v4422_v48 }
 0x254   :  { %1379 = vrot.lane.b32.xlu1 %v3329_v15, %s3020_s13  ;;  %1377 = vrot.lane.b32.xlu0 %v3344_v19, %s3020_s13 }
 0x256   :  { %v4428_v27 = vpop.permute.xlu1 %1203  ;;  %v4430_v0 = vpop.permute.xlu0 %1117 }
 0x257   :  { %6597 = vst [vmem:[#allocation229_spill] sm:$0xff] %v4428_v27  ;;  %6598 = vst [vmem:[#allocation230_spill] sm:$0xff] %v4430_v0  ;;  %v6607_v0 = vld [vmem:[#allocation23_spill] sm:$0xff] }
 0x258   :  { %1383 = vrot.lane.b32.xlu1 %v6599_v30, %s3020_s13  ;;  %1381 = vrot.lane.b32.xlu0 %v6600_v11, %s3020_s13 }
 0x25a   :  { %v4436_v28 = vpop.permute.xlu1 %1207  ;;  %v4438_v48 = vpop.permute.xlu0 %1205 }
 0x25b   :  { %6601 = vst [vmem:[#allocation10_spill] sm:$0xff] %v4436_v28  ;;  %6602 = vst [vmem:[#allocation14_spill] sm:$0xff] %v4438_v48  ;;  %v6611_v48 = vld [vmem:[#allocation29_spill] sm:$0xff] }
 0x25c   :  { %1387 = vrot.lane.b32.xlu1 %v6603_v24, %s3020_s13  ;;  %1385 = vrot.lane.b32.xlu0 %v6604_v49, %s3020_s13 }
 0x25e   :  { %v4444_v10 = vpop.permute.xlu1 %1211  ;;  %v4446_v27 = vpop.permute.xlu0 %1209 }
 0x25f   :  { %6605 = vst [vmem:[#allocation17_spill] sm:$0xff] %v4444_v10  ;;  %6606 = vst [vmem:[#allocation18_spill] sm:$0xff] %v4446_v27 }
 0x260   :  { %1391 = vrot.lane.b32.xlu1 %v6607_v0, %s3020_s13  ;;  %1389 = vrot.lane.b32.xlu0 %v6608_v63, %s3020_s13 }
 0x262   :  { %v4452_v34 = vpop.permute.xlu1 %1215  ;;  %v4454_v28 = vpop.permute.xlu0 %1213 }
 0x263   :  { %6609 = vst [vmem:[#allocation23_spill] sm:$0xff] %v4452_v34  ;;  %6610 = vst [vmem:[#allocation24_spill] sm:$0xff] %v4454_v28 }
 0x264   :  { %1395 = vrot.lane.b32.xlu1 %v3522_v26, %s3020_s13  ;;  %1393 = vrot.lane.b32.xlu0 %v6611_v48, %s3020_s13 }
 0x266   :  { %v4460_v7 = vpop.permute.xlu1 %1219  ;;  %v4462_v10 = vpop.permute.xlu0 %1217 }
 0x267   :  { %6612 = vst [vmem:[#allocation29_spill] sm:$0xff] %v4460_v7  ;;  %6613 = vst [vmem:[#allocation231_spill] sm:$0xff] %v4462_v10 }
 0x268   :  { %1399 = vrot.lane.b32.xlu1 %v3559_v55, %s3020_s13  ;;  %1397 = vrot.lane.b32.xlu0 %v3580_v62, %s3020_s13 }
 0x26a   :  { %v4468_v27 = vpop.permute.xlu1 %1223  ;;  %v4470_v34 = vpop.permute.xlu0 %1221 }
 0x26b   :  { %6614 = vst [vmem:[#allocation232_spill] sm:$0xff] %v4468_v27  ;;  %6615 = vst [vmem:[#allocation233_spill] sm:$0xff] %v4470_v34 }
 0x26c   :  { %1403 = vrot.lane.b32.xlu1 %v3603_v40, %s3020_s13  ;;  %1401 = vrot.lane.b32.xlu0 %v3624_v54, %s3020_s13 }
 0x26e   :  { %v4476_v28 = vpop.permute.xlu1 %1227  ;;  %v4478_v7 = vpop.permute.xlu0 %1225 }
 0x26f   :  { %6616 = vst [vmem:[#allocation234_spill] sm:$0xff] %v4476_v28  ;;  %6617 = vst [vmem:[#allocation235_spill] sm:$0xff] %v4478_v7 }
 0x270   :  { %1407 = vrot.lane.b32.xlu1 %v3659_v3, %s3020_s13  ;;  %1405 = vrot.lane.b32.xlu0 %v3684_v56, %s3020_s13 }
 0x272   :  { %v4484_v10 = vpop.permute.xlu1 %1231  ;;  %v4486_v27 = vpop.permute.xlu0 %1229 }
 0x273   :  { %6618 = vst [vmem:[#allocation236_spill] sm:$0xff] %v4484_v10  ;;  %6619 = vst [vmem:[#allocation237_spill] sm:$0xff] %v4486_v27 }
 0x274   :  { %1411 = vrot.lane.b32.xlu1 %v3719_v21, %s3020_s13  ;;  %1409 = vrot.lane.b32.xlu0 %v3744_v14, %s3020_s13 }
 0x276   :  { %v4492_v34 = vpop.permute.xlu1 %1235  ;;  %v4494_v28 = vpop.permute.xlu0 %1233 }
 0x277   :  { %6620 = vst [vmem:[#allocation238_spill] sm:$0xff] %v4492_v34  ;;  %6621 = vst [vmem:[#allocation239_spill] sm:$0xff] %v4494_v28 }
 0x278   :  { %1415 = vrot.lane.b32.xlu1 %v3779_v41, %s3020_s13  ;;  %1413 = vrot.lane.b32.xlu0 %v3804_v12, %s3020_s13 }
 0x27a   :  { %v4500_v7 = vpop.permute.xlu1 %1239  ;;  %v4502_v10 = vpop.permute.xlu0 %1237 }
 0x27b   :  { %6622 = vst [vmem:[#allocation240_spill] sm:$0xff] %v4500_v7  ;;  %6623 = vst [vmem:[#allocation241_spill] sm:$0xff] %v4502_v10 }
 0x27c   :  { %1419 = vrot.lane.b32.xlu1 %v3839_v35, %s3020_s13  ;;  %1417 = vrot.lane.b32.xlu0 %v3864_v57, %s3020_s13 }
 0x27e   :  { %v4508_v27 = vpop.permute.xlu1 %1243  ;;  %v4510_v34 = vpop.permute.xlu0 %1241 }
 0x27f   :  { %6624 = vst [vmem:[#allocation242_spill] sm:$0xff] %v4508_v27  ;;  %6625 = vst [vmem:[#allocation243_spill] sm:$0xff] %v4510_v34 }
 0x280   :  { %1423 = vrot.lane.b32.xlu1 %v3899_v43, %s3020_s13  ;;  %1421 = vrot.lane.b32.xlu0 %v3924_v61, %s3020_s13 }
 0x282   :  { %v4516_v28 = vpop.permute.xlu1 %1247  ;;  %v4518_v7 = vpop.permute.xlu0 %1245 }
 0x283   :  { %6626 = vst [vmem:[#allocation244_spill] sm:$0xff] %v4516_v28  ;;  %6627 = vst [vmem:[#allocation245_spill] sm:$0xff] %v4518_v7 }
 0x284   :  { %1427 = vrot.lane.b32.xlu1 %v3959_v25, %s3020_s13  ;;  %1425 = vrot.lane.b32.xlu0 %v3984_v31, %s3020_s13 }
 0x286   :  { %v4524_v10 = vpop.permute.xlu1 %1251  ;;  %v4526_v27 = vpop.permute.xlu0 %1249 }
 0x287   :  { %6628 = vst [vmem:[#allocation246_spill] sm:$0xff] %v4524_v10  ;;  %6629 = vst [vmem:[#allocation247_spill] sm:$0xff] %v4526_v27 }
 0x288   :  { %1431 = vrot.lane.b32.xlu1 %v4019_v46, %s3020_s13  ;;  %1429 = vrot.lane.b32.xlu0 %v4044_v39, %s3020_s13  ;;  %v6648_v46 = vld [vmem:[#allocation46_spill] sm:$0xff] }
 0x28a   :  { %v4532_v34 = vpop.permute.xlu1 %1255  ;;  %v4534_v28 = vpop.permute.xlu0 %1253 }
 0x28b   :  { %6630 = vst [vmem:[#allocation248_spill] sm:$0xff] %v4532_v34  ;;  %6631 = vst [vmem:[#allocation249_spill] sm:$0xff] %v4534_v28 }
 0x28c   :  { %1435 = vrot.lane.b32.xlu1 %v4079_v58, %s3020_s13  ;;  %1433 = vrot.lane.b32.xlu0 %v4104_v1, %s3020_s13 }
 0x28e   :  { %v4540_v7 = vpop.permute.xlu1 %1259  ;;  %v4542_v10 = vpop.permute.xlu0 %1257 }
 0x28f   :  { %6632 = vst [vmem:[#allocation250_spill] sm:$0xff] %v4540_v7  ;;  %6633 = vst [vmem:[#allocation251_spill] sm:$0xff] %v4542_v10 }
 0x290   :  { %1439 = vrot.lane.b32.xlu1 %v4139_v51, %s3020_s13  ;;  %1437 = vrot.lane.b32.xlu0 %v4164_v38, %s3020_s13  ;;  %v6643_v51 = vld [vmem:[#allocation41_spill] sm:$0xff] }
 0x291   :  { %v930_v1 = vadd.f32 %v6643_v51, %v3329_v15  ;;  %v961_v15 = vadd.f32 %v6648_v46, %v3355_v23  ;;  %v6649_v51 = vld [vmem:[#allocation50_spill] sm:$0xff] }
 0x292   :  { %v4548_v27 = vpop.permute.xlu1 %1263  ;;  %v4550_v34 = vpop.permute.xlu0 %1261 }
 0x293   :  { %6634 = vst [vmem:[#allocation252_spill] sm:$0xff] %v4548_v27  ;;  %6635 = vst [vmem:[#allocation253_spill] sm:$0xff] %v4550_v34 }
 0x294   :  { %1443 = vrot.lane.b32.xlu1 %v3333_v16, %s3020_s13  ;;  %1441 = vrot.lane.b32.xlu0 %v3355_v23, %s3020_s13  ;;  %v6657_v23 = vld [vmem:[#allocation53_spill] sm:$0xff] }
 0x295   :  { %v4609_v46 = vadd.f32 %v6657_v23, %v961_v15  ;;  %v6667_v23 = vld [vmem:[#allocation74_spill] sm:$0xff] }
 0x296   :  { %v4556_v28 = vpop.permute.xlu1 %1267  ;;  %v4558_v7 = vpop.permute.xlu0 %1265 }
 0x297   :  { %6636 = vst [vmem:[#allocation254_spill] sm:$0xff] %v4556_v28  ;;  %6637 = vst [vmem:[#allocation255_spill] sm:$0xff] %v4558_v7  ;;  %v6640_v28 = vld [vmem:[#allocation66_spill] sm:$0xff] }
 0x298   :  { %1447 = vrot.lane.b32.xlu1 %v3377_v32, %s3020_s13  ;;  %1445 = vrot.lane.b32.xlu0 %v3394_v36, %s3020_s13  ;;  %v931_v34 = vadd.f32 %v6640_v28, %v6600_v11  ;;  %v6646_v28 = vld [vmem:[#allocation40_spill] sm:$0xff] }
 0x299   :  { %v962_v11 = vadd.f32 %v6646_v28, %v3333_v16  ;;  %v6659_v28 = vld [vmem:[#allocation55_spill] sm:$0xff] }
 0x29a   :  { %v4564_v10 = vpop.permute.xlu1 %1271  ;;  %v4566_v27 = vpop.permute.xlu0 %1269  ;;  %v1123_v25 = vadd.f32 %v6652_v60, %v931_v34  ;;  %v6660_v60 = vld [vmem:[#allocation61_spill] sm:$0xff] }
 0x29b   :  { %6638 = vst [vmem:[#allocation256_spill] sm:$0xff] %v4564_v10  ;;  %6639 = vst [vmem:[#allocation257_spill] sm:$0xff] %v4566_v27  ;;  %v6644_v10 = vld [vmem:[#allocation43_spill] sm:$0xff]  ;;  %v6645_v27 = vld [vmem:[#allocation52_spill] sm:$0xff]  ;;  %v4603_v16 = vadd.f32 %v6655_v45, %v962_v11 }
 0x29c   :  { %1451 = vrot.lane.b32.xlu1 %v3442_v52, %s3020_s13  ;;  %1449 = vrot.lane.b32.xlu0 %v3446_v53, %s3020_s13  ;;  %v929_v58 = vadd.f32 %v6644_v10, %v3344_v19  ;;  %v932_v39 = vadd.f32 %v6645_v27, %v6599_v30  ;;  %v6650_v19 = vld [vmem:[#allocation54_spill] sm:$0xff]  ;;  %v6651_v27 = vld [vmem:[#allocation57_spill] sm:$0xff] }
 0x29d   :  { %v964_v10 = vadd.f32 %v6650_v19, %v3377_v32  ;;  %v6662_v45 = vld [vmem:[#allocation65_spill] sm:$0xff] }
 0x29e   :  { %v4574_v7 = vpop.permute.xlu1 %1275  ;;  %v4576_v38 = vpop.permute.xlu0 %1273  ;;  %v1121_v31 = vadd.f32 %v6649_v51, %v929_v58  ;;  %v1124_v30 = vadd.f32 %v6651_v27, %v932_v39  ;;  %v6658_v58 = vld [vmem:[#allocation58_spill] sm:$0xff]  ;;  %v6661_v51 = vld [vmem:[#allocation64_spill] sm:$0xff] }
 0x29f   :  { %6641 = vst [vmem:[#allocation66_spill] sm:$0xff] %v4574_v7  ;;  %6642 = vst [vmem:[#allocation258_spill] sm:$0xff] %v4576_v38  ;;  %v6647_v7 = vld [vmem:[#allocation42_spill] sm:$0xff]  ;;  %v963_v32 = vadd.f32 %v6658_v58, %v3394_v36  ;;  %v4617_v34 = vadd.f32 %v6660_v60, %v964_v10  ;;  %v6663_v36 = vld [vmem:[#allocation69_spill] sm:$0xff]  ;;  %v965_v58 = vadd.f32 %v6667_v23, %v3446_v53 }
 0x2a0   :  { %1455 = vrot.lane.b32.xlu1 %v3490_v4, %s3020_s13  ;;  %1453 = vrot.lane.b32.xlu0 %v3494_v6, %s3020_s13  ;;  %v1122_v38 = vadd.f32 %v6647_v7, %v930_v1  ;;  %v6656_v7 = vld [vmem:[#allocation49_spill] sm:$0xff]  ;;  %v4614_v39 = vadd.f32 %v6659_v28, %v1121_v31  ;;  %v4620_v19 = vadd.f32 %v6661_v51, %v1124_v30  ;;  %v6664_v31 = vld [vmem:[#allocation70_spill] sm:$0xff]  ;;  %v6666_v30 = vld [vmem:[#allocation67_spill] sm:$0xff] }
 0x2a1   :  { %v934_v11 = vadd.f32 %v6663_v36, %v6603_v24  ;;  %v933_v15 = vadd.f32 %v6664_v31, %v6604_v49  ;;  %v6665_v10 = vld [vmem:[#allocation73_spill] sm:$0xff]  ;;  %v6672_v49 = vld [vmem:[#allocation76_spill] sm:$0xff] }
 0x2a2   :  { %v4598_v13 = vpop.permute.xlu1 %1279  ;;  %v4600_v61 = vpop.permute.xlu0 %1277  ;;  %v4606_v1 = vadd.f32 %v6656_v7, %v1122_v38  ;;  %v4627_v38 = vadd.f32 %v6662_v45, %v963_v32  ;;  %v966_v27 = vadd.f32 %v6665_v10, %v3442_v52  ;;  %v4636_v7 = vadd.f32 %v6666_v30, %v1123_v25  ;;  %v6668_v28 = vld [vmem:[#allocation85_spill] sm:$0xff]  ;;  %v6669_v32 = vld [vmem:[#allocation86_spill] sm:$0xff]  ;;  %v6675_v30 = vld [vmem:[#allocation88_spill] sm:$0xff] }
 0x2a3   :  { %6653 = vst [vmem:[#allocation41_spill] sm:$0xff] %v4598_v13  ;;  %6654 = vst [vmem:[#allocation43_spill] sm:$0xff] %v4600_v61  ;;  %v936_v60 = vadd.f32 %v6668_v28, %v6607_v0  ;;  %v935_v51 = vadd.f32 %v6669_v32, %v6608_v63  ;;  %v1126_v36 = vadd.f32 %v6672_v49, %v934_v11  ;;  %v6673_v31 = vld [vmem:[#allocation77_spill] sm:$0xff]  ;;  %v6674_v10 = vld [vmem:[#allocation78_spill] sm:$0xff] }
 0x2a4   :  { %1459 = vrot.lane.b32.xlu1 %v3538_v33, %s3020_s13  ;;  %1457 = vrot.lane.b32.xlu0 %v3542_v37, %s3020_s13  ;;  %v1125_v52 = vadd.f32 %v6673_v31, %v933_v15  ;;  %v4651_v25 = vadd.f32 %v6674_v10, %v966_v27  ;;  %v968_v53 = vadd.f32 %v6675_v30, %v3490_v4  ;;  %v6676_v23 = vld [vmem:[#allocation89_spill] sm:$0xff]  ;;  %v6677_v28 = vld [vmem:[#allocation90_spill] sm:$0xff]  ;;  %v6678_v63 = vld [vmem:[#allocation91_spill] sm:$0xff] }
 0x2a5   :  { %v967_v0 = vadd.f32 %v6676_v23, %v3494_v6  ;;  %v1128_v61 = vadd.f32 %v6677_v28, %v936_v60  ;;  %v1127_v32 = vadd.f32 %v6678_v63, %v935_v51  ;;  %v6679_v11 = vld [vmem:[#allocation79_spill] sm:$0xff]  ;;  %v6680_v27 = vld [vmem:[#allocation81_spill] sm:$0xff]  ;;  %v6681_v4 = vld [vmem:[#allocation82_spill] sm:$0xff] }
 0x2a6   :  { %v4644_v45 = vpop.permute.xlu1 %1283  ;;  %v4646_v24 = vpop.permute.xlu0 %1281  ;;  %v4664_v15 = vadd.f32 %v6679_v11, %v965_v58  ;;  %v4667_v49 = vadd.f32 %v6680_v27, %v1126_v36  ;;  %v4670_v31 = vadd.f32 %v6681_v4, %v1125_v52  ;;  %v6682_v6 = vld [vmem:[#allocation103_spill] sm:$0xff]  ;;  %v6683_v10 = vld [vmem:[#allocation93_spill] sm:$0xff]  ;;  %v6684_v30 = vld [vmem:[#allocation94_spill] sm:$0xff] }
 0x2a7   :  { %6670 = vst [vmem:[#allocation52_spill] sm:$0xff] %v4644_v45  ;;  %6671 = vst [vmem:[#allocation40_spill] sm:$0xff] %v4646_v24  ;;  %v937_v60 = vadd.f32 %v6682_v6, %v6611_v48  ;;  %v4675_v51 = vadd.f32 %v6683_v10, %v968_v53  ;;  %v4678_v23 = vadd.f32 %v6684_v30, %v967_v0  ;;  %v6685_v28 = vld [vmem:[#allocation97_spill] sm:$0xff]  ;;  %v6687_v58 = vld [vmem:[#allocation98_spill] sm:$0xff] }
 0x2a8   :  { %1463 = vrot.lane.b32.xlu1 %v3572_v59, %s3020_s13  ;;  %1461 = vrot.lane.b32.xlu0 %v3591_v9, %s3020_s13  ;;  %v4681_v63 = vadd.f32 %v6685_v28, %v1128_v61  ;;  %v4684_v11 = vadd.f32 %v6687_v58, %v1127_v32  ;;  %v6691_v52 = vld [vmem:[#allocation102_spill] sm:$0xff]  ;;  %v6692_v48 = vld [vmem:[#allocation105_spill] sm:$0xff] }
 0x2a9   :  { %v938_v4 = vadd.f32 %v6691_v52, %v3522_v26  ;;  %v970_v53 = vadd.f32 %v6692_v48, %v3538_v33  ;;  %v6693_v6 = vld [vmem:[#allocation106_spill] sm:$0xff]  ;;  %v6694_v10 = vld [vmem:[#allocation109_spill] sm:$0xff]  ;;  %v6698_v26 = vld [vmem:[#allocation108_spill] sm:$0xff] }
 0x2aa   :  { %6686 = vst [vmem:[#allocation42_spill] sm:$0xff] %v4681_v63  ;;  %6688 = vst [vmem:[#allocation46_spill] sm:$0xff] %v4684_v11  ;;  %v4686_v36 = vpop.permute.xlu1 %1287  ;;  %v4688_v27 = vpop.permute.xlu0 %1285  ;;  %v969_v0 = vadd.f32 %v6693_v6, %v3542_v37  ;;  %v1129_v30 = vadd.f32 %v6694_v10, %v937_v60  ;;  %v6695_v61 = vld [vmem:[#allocation118_spill] sm:$0xff]  ;;  %v6696_v32 = vld [vmem:[#allocation121_spill] sm:$0xff] }
 0x2ab   :  { %6689 = vst [vmem:[#allocation50_spill] sm:$0xff] %v4686_v36  ;;  %6690 = vst [vmem:[#allocation54_spill] sm:$0xff] %v4688_v27  ;;  %v940_v28 = vadd.f32 %v6695_v61, %v3559_v55  ;;  %v972_v58 = vadd.f32 %v6696_v32, %v3572_v59  ;;  %v6697_v11 = vld [vmem:[#allocation122_spill] sm:$0xff]  ;;  %v4708_v33 = vadd.f32 %v6698_v26, %v938_v4  ;;  %v6699_v37 = vld [vmem:[#allocation113_spill] sm:$0xff] }
 0x2ac   :  { %v939_v27 = vadd.f32 %v6697_v11, %v3580_v62  ;;  %1467 = vrot.lane.b32.xlu1 %v3616_v47, %s3020_s13  ;;  %1465 = vrot.lane.b32.xlu0 %v3639_v22, %s3020_s13  ;;  %v4711_v60 = vadd.f32 %v6699_v37, %v970_v53  ;;  %v6700_v52 = vld [vmem:[#allocation114_spill] sm:$0xff]  ;;  %v6702_v59 = vld [vmem:[#allocation125_spill] sm:$0xff]  ;;  %v6703_v6 = vld [vmem:[#allocation119_spill] sm:$0xff] }
 0x2ad   :  { %v4714_v55 = vadd.f32 %v6700_v52, %v969_v0  ;;  %v971_v48 = vadd.f32 %v6702_v59, %v3591_v9  ;;  %v4719_v62 = vadd.f32 %v6703_v6, %v1129_v30  ;;  %v6705_v11 = vld [vmem:[#allocation124_spill] sm:$0xff]  ;;  %v6706_v61 = vld [vmem:[#allocation129_spill] sm:$0xff]  ;;  %v6708_v4 = vld [vmem:[#allocation130_spill] sm:$0xff] }
 0x2ae   :  { %v4722_v10 = vadd.f32 %v6705_v11, %v940_v28  ;;  %v4725_v32 = vadd.f32 %v6706_v61, %v972_v58  ;;  %v4728_v26 = vadd.f32 %v6708_v4, %v939_v27  ;;  %v4730_v53 = vpop.permute.xlu1 %1291  ;;  %v4732_v37 = vpop.permute.xlu0 %1289  ;;  %v6711_v0 = vld [vmem:[#allocation134_spill] sm:$0xff]  ;;  %v6712_v9 = vld [vmem:[#allocation135_spill] sm:$0xff]  ;;  %v6714_v30 = vld [vmem:[#allocation137_spill] sm:$0xff] }
 0x2af   :  { %6701 = vst [vmem:[#allocation57_spill] sm:$0xff] %v4714_v55  ;;  %6704 = vst [vmem:[#allocation62_spill] sm:$0xff] %v4719_v62  ;;  %v942_v52 = vadd.f32 %v6711_v0, %v3603_v40  ;;  %v4737_v59 = vadd.f32 %v6712_v9, %v971_v48  ;;  %v974_v28 = vadd.f32 %v6714_v30, %v3616_v47  ;;  %v6715_v6 = vld [vmem:[#allocation138_spill] sm:$0xff]  ;;  %v6716_v11 = vld [vmem:[#allocation141_spill] sm:$0xff] }
 0x2b0   :  { %6707 = vst [vmem:[#allocation45_spill] sm:$0xff] %v4725_v32  ;;  %6709 = vst [vmem:[#allocation49_spill] sm:$0xff] %v4730_v53  ;;  %v941_v58 = vadd.f32 %v6715_v6, %v3624_v54  ;;  %v973_v27 = vadd.f32 %v6716_v11, %v3639_v22  ;;  %v6717_v61 = vld [vmem:[#allocation150_spill] sm:$0xff]  ;;  %v6718_v62 = vld [vmem:[#allocation153_spill] sm:$0xff]  ;;  %1471 = vrot.lane.b32.xlu1 %v3676_v50, %s3020_s13  ;;  %1469 = vrot.lane.b32.xlu0 %v3699_v20, %s3020_s13 }
 0x2b1   :  { %6710 = vst [vmem:[#allocation53_spill] sm:$0xff] %v4732_v37  ;;  %6713 = vst [vmem:[#allocation58_spill] sm:$0xff] %v4737_v59  ;;  %v944_v4 = vadd.f32 %v6717_v61, %v3659_v3  ;;  %v976_v37 = vadd.f32 %v6718_v62, %v3676_v50  ;;  %v6719_v40 = vld [vmem:[#allocation140_spill] sm:$0xff]  ;;  %v6720_v48 = vld [vmem:[#allocation145_spill] sm:$0xff] }
 0x2b2   :  { %v4754_v47 = vadd.f32 %v6719_v40, %v942_v52  ;;  %v4757_v54 = vadd.f32 %v6720_v48, %v974_v28  ;;  %v6722_v22 = vld [vmem:[#allocation154_spill] sm:$0xff]  ;;  %v6723_v3 = vld [vmem:[#allocation157_spill] sm:$0xff]  ;;  %v6725_v6 = vld [vmem:[#allocation151_spill] sm:$0xff]  ;;  %v4775_v28 = vpop.permute.xlu1 %1295  ;;  %v4777_v40 = vpop.permute.xlu0 %1293 }
 0x2b3   :  { %v943_v0 = vadd.f32 %v6722_v22, %v3684_v56  ;;  %v975_v9 = vadd.f32 %v6723_v3, %v3699_v20  ;;  %v6724_v30 = vld [vmem:[#allocation146_spill] sm:$0xff]  ;;  %v4767_v50 = vadd.f32 %v6725_v6, %v973_v27  ;;  %v6727_v11 = vld [vmem:[#allocation156_spill] sm:$0xff]  ;;  %v4773_v52 = vadd.f32 %v4150_v8, %v976_v37  ;;  %6729 = vst [vmem:[#allocation65_spill] sm:$0xff] %v4775_v28  ;;  %v6731_v56 = vld [vmem:[#allocation161_spill] sm:$0xff] }
 0x2b4   :  { %6721 = vst [vmem:[#allocation55_spill] sm:$0xff] %v4757_v54  ;;  %v4764_v62 = vadd.f32 %v6724_v30, %v941_v58  ;;  %v4770_v61 = vadd.f32 %v6727_v11, %v944_v4  ;;  %6730 = vst [vmem:[#allocation69_spill] sm:$0xff] %v4777_v40  ;;  %v946_v20 = vadd.f32 %v4168_v5, %v3719_v21  ;;  %v6732_v58 = vld [vmem:[#allocation165_spill] sm:$0xff]  ;;  %v6734_v27 = vld [vmem:[#allocation167_spill] sm:$0xff]  ;;  %1475 = vrot.lane.b32.xlu1 %v3736_v42, %s3020_s13 }
 0x2b5   :  { %6726 = vst [vmem:[#allocation61_spill] sm:$0xff] %v4767_v50  ;;  %6728 = vst [vmem:[#allocation64_spill] sm:$0xff] %v4773_v52  ;;  %v4780_v48 = vadd.f32 %v6731_v56, %v943_v0  ;;  %v4785_v22 = vadd.f32 %v6732_v58, %v975_v9  ;;  %v978_v4 = vadd.f32 %v6734_v27, %v3736_v42  ;;  %v6735_v3 = vld [vmem:[#allocation168_spill] sm:$0xff]  ;;  %v6736_v37 = vld [vmem:[#allocation170_spill] sm:$0xff]  ;;  %1473 = vrot.lane.b32.xlu0 %v3759_v44, %s3020_s13 }
 0x2b6   :  { %v945_v8 = vadd.f32 %v6735_v3, %v3744_v14  ;;  %v977_v30 = vadd.f32 %v6736_v37, %v3759_v44  ;;  %v6737_v6 = vld [vmem:[#allocation173_spill] sm:$0xff]  ;;  %v6739_v0 = vld [vmem:[#allocation175_spill] sm:$0xff]  ;;  %v6740_v14 = vld [vmem:[#allocation176_spill] sm:$0xff]  ;;  %v4820_v40 = vpop.permute.xlu1 %1299 }
 0x2b7   :  { %6733 = vst [vmem:[#allocation70_spill] sm:$0xff] %v4785_v22  ;;  %v948_v11 = vadd.f32 %v6737_v6, %v3779_v41  ;;  %v6738_v21 = vld [vmem:[#allocation169_spill] sm:$0xff]  ;;  %v980_v9 = vadd.f32 %v6739_v0, %v3796_v17  ;;  %v947_v56 = vadd.f32 %v6740_v14, %v3804_v12  ;;  %v6741_v58 = vld [vmem:[#allocation178_spill] sm:$0xff]  ;;  %v6742_v3 = vld [vmem:[#allocation171_spill] sm:$0xff]  ;;  %v4822_v0 = vpop.permute.xlu0 %1297 }
 0x2b8   :  { %v4800_v5 = vadd.f32 %v6738_v21, %v946_v20  ;;  %v979_v27 = vadd.f32 %v6741_v58, %v3819_v18  ;;  %v4809_v41 = vadd.f32 %v6742_v3, %v978_v4  ;;  %v6744_v37 = vld [vmem:[#allocation172_spill] sm:$0xff]  ;;  %v6745_v6 = vld [vmem:[#allocation174_spill] sm:$0xff]  ;;  %v6747_v20 = vld [vmem:[#allocation177_spill] sm:$0xff]  ;;  %6748 = vst [vmem:[#allocation74_spill] sm:$0xff] %v4820_v40  ;;  %1479 = vrot.lane.b32.xlu1 %v3796_v17, %s3020_s13 }
 0x2b9   :  { %v4812_v42 = vadd.f32 %v6744_v37, %v945_v8  ;;  %v4815_v44 = vadd.f32 %v6745_v6, %v977_v30  ;;  %v4818_v21 = vadd.f32 %v6747_v20, %v948_v11  ;;  %6749 = vst [vmem:[#allocation85_spill] sm:$0xff] %v4822_v0  ;;  %v6750_v12 = vld [vmem:[#allocation179_spill] sm:$0xff]  ;;  %v6752_v58 = vld [vmem:[#allocation180_spill] sm:$0xff]  ;;  %v6753_v4 = vld [vmem:[#allocation181_spill] sm:$0xff]  ;;  %1477 = vrot.lane.b32.xlu0 %v3819_v18, %s3020_s13 }
 0x2ba   :  { %6743 = vst [vmem:[#allocation73_spill] sm:$0xff] %v4809_v41  ;;  %v4825_v14 = vadd.f32 %v6750_v12, %v980_v9  ;;  %v4828_v28 = vadd.f32 %v6752_v58, %v947_v56  ;;  %v950_v8 = vadd.f32 %v6753_v4, %v3839_v35  ;;  %v6754_v3 = vld [vmem:[#allocation182_spill] sm:$0xff]  ;;  %v6756_v30 = vld [vmem:[#allocation183_spill] sm:$0xff]  ;;  %v6757_v6 = vld [vmem:[#allocation184_spill] sm:$0xff]  ;;  %v4865_v36 = vpop.permute.xlu1 %1303 }
 0x2bb   :  { %6746 = vst [vmem:[#allocation67_spill] sm:$0xff] %v4815_v44  ;;  %v4833_v37 = vadd.f32 %v6754_v3, %v979_v27  ;;  %v982_v11 = vadd.f32 %v6756_v30, %v3856_v29  ;;  %v949_v20 = vadd.f32 %v6757_v6, %v3864_v57  ;;  %v6758_v0 = vld [vmem:[#allocation186_spill] sm:$0xff]  ;;  %v6759_v9 = vld [vmem:[#allocation185_spill] sm:$0xff]  ;;  %v6761_v12 = vld [vmem:[#allocation99_spill] sm:$0xff] }
 0x2bc   :  { %6751 = vst [vmem:[#allocation86_spill] sm:$0xff] %v4825_v14  ;;  %v981_v40 = vadd.f32 %v6758_v0, %v3879_v2  ;;  %v4846_v35 = vadd.f32 %v6759_v9, %v950_v8  ;;  %v6760_v56 = vld [vmem:[#allocation189_spill] sm:$0xff]  ;;  %v6762_v58 = vld [vmem:[#allocation191_spill] sm:$0xff]  ;;  %v6763_v3 = vld [vmem:[#allocation100_spill] sm:$0xff]  ;;  %1483 = vrot.lane.b32.xlu1 %v3856_v29, %s3020_s13 }
 0x2bd   :  { %6755 = vst [vmem:[#allocation76_spill] sm:$0xff] %v4833_v37  ;;  %v952_v27 = vadd.f32 %v6760_v56, %v3899_v43  ;;  %v984_v4 = vadd.f32 %v6762_v58, %v6761_v12  ;;  %v6764_v57 = vld [vmem:[#allocation192_spill] sm:$0xff]  ;;  %v6765_v6 = vld [vmem:[#allocation187_spill] sm:$0xff]  ;;  %v6768_v37 = vld [vmem:[#allocation190_spill] sm:$0xff]  ;;  %v4867_v43 = vpop.permute.xlu0 %1301  ;;  %1481 = vrot.lane.b32.xlu0 %v3879_v2, %s3020_s13 }
 0x2be   :  { %v951_v30 = vadd.f32 %v6764_v57, %v6763_v3  ;;  %v4855_v0 = vadd.f32 %v6765_v6, %v982_v11  ;;  %v6767_v53 = vld [vmem:[#allocation188_spill] sm:$0xff]  ;;  %v4861_v18 = vadd.f32 %v6768_v37, %v981_v40  ;;  %v6771_v9 = vld [vmem:[#allocation194_spill] sm:$0xff]  ;;  %6772 = vst [vmem:[#allocation88_spill] sm:$0xff] %v4865_v36  ;;  %6773 = vst [vmem:[#allocation89_spill] sm:$0xff] %v4867_v43 }
 0x2bf   :  { %v4858_v17 = vadd.f32 %v6767_v53, %v949_v20  ;;  %v6770_v8 = vld [vmem:[#allocation104_spill] sm:$0xff]  ;;  %v6774_v56 = vld [vmem:[#allocation193_spill] sm:$0xff]  ;;  %v6775_v3 = vld [vmem:[#allocation195_spill] sm:$0xff] }
 0x2c0   :  { %6766 = vst [vmem:[#allocation77_spill] sm:$0xff] %v4855_v0  ;;  %6769 = vst [vmem:[#allocation78_spill] sm:$0xff] %v4861_v18  ;;  %v983_v63 = vadd.f32 %v6771_v9, %v6770_v8  ;;  %v4870_v58 = vadd.f32 %v6774_v56, %v952_v27  ;;  %v4873_v57 = vadd.f32 %v6775_v3, %v984_v4  ;;  %v6777_v11 = vld [vmem:[#allocation196_spill] sm:$0xff]  ;;  %v6778_v53 = vld [vmem:[#allocation110_spill] sm:$0xff]  ;;  %1487 = vrot.lane.b32.xlu1 %v6761_v12, %s3020_s13 }
 0x2c1   :  { %v4876_v6 = vadd.f32 %v6777_v11, %v951_v30  ;;  %v6779_v20 = vld [vmem:[#allocation197_spill] sm:$0xff]  ;;  %v6780_v37 = vld [vmem:[#allocation198_spill] sm:$0xff]  ;;  %v6782_v9 = vld [vmem:[#allocation115_spill] sm:$0xff]  ;;  %v4908_v13 = vpop.permute.xlu0 %1305  ;;  %1485 = vrot.lane.b32.xlu0 %v6770_v8, %s3020_s13 }
 0x2c2   :  { %6776 = vst [vmem:[#allocation90_spill] sm:$0xff] %v4873_v57  ;;  %v954_v40 = vadd.f32 %v6779_v20, %v6778_v53  ;;  %v4881_v18 = vadd.f32 %v6780_v37, %v983_v63  ;;  %v6783_v0 = vld [vmem:[#allocation199_spill] sm:$0xff]  ;;  %v6784_v14 = vld [vmem:[#allocation116_spill] sm:$0xff]  ;;  %v6787_v4 = vld [vmem:[#allocation202_spill] sm:$0xff] }
 0x2c3   :  { %v986_v36 = vadd.f32 %v6783_v0, %v6782_v9  ;;  %v6785_v43 = vld [vmem:[#allocation200_spill] sm:$0xff]  ;;  %v6788_v56 = vld [vmem:[#allocation126_spill] sm:$0xff]  ;;  %v6789_v3 = vld [vmem:[#allocation205_spill] sm:$0xff]  ;;  %6801 = vst [vmem:[#allocation82_spill] sm:$0xff] %v4908_v13 }
 0x2c4   :  { %6781 = vst [vmem:[#allocation91_spill] sm:$0xff] %v4881_v18  ;;  %v953_v24 = vadd.f32 %v6785_v43, %v6784_v14  ;;  %v6786_v27 = vld [vmem:[#allocation120_spill] sm:$0xff]  ;;  %v956_v11 = vadd.f32 %v6789_v3, %v6788_v56  ;;  %v6790_v63 = vld [vmem:[#allocation131_spill] sm:$0xff]  ;;  %v6794_v57 = vld [vmem:[#allocation201_spill] sm:$0xff]  ;;  %1491 = vrot.lane.b32.xlu1 %v6782_v9, %s3020_s13 }
 0x2c5   :  { %v985_v30 = vadd.f32 %v6787_v4, %v6786_v27  ;;  %v6791_v53 = vld [vmem:[#allocation207_spill] sm:$0xff]  ;;  %v6792_v37 = vld [vmem:[#allocation132_spill] sm:$0xff]  ;;  %v1146_v14 = vadd.f32 %v6794_v57, %v954_v40  ;;  %v6799_v41 = vld [vmem:[#allocation210_spill] sm:$0xff]  ;;  %v4906_v4 = vpop.permute.xlu1 %1307  ;;  %1489 = vrot.lane.b32.xlu0 %v6786_v27, %s3020_s13 }
 0x2c6   :  { %v988_v20 = vadd.f32 %v6791_v53, %v6790_v63  ;;  %v6793_v0 = vld [vmem:[#allocation208_spill] sm:$0xff]  ;;  %v6795_v43 = vld [vmem:[#allocation203_spill] sm:$0xff]  ;;  %6800 = vst [vmem:[#allocation81_spill] sm:$0xff] %v4906_v4  ;;  %v6802_v56 = vld [vmem:[#allocation206_spill] sm:$0xff] }
 0x2c7   :  { %v955_v18 = vadd.f32 %v6793_v0, %v6792_v37  ;;  %v4901_v44 = vadd.f32 %v6795_v43, %v986_v36  ;;  %v6797_v29 = vld [vmem:[#allocation204_spill] sm:$0xff]  ;;  %v4911_v3 = vadd.f32 %v6802_v56, %v985_v30  ;;  %v6804_v53 = vld [vmem:[#allocation209_spill] sm:$0xff]  ;;  %v6805_v37 = vld [vmem:[#allocation211_spill] sm:$0xff] }
 0x2c8   :  { %v1145_v45 = vadd.f32 %v6797_v29, %v953_v24  ;;  %v6798_v2 = vld [vmem:[#allocation136_spill] sm:$0xff]  ;;  %v1148_v52 = vadd.f32 %v6804_v53, %v956_v11  ;;  %v4915_v0 = vadd.f32 %v6805_v37, %v988_v20  ;;  %v6808_v40 = vld [vmem:[#allocation142_spill] sm:$0xff]  ;;  %v6809_v43 = vld [vmem:[#allocation213_spill] sm:$0xff]  ;;  %1495 = vrot.lane.b32.xlu1 %v6790_v63, %s3020_s13 }
 0x2c9   :  { %6796 = vst [vmem:[#allocation79_spill] sm:$0xff] %v4901_v44  ;;  %v987_v22 = vadd.f32 %v6799_v41, %v6798_v2  ;;  %6803 = vst [vmem:[#allocation103_spill] sm:$0xff] %v4911_v3  ;;  %v6807_v57 = vld [vmem:[#allocation212_spill] sm:$0xff]  ;;  %v958_v24 = vadd.f32 %v6809_v43, %v6808_v40  ;;  %v6810_v29 = vld [vmem:[#allocation214_spill] sm:$0xff]  ;;  %1493 = vrot.lane.b32.xlu0 %v6798_v2, %s3020_s13 }
 0x2ca   :  { %6806 = vst [vmem:[#allocation93_spill] sm:$0xff] %v4915_v0  ;;  %v1147_v36 = vadd.f32 %v6807_v57, %v955_v18  ;;  %v6812_v41 = vld [vmem:[#allocation147_spill] sm:$0xff]  ;;  %v6814_v30 = vld [vmem:[#allocation148_spill] sm:$0xff]  ;;  %v6817_v18 = vld [vmem:[#allocation218_spill] sm:$0xff] }
 0x2cb   :  { %v4921_v44 = vadd.f32 %v6810_v29, %v987_v22  ;;  %v6813_v4 = vld [vmem:[#allocation215_spill] sm:$0xff]  ;;  %v6815_v11 = vld [vmem:[#allocation216_spill] sm:$0xff]  ;;  %v6818_v37 = vld [vmem:[#allocation158_spill] sm:$0xff] }
 0x2cc   :  { %v990_v50 = vadd.f32 %v6813_v4, %v6812_v41  ;;  %v957_v20 = vadd.f32 %v6815_v11, %v6814_v30  ;;  %v6816_v56 = vld [vmem:[#allocation152_spill] sm:$0xff]  ;;  %v6819_v57 = vld [vmem:[#allocation221_spill] sm:$0xff]  ;;  %v6820_v22 = vld [vmem:[#allocation162_spill] sm:$0xff]  ;;  %v4945_v11 = vpop.permute.xlu1 %1311  ;;  %1499 = vrot.lane.b32.xlu1 %v6812_v41, %s3020_s13 }
 0x2cd   :  { %6811 = vst [vmem:[#allocation94_spill] sm:$0xff] %v4921_v44  ;;  %v989_v53 = vadd.f32 %v6817_v18, %v6816_v56  ;;  %v960_v40 = vadd.f32 %v6819_v57, %v6818_v37  ;;  %v6821_v43 = vld [vmem:[#allocation223_spill] sm:$0xff]  ;;  %v6822_v13 = vld [vmem:[#allocation217_spill] sm:$0xff]  ;;  %v6826_v3 = vld [vmem:[#allocation224_spill] sm:$0xff]  ;;  %v4947_v18 = vpop.permute.xlu0 %1309  ;;  %1497 = vrot.lane.b32.xlu0 %v6816_v56, %s3020_s13 }
 0x2ce   :  { %v992_v29 = vadd.f32 %v6821_v43, %v6820_v22  ;;  %v1150_v4 = vadd.f32 %v6822_v13, %v958_v24  ;;  %v6823_v44 = vld [vmem:[#allocation219_spill] sm:$0xff]  ;;  %v6827_v54 = vld [vmem:[#allocation166_spill] sm:$0xff]  ;;  %6829 = vst [vmem:[#allocation98_spill] sm:$0xff] %v4945_v11  ;;  %6830 = vst [vmem:[#allocation102_spill] sm:$0xff] %v4947_v18 }
 0x2cf   :  { %v4939_v0 = vadd.f32 %v6823_v44, %v990_v50  ;;  %v6825_v12 = vld [vmem:[#allocation163_spill] sm:$0xff]  ;;  %v6828_v59 = vld [vmem:[#allocation226_spill] sm:$0xff]  ;;  %v6831_v32 = vld [vmem:[#allocation220_spill] sm:$0xff] }
 0x2d0   :  { %v959_v8 = vadd.f32 %v6826_v3, %v6825_v12  ;;  %v991_v30 = vadd.f32 %v6828_v59, %v6827_v54  ;;  %v1149_v37 = vadd.f32 %v6831_v32, %v957_v20  ;;  %v6832_v57 = vld [vmem:[#allocation222_spill] sm:$0xff]  ;;  %v6833_v43 = vld [vmem:[#allocation225_spill] sm:$0xff]  ;;  %v6834_v24 = vld [vmem:[#allocation227_spill] sm:$0xff]  ;;  %1503 = vrot.lane.b32.xlu1 %v6820_v22, %s3020_s13 }
 0x2d1   :  { %6824 = vst [vmem:[#allocation97_spill] sm:$0xff] %v4939_v0  ;;  %v4951_v55 = vadd.f32 %v6832_v57, %v989_v53  ;;  %v1152_v13 = vadd.f32 %v6833_v43, %v960_v40  ;;  %v4955_v50 = vadd.f32 %v6834_v24, %v992_v29  ;;  %v6835_v44 = vld [vmem:[#allocation228_spill] sm:$0xff]  ;;  %v6836_v3 = vld [vmem:[#allocation229_spill] sm:$0xff]  ;;  %v6837_v59 = vld [vmem:[#allocation230_spill] sm:$0xff]  ;;  %1501 = vrot.lane.b32.xlu0 %v6827_v54, %s3020_s13 }
 0x2d2   :  { %v1151_v0 = vadd.f32 %v6835_v44, %v959_v8  ;;  %v4960_v12 = vadd.f32 %v6836_v3, %v4708_v33  ;;  %v4963_v11 = vadd.f32 %v6837_v59, %v991_v30  ;;  %v6839_v32 = vld [vmem:[#allocation10_spill] sm:$0xff]  ;;  %v6841_v33 = vld [vmem:[#allocation17_spill] sm:$0xff]  ;;  %v6843_v9 = vld [vmem:[#allocation23_spill] sm:$0xff]  ;;  %v1380_v44 = vpop.permute.xlu1 %1379  ;;  %v1378_v3 = vpop.permute.xlu0 %1377 }
 0x2d3   :  { %v4971_v20 = vadd.f32 %v6839_v32, %v4722_v10  ;;  %v6840_v53 = vld [vmem:[#allocation14_spill] sm:$0xff]  ;;  %v4979_v29 = vadd.f32 %v6841_v33, %v4754_v47  ;;  %v4987_v57 = vadd.f32 %v6843_v9, %v4770_v61  ;;  %v6844_v27 = vld [vmem:[#allocation24_spill] sm:$0xff]  ;;  %v6845_v43 = vld [vmem:[#allocation29_spill] sm:$0xff] }
 0x2d4   :  { %6838 = vst [vmem:[#allocation105_spill] sm:$0xff] %v4963_v11  ;;  %v4975_v40 = vadd.f32 %v6840_v53, %v4728_v26  ;;  %v6842_v8 = vld [vmem:[#allocation18_spill] sm:$0xff]  ;;  %v4991_v10 = vadd.f32 %v6844_v27, %v4780_v48  ;;  %v4995_v26 = vadd.f32 %v6845_v43, %v4800_v5  ;;  %v6846_v24 = vld [vmem:[#allocation231_spill] sm:$0xff]  ;;  %v6848_v61 = vld [vmem:[#allocation233_spill] sm:$0xff]  ;;  %v1506_v48 = vadd.f32 %v1380_v44, %v4606_v1 }
 0x2d5   :  { %v4983_v30 = vadd.f32 %v6842_v8, %v4764_v62  ;;  %v4999_v47 = vadd.f32 %v6846_v24, %v4812_v42  ;;  %v6847_v62 = vld [vmem:[#allocation232_spill] sm:$0xff]  ;;  %v5007_v32 = vadd.f32 %v6848_v61, %v4828_v28  ;;  %v1505_v53 = vadd.f32 %v1378_v3, %v4614_v39  ;;  %v6849_v5 = vld [vmem:[#allocation234_spill] sm:$0xff]  ;;  %v6850_v42 = vld [vmem:[#allocation235_spill] sm:$0xff] }
 0x2d6   :  { %v5003_v59 = vadd.f32 %v6847_v62, %v4818_v21  ;;  %v5013_v33 = vadd.f32 %v6849_v5, %v4846_v35  ;;  %v5017_v8 = vadd.f32 %v6850_v42, %v4858_v17  ;;  %v6851_v9 = vld [vmem:[#allocation236_spill] sm:$0xff]  ;;  %v6852_v1 = vld [vmem:[#allocation237_spill] sm:$0xff]  ;;  %v6853_v28 = vld [vmem:[#allocation238_spill] sm:$0xff]  ;;  %v1570_v27 = vmul.f32 2e-05, %v1506_v48  ;;  %v1384_v61 = vpop.permute.xlu1 %1383 }
 0x2d7   :  { %v5021_v21 = vadd.f32 %v6851_v9, %v4870_v58  ;;  %v5029_v39 = vadd.f32 %v6852_v1, %v4876_v6  ;;  %v5032_v35 = vadd.f32 %v6853_v28, %v1146_v14  ;;  %v1569_v17 = vmul.f32 2e-05, %v1505_v53  ;;  %v6854_v43 = vld [vmem:[#allocation239_spill] sm:$0xff]  ;;  %v6855_v58 = vld [vmem:[#allocation240_spill] sm:$0xff]  ;;  %v6856_v3 = vld [vmem:[#allocation241_spill] sm:$0xff]  ;;  %v1382_v6 = vpop.permute.xlu0 %1381 }
 0x2d8   :  { %v5035_v24 = vadd.f32 %v6854_v43, %v1145_v45  ;;  %v5038_v44 = vadd.f32 %v6855_v58, %v1148_v52  ;;  %v5041_v63 = vadd.f32 %v6856_v3, %v1147_v36  ;;  %v6857_v62 = vld [vmem:[#allocation242_spill] sm:$0xff]  ;;  %v5046_v5 = vadd.f32 2.0, %v1570_v27  ;;  %v6858_v53 = vld [vmem:[#allocation243_spill] sm:$0xff]  ;;  %v6859_v52 = vld [vmem:[#allocation244_spill] sm:$0xff] }
 0x2d9   :  { %v5044_v2 = vadd.f32 %v6857_v62, %v1150_v4  ;;  %v5048_v14 = vadd.f32 2.0, %v1569_v17  ;;  %v1508_v48 = vadd.f32 %v1384_v61, %v4620_v19  ;;  %v1507_v45 = vadd.f32 %v1382_v6, %v4636_v7  ;;  %v6860_v36 = vld [vmem:[#allocation245_spill] sm:$0xff]  ;;  %v6861_v4 = vld [vmem:[#allocation246_spill] sm:$0xff]  ;;  %v6862_v7 = vld [vmem:[#allocation247_spill] sm:$0xff] }
 0x2da   :  { %v5053_v42 = vadd.f32 %v6858_v53, %v1149_v37  ;;  %v5056_v9 = vadd.f32 %v6859_v52, %v1152_v13  ;;  %v5059_v1 = vadd.f32 %v6860_v36, %v1151_v0  ;;  %v5067_v19 = vadd.f32 %v6861_v4, %v4603_v16  ;;  %v6863_v13 = vld [vmem:[#allocation248_spill] sm:$0xff]  ;;  %v6864_v0 = vld [vmem:[#allocation249_spill] sm:$0xff]  ;;  %v6865_v56 = vld [vmem:[#allocation250_spill] sm:$0xff] }
 0x2db   :  { %v5071_v37 = vadd.f32 %v6862_v7, %v4609_v46  ;;  %v5075_v28 = vadd.f32 %v6863_v13, %v4617_v34  ;;  %2739 = vrsqrt.f32 %v5046_v5  ;;  %v5080_v41 = vadd.f32 %v6864_v0, %v4627_v38  ;;  %v6866_v16 = vld [vmem:[#allocation251_spill] sm:$0xff]  ;;  %v1388_v46 = vpop.permute.xlu1 %1387  ;;  %v1386_v43 = vpop.permute.xlu0 %1385  ;;  %v6867_v38 = vld [vmem:[#allocation252_spill] sm:$0xff]  ;;  %v6872_v36 = vld [vmem:[#allocation45_spill] sm:$0xff] }
 0x2dc   :  { %v5084_v27 = vadd.f32 %v6865_v56, %v4651_v25  ;;  %v5088_v17 = vadd.f32 %v6866_v16, %v4664_v15  ;;  %2741 = vrsqrt.f32 %v5048_v14  ;;  %v1572_v34 = vmul.f32 2e-05, %v1508_v48  ;;  %v6868_v25 = vld [vmem:[#allocation253_spill] sm:$0xff]  ;;  %v6869_v15 = vld [vmem:[#allocation254_spill] sm:$0xff]  ;;  %v6871_v52 = vld [vmem:[#allocation255_spill] sm:$0xff] }
 0x2dd   :  { %v1571_v58 = vmul.f32 2e-05, %v1507_v45  ;;  %v1510_v3 = vadd.f32 %v1388_v46, %v4667_v49  ;;  %v1509_v62 = vadd.f32 %v1386_v43, %v4670_v31  ;;  %v5095_v61 = vadd.f32 %v6867_v38, %v4675_v51  ;;  %v6870_v45 = vld [vmem:[#allocation57_spill] sm:$0xff]  ;;  %v6873_v4 = vld [vmem:[#allocation256_spill] sm:$0xff]  ;;  %v6874_v7 = vld [vmem:[#allocation58_spill] sm:$0xff] }
 0x2de   :  { %v5099_v6 = vadd.f32 %v6868_v25, %v4678_v23  ;;  %v5103_v53 = vadd.f32 %v6869_v15, %v4711_v60  ;;  %v5109_v49 = vadd.f32 2.0, %v1572_v34  ;;  %v5115_v23 = vadd.f32 %v6871_v52, %v6870_v45  ;;  %v6875_v13 = vld [vmem:[#allocation257_spill] sm:$0xff]  ;;  %v6877_v0 = vld [vmem:[#allocation55_spill] sm:$0xff]  ;;  %v6878_v54 = vld [vmem:[#allocation66_spill] sm:$0xff] }
 0x2df   :  { %v5111_v31 = vadd.f32 2.0, %v1571_v58  ;;  %v1574_v51 = vmul.f32 2e-05, %v1510_v3  ;;  %v1573_v48 = vmul.f32 2e-05, %v1509_v62  ;;  %v5119_v60 = vadd.f32 %v6873_v4, %v6872_v36  ;;  %v1392_v16 = vpop.permute.xlu1 %1391  ;;  %v1390_v46 = vpop.permute.xlu0 %1389  ;;  %v6880_v43 = vld [vmem:[#allocation61_spill] sm:$0xff] }
 0x2e0   :  { %v5123_v22 = vadd.f32 %v6875_v13, %v6874_v7  ;;  %v5127_v56 = vadd.f32 %v6878_v54, %v6877_v0  ;;  %v6881_v34 = vld [vmem:[#allocation258_spill] sm:$0xff]  ;;  %v6883_v3 = vld [vmem:[#allocation64_spill] sm:$0xff]  ;;  %v6884_v62 = vld [vmem:[#allocation41_spill] sm:$0xff]  ;;  %2743 = vrsqrt.f32 %v5109_v49  ;;  %vm1770_vm2 = vcmp.eq.f32.partialorder %v5046_v5, inf }
 0x2e1   :  { %v5131_v58 = vadd.f32 %v6881_v34, %v6880_v43  ;;  %v5135_v38 = vadd.f32 %v6884_v62, %v6883_v3  ;;  %v6886_v25 = vld [vmem:[#allocation70_spill] sm:$0xff]  ;;  %v6887_v15 = vld [vmem:[#allocation43_spill] sm:$0xff]  ;;  %v6889_v52 = vld [vmem:[#allocation73_spill] sm:$0xff]  ;;  %2745 = vrsqrt.f32 %v5111_v31  ;;  %v5155_v3 = vadd.f32 2.0, %v1574_v51 }
 0x2e2   :  { %6876 = vst [vmem:[#allocation106_spill] sm:$0xff] %v5123_v22  ;;  %6879 = vst [vmem:[#allocation109_spill] sm:$0xff] %v5127_v56  ;;  %v5139_v45 = vadd.f32 %v6887_v15, %v6886_v25  ;;  %v6890_v36 = vld [vmem:[#allocation52_spill] sm:$0xff]  ;;  %v6892_v7 = vld [vmem:[#allocation67_spill] sm:$0xff]  ;;  %v5157_v62 = vadd.f32 2.0, %v1573_v48  ;;  %vm1772_vm3 = vcmp.eq.f32.partialorder %v5046_v5, 0.0 }
 0x2e3   :  { %6882 = vst [vmem:[#allocation118_spill] sm:$0xff] %v5131_v58  ;;  %6885 = vst [vmem:[#allocation121_spill] sm:$0xff] %v5135_v38  ;;  %v5144_v4 = vadd.f32 %v6890_v36, %v6889_v52  ;;  %v6893_v13 = vld [vmem:[#allocation40_spill] sm:$0xff]  ;;  %v6895_v54 = vld [vmem:[#allocation86_spill] sm:$0xff]  ;;  %v1396_v38 = vpop.permute.xlu1 %1395  ;;  %2747 = vrsqrt.f32 %v5155_v3  ;;  %vm1763_vm4 = vcmp.eq.f32.partialorder %v5048_v14, inf  ;;  %vm1765_vm5 = vcmp.eq.f32.partialorder %v5048_v14, 0.0 }
 0x2e4   :  { %6888 = vst [vmem:[#allocation122_spill] sm:$0xff] %v5139_v45  ;;  %v5148_v0 = vadd.f32 %v6893_v13, %v6892_v7  ;;  %v6896_v43 = vld [vmem:[#allocation50_spill] sm:$0xff]  ;;  %v6900_v52 = vld [vmem:[#allocation76_spill] sm:$0xff]  ;;  %v6903_v7 = vld [vmem:[#allocation77_spill] sm:$0xff]  ;;  %2749 = vrsqrt.f32 %v5157_v62  ;;  %vm1784_vm6 = vcmp.eq.f32.partialorder %v5109_v49, inf  ;;  %vm1786_vm7 = vcmp.eq.f32.partialorder %v5109_v49, 0.0 }
 0x2e5   :  { %6891 = vst [vmem:[#allocation108_spill] sm:$0xff] %v5144_v4  ;;  %v5152_v34 = vadd.f32 %v6896_v43, %v6895_v54  ;;  %v6898_v25 = vld [vmem:[#allocation42_spill] sm:$0xff]  ;;  %v6904_v13 = vld [vmem:[#allocation49_spill] sm:$0xff]  ;;  %vm1777_vm8 = vcmp.eq.f32.partialorder %v5111_v31, inf  ;;  %vm1779_vm9 = vcmp.eq.f32.partialorder %v5111_v31, 0.0  ;;  %vm1798_vm10 = vcmp.eq.f32.partialorder %v5155_v3, inf }
 0x2e6   :  { %6894 = vst [vmem:[#allocation113_spill] sm:$0xff] %v5148_v0  ;;  %v1512_v15 = vadd.f32 %v1392_v16, %v6898_v25  ;;  %v6899_v18 = vld [vmem:[#allocation46_spill] sm:$0xff]  ;;  %v5167_v0 = vadd.f32 %v6904_v13, %v6903_v7  ;;  %v6907_v43 = vld [vmem:[#allocation53_spill] sm:$0xff]  ;;  %v1394_v16 = vpop.permute.xlu0 %1393  ;;  %v6912_v25 = vld [vmem:[#allocation91_spill] sm:$0xff]  ;;  %vm1800_vm11 = vcmp.eq.f32.partialorder %v5155_v3, 0.0  ;;  %vm1791_vm12 = vcmp.eq.f32.partialorder %v5157_v62, inf }
 0x2e7   :  { %6897 = vst [vmem:[#allocation114_spill] sm:$0xff] %v5152_v34  ;;  %v1511_v11 = vadd.f32 %v1390_v46, %v6899_v18  ;;  %v6901_v36 = vld [vmem:[#allocation54_spill] sm:$0xff]  ;;  %v6910_v45 = vld [vmem:[#allocation65_spill] sm:$0xff]  ;;  %v6918_v7 = vld [vmem:[#allocation103_spill] sm:$0xff]  ;;  %vm1793_vm13 = vcmp.eq.f32.partialorder %v5157_v62, 0.0 }
 0x2e8   :  { %v5163_v4 = vadd.f32 %v6901_v36, %v6900_v52  ;;  %6905 = vst [vmem:[#allocation119_spill] sm:$0xff] %v5167_v0  ;;  %v6906_v54 = vld [vmem:[#allocation78_spill] sm:$0xff]  ;;  %v6913_v18 = vld [vmem:[#allocation69_spill] sm:$0xff]  ;;  %v6915_v52 = vld [vmem:[#allocation79_spill] sm:$0xff] }
 0x2e9   :  { %v5171_v34 = vadd.f32 %v6907_v43, %v6906_v54  ;;  %v6909_v51 = vld [vmem:[#allocation90_spill] sm:$0xff]  ;;  %v5179_v46 = vadd.f32 %v6913_v18, %v6912_v25  ;;  %v6919_v13 = vld [vmem:[#allocation85_spill] sm:$0xff]  ;;  %v1576_v54 = vmul.f32 2e-05, %v1512_v15  ;;  %v1575_v43 = vmul.f32 2e-05, %v1511_v11 }
 0x2ea   :  { %6902 = vst [vmem:[#allocation125_spill] sm:$0xff] %v5163_v4  ;;  %v5175_v48 = vadd.f32 %v6910_v45, %v6909_v51  ;;  %v6916_v36 = vld [vmem:[#allocation74_spill] sm:$0xff]  ;;  %v5187_v0 = vadd.f32 %v6919_v13, %v6918_v7  ;;  %v1773_v45 = vand.u32 2147483648, %v5046_v5  ;;  %v1514_v51 = vadd.f32 %v1396_v38, %v4960_v12  ;;  %v1400_v7 = vpop.permute.xlu1 %1399  ;;  %v1398_v15 = vpop.permute.xlu0 %1397 }
 0x2eb   :  { %6908 = vst [vmem:[#allocation124_spill] sm:$0xff] %v5171_v34  ;;  %6914 = vst [vmem:[#allocation130_spill] sm:$0xff] %v5179_v46  ;;  %v5183_v4 = vadd.f32 %v6916_v36, %v6915_v52  ;;  %v6921_v25 = vld [vmem:[#allocation62_spill] sm:$0xff]  ;;  %v5196_v52 = vpop.eup %2739  ;;  %v1766_v36 = vand.u32 2147483648, %v5048_v14  ;;  %v5207_v12 = vadd.f32 2.0, %v1576_v54  ;;  %v5209_v38 = vadd.f32 2.0, %v1575_v43 }
 0x2ec   :  { %6911 = vst [vmem:[#allocation129_spill] sm:$0xff] %v5175_v48  ;;  %6920 = vst [vmem:[#allocation135_spill] sm:$0xff] %v5187_v0  ;;  %v1513_v18 = vadd.f32 %v1394_v16, %v6921_v25  ;;  %v5202_v13 = vpop.eup %2741  ;;  %v1769_v11 = vmul.f32 %v5196_v52, %v5046_v5  ;;  %v1787_v25 = vand.u32 2147483648, %v5109_v49  ;;  %v1578_v0 = vmul.f32 2e-05, %v1514_v51 }
 0x2ed   :  { %6917 = vst [vmem:[#allocation134_spill] sm:$0xff] %v5183_v4  ;;  %v1762_v16 = vmul.f32 %v5202_v13, %v5048_v14  ;;  %2751 = vrsqrt.f32 %v5207_v12  ;;  %v1516_v54 = vadd.f32 %v1400_v7, %v4971_v20  ;;  %v1515_v51 = vadd.f32 %v1398_v15, %v4975_v40  ;;  %v5231_v7 = vpop.eup %2743 }
 0x2ee   :  { %v1577_v4 = vmul.f32 2e-05, %v1513_v18  ;;  %v1771_v46 = vsel %vm1770_vm2, %v5046_v5, %v1769_v11  ;;  %2753 = vrsqrt.f32 %v5209_v38  ;;  %v1780_v11 = vand.u32 2147483648, %v5111_v31  ;;  %v1404_v20 = vpop.permute.xlu1 %1403 }
 0x2ef   :  { %v1774_v43 = vsel %vm1772_vm3, %v1773_v45, %v1771_v46  ;;  %v1764_v48 = vsel %vm1763_vm4, %v5048_v14, %v1762_v16  ;;  %v5234_v5 = vadd.f32 2.0, %v1578_v0  ;;  %v5238_v45 = vpop.eup %2745  ;;  %v1783_v40 = vmul.f32 %v5231_v7, %v5109_v49 }
 0x2f0   :  { %2755 = vrsqrt.f32 %v1774_v43  ;;  %v1767_v18 = vsel %vm1765_vm5, %v1766_v36, %v1764_v48  ;;  %v5236_v46 = vadd.f32 2.0, %v1577_v4  ;;  %v1801_v14 = vand.u32 2147483648, %v5155_v3  ;;  %v5254_v16 = vpop.eup %2747 }
 0x2f1   :  { %2757 = vrsqrt.f32 %v1767_v18  ;;  %v1580_v48 = vmul.f32 2e-05, %v1516_v54  ;;  %v1776_v36 = vmul.f32 %v5238_v45, %v5111_v31  ;;  %v1579_v15 = vmul.f32 2e-05, %v1515_v51  ;;  %v5263_v51 = vpop.eup %2749 }
 0x2f2   :  { %2759 = vrsqrt.f32 %v5234_v5  ;;  %v1518_v0 = vadd.f32 %v1404_v20, %v4979_v29  ;;  %v1785_v4 = vsel %vm1784_vm6, %v5109_v49, %v1783_v40  ;;  %v1794_v29 = vand.u32 2147483648, %v5157_v62 }
 0x2f3   :  { %2761 = vrsqrt.f32 %v5236_v46  ;;  %v1788_v54 = vsel %vm1786_vm7, %v1787_v25, %v1785_v4  ;;  %v1778_v43 = vsel %vm1777_vm8, %v5111_v31, %v1776_v36  ;;  %vm1812_vm14 = vcmp.eq.f32.partialorder %v5207_v12, inf }
 0x2f4   :  { %2763 = vrsqrt.f32 %v1788_v54  ;;  %v1781_v18 = vsel %vm1779_vm9, %v1780_v11, %v1778_v43  ;;  %v1797_v20 = vmul.f32 %v5254_v16, %v5155_v3  ;;  %v5269_v40 = vadd.f32 2.0, %v1580_v48  ;;  %v1402_v11 = vpop.permute.xlu0 %1401 }
 0x2f5   :  { %2765 = vrsqrt.f32 %v1781_v18  ;;  %v1790_v49 = vmul.f32 %v5263_v51, %v5157_v62  ;;  %v5273_v25 = vadd.f32 2.0, %v1579_v15  ;;  %v1582_v36 = vmul.f32 2e-05, %v1518_v0  ;;  %v1408_v0 = vpop.permute.xlu1 %1407 }
 0x2f6   :  { %v1799_v4 = vsel %vm1798_vm10, %v5155_v3, %v1797_v20  ;;  %vm1814_vm15 = vcmp.eq.f32.partialorder %v5207_v12, 0.0  ;;  %v1815_v31 = vand.u32 2147483648, %v5207_v12  ;;  %2767 = vrsqrt.f32 %v5269_v40 }
 0x2f7   :  { %v1802_v48 = vsel %vm1800_vm11, %v1801_v14, %v1799_v4  ;;  %v1792_v15 = vsel %vm1791_vm12, %v5157_v62, %v1790_v49  ;;  %vm1805_vm0 = vcmp.eq.f32.partialorder %v5209_v38, inf  ;;  %2769 = vrsqrt.f32 %v5273_v25 }
 0x2f8   :  { %2771 = vrsqrt.f32 %v1802_v48  ;;  %v1795_v54 = vsel %vm1793_vm13, %v1794_v29, %v1792_v15  ;;  %vm1807_vm1 = vcmp.eq.f32.partialorder %v5209_v38, 0.0  ;;  %v1808_v43 = vand.u32 2147483648, %v5209_v38 }
 0x2f9   :  { %2773 = vrsqrt.f32 %v1795_v54  ;;  %vm1826_vm2 = vcmp.eq.f32.partialorder %v5234_v5, inf  ;;  %v5295_v3 = vadd.f32 2.0, %v1582_v36  ;;  %v1517_v14 = vadd.f32 %v1402_v11, %v4983_v30 }
 0x2fa   :  { %v5292_v18 = vpop.eup %2751  ;;  %vm1828_vm3 = vcmp.eq.f32.partialorder %v5234_v5, 0.0  ;;  %v1829_v62 = vand.u32 2147483648, %v5234_v5  ;;  %v1520_v29 = vadd.f32 %v1408_v0, %v4987_v57  ;;  %vm1819_vm4 = vcmp.eq.f32.partialorder %v5236_v46, inf  ;;  %v1406_v0 = vpop.permute.xlu0 %1405 }
 0x2fb   :  { %v5298_v20 = vpop.eup %2753  ;;  %v1811_v49 = vmul.f32 %v5292_v18, %v5207_v12  ;;  %vm1821_vm5 = vcmp.eq.f32.partialorder %v5236_v46, 0.0  ;;  %2775 = vrsqrt.f32 %v5295_v3  ;;  %v1822_v15 = vand.u32 2147483648, %v5236_v46 }
 0x2fc   :  { %v1804_v48 = vmul.f32 %v5298_v20, %v5209_v38  ;;  %v1581_v57 = vmul.f32 2e-05, %v1517_v14  ;;  %vm1840_vm6 = vcmp.eq.f32.partialorder %v5269_v40, inf  ;;  %vm1842_vm7 = vcmp.eq.f32.partialorder %v5269_v40, 0.0 }
 0x2fd   :  { %v2756_v4 = vpop.eup %2755  ;;  %v1813_v11 = vsel %vm1812_vm14, %v5207_v12, %v1811_v49  ;;  %v6922_v49 = vld [vmem:[#allocation5_spill] sm:$0xff]  ;;  %vm1833_vm8 = vcmp.eq.f32.partialorder %v5273_v25, inf  ;;  %vm1835_vm9 = vcmp.eq.f32.partialorder %v5273_v25, 0.0  ;;  %vm1854_vm10 = vcmp.eq.f32.partialorder %v5295_v3, inf }
 0x2fe   :  { %v2758_v30 = vpop.eup %2757  ;;  %v2274_v36 = vmul.f32 %v2756_v4, %v5196_v52  ;;  %v1816_v34 = vsel %vm1814_vm15, %v1815_v31, %v1813_v11  ;;  %v1806_v58 = vsel %vm1805_vm0, %v5209_v38, %v1804_v48  ;;  %v1584_v52 = vmul.f32 2e-05, %v1520_v29  ;;  %v1412_v4 = vpop.permute.xlu1 %1411  ;;  %v6923_v31 = vld [vmem:[#allocation7_spill] sm:$0xff] }
 0x2ff   :  { %v2273_v54 = vmul.f32 %v2758_v30, %v5202_v13  ;;  %v5322_v56 = vpop.eup %2759  ;;  %2777 = vrsqrt.f32 %v1816_v34  ;;  %v1809_v14 = vsel %vm1807_vm1, %v1808_v43, %v1806_v58  ;;  %v5327_v13 = vadd.f32 2.0, %v1581_v57 }
 0x300   :  { %v2338_v22 = vmul.f32 %v2274_v36, %v6922_v49  ;;  %v5329_v12 = vpop.eup %2761  ;;  %2779 = vrsqrt.f32 %v1809_v14  ;;  %v1825_v48 = vmul.f32 %v5322_v56, %v5234_v5  ;;  %v5334_v29 = vadd.f32 2.0, %v1584_v52 }
 0x301   :  { %v2337_v30 = vmul.f32 %v2273_v54, %v6923_v31  ;;  %v1818_v36 = vmul.f32 %v5329_v12, %v5236_v46  ;;  %2781 = vrsqrt.f32 %v5327_v13  ;;  %v1519_v58 = vadd.f32 %v1406_v0, %v4991_v10  ;;  %v2764_v34 = vpop.eup %2763  ;;  %v1410_v0 = vpop.permute.xlu0 %1409 }
 0x302   :  { %2402 = vst [vmem:[#allocation2 + $0x8] sm:$0xff] %v2338_v22  ;;  %v1827_v38 = vsel %vm1826_vm2, %v5234_v5, %v1825_v48  ;;  %v1843_v43 = vand.u32 2147483648, %v5269_v40  ;;  %2783 = vrsqrt.f32 %v5334_v29  ;;  %v1522_v22 = vadd.f32 %v1412_v4, %v4995_v26  ;;  %v2766_v11 = vpop.eup %2765  ;;  %v6925_v48 = vld [vmem:[#allocation13_spill] sm:$0xff] }
 0x303   :  { %2401 = vst [vmem:[#allocation2] sm:$0xff] %v2337_v30  ;;  %v2276_v57 = vmul.f32 %v2764_v34, %v5231_v7  ;;  %v1830_v54 = vsel %vm1828_vm3, %v1829_v62, %v1827_v38  ;;  %v1820_v10 = vsel %vm1819_vm4, %v5236_v46, %v1818_v36  ;;  %v5354_v52 = vpop.eup %2767  ;;  %v2275_v49 = vmul.f32 %v2766_v11, %v5238_v45  ;;  %v1416_v7 = vpop.permute.xlu1 %1415  ;;  %v6924_v62 = vld [vmem:[#allocation9_spill] sm:$0xff] }
 0x304   :  { %2785 = vrsqrt.f32 %v1830_v54  ;;  %v1823_v26 = vsel %vm1821_vm5, %v1822_v15, %v1820_v10  ;;  %v5360_v5 = vpop.eup %2769  ;;  %v1839_v14 = vmul.f32 %v5354_v52, %v5269_v40  ;;  %v1583_v31 = vmul.f32 2e-05, %v1519_v58 }
 0x305   :  { %v2340_v4 = vmul.f32 %v2276_v57, %v6924_v62  ;;  %2787 = vrsqrt.f32 %v1823_v26  ;;  %v2772_v30 = vpop.eup %2771  ;;  %v2339_v36 = vmul.f32 %v2275_v49, %v6925_v48  ;;  %v1832_v45 = vmul.f32 %v5360_v5, %v5273_v25  ;;  %v6926_v26 = vld [vmem:[#allocation15_spill] sm:$0xff] }
 0x306   :  { %v1836_v46 = vand.u32 2147483648, %v5273_v25  ;;  %v1586_v15 = vmul.f32 2e-05, %v1522_v22  ;;  %v2774_v34 = vpop.eup %2773  ;;  %v2278_v38 = vmul.f32 %v2772_v30, %v5254_v16  ;;  %v1841_v11 = vsel %vm1840_vm6, %v5269_v40, %v1839_v14 }
 0x307   :  { %2404 = vst [vmem:[#allocation2 + $0x18] sm:$0xff] %v2340_v4  ;;  %v5373_v57 = vadd.f32 2.0, %v1583_v31  ;;  %v1521_v58 = vadd.f32 %v1410_v0, %v4999_v47  ;;  %2403 = vst [vmem:[#allocation2 + $0x10] sm:$0xff] %v2339_v36  ;;  %v2277_v54 = vmul.f32 %v2774_v34, %v5263_v51  ;;  %v1844_v10 = vsel %vm1842_vm7, %v1843_v43, %v1841_v11  ;;  %v1414_v51 = vpop.permute.xlu0 %1413  ;;  %v6927_v4 = vld [vmem:[#allocation16_spill] sm:$0xff]  ;;  %v1420_v14 = vpop.permute.xlu1 %1419 }
 0x308   :  { %v1834_v22 = vsel %vm1833_vm8, %v5273_v25, %v1832_v45  ;;  %v5382_v49 = vadd.f32 2.0, %v1586_v15  ;;  %v5384_v16 = vpop.eup %2775  ;;  %v2342_v62 = vmul.f32 %v2278_v38, %v6926_v26  ;;  %2789 = vrsqrt.f32 %v1844_v10 }
 0x309   :  { %v1837_v47 = vsel %vm1835_vm9, %v1836_v46, %v1834_v22  ;;  %v1524_v0 = vadd.f32 %v1416_v7, %v5003_v59  ;;  %v2341_v40 = vmul.f32 %v2277_v54, %v6927_v4  ;;  %v1853_v43 = vmul.f32 %v5384_v16, %v5295_v3  ;;  %v6928_v54 = vld [vmem:[#allocation21_spill] sm:$0xff]  ;;  %v6929_v22 = vld [vmem:[#allocation22_spill] sm:$0xff] }
 0x30a   :  { %2791 = vrsqrt.f32 %v1837_v47  ;;  %2406 = vst [vmem:[#allocation2 + $0x28] sm:$0xff] %v2342_v62  ;;  %vm1856_vm11 = vcmp.eq.f32.partialorder %v5295_v3, 0.0  ;;  %v1857_v31 = vand.u32 2147483648, %v5295_v3  ;;  %vm1847_vm12 = vcmp.eq.f32.partialorder %v5327_v13, inf }
 0x30b   :  { %2793 = vrsqrt.f32 %v5373_v57  ;;  %2405 = vst [vmem:[#allocation2 + $0x20] sm:$0xff] %v2341_v40  ;;  %v1855_v25 = vsel %vm1854_vm10, %v5295_v3, %v1853_v43  ;;  %vm1849_vm13 = vcmp.eq.f32.partialorder %v5327_v13, 0.0  ;;  %v1585_v7 = vmul.f32 2e-05, %v1521_v58  ;;  %v1424_v47 = vpop.permute.xlu1 %1423 }
 0x30c   :  { %v2778_v59 = vpop.eup %2777  ;;  %2795 = vrsqrt.f32 %v5382_v49  ;;  %v1858_v36 = vsel %vm1856_vm11, %v1857_v31, %v1855_v25  ;;  %v1588_v45 = vmul.f32 2e-05, %v1524_v0  ;;  %v1523_v46 = vadd.f32 %v1414_v51, %v5007_v32  ;;  %v1418_v32 = vpop.permute.xlu0 %1417 }
 0x30d   :  { %v2780_v30 = vpop.eup %2779  ;;  %v2280_v48 = vmul.f32 %v2778_v59, %v5292_v18  ;;  %2797 = vrsqrt.f32 %v1858_v36  ;;  %v1850_v38 = vand.u32 2147483648, %v5327_v13  ;;  %v5407_v3 = vadd.f32 2.0, %v1585_v7  ;;  %v6930_v7 = vld [vmem:[#allocation93_spill] sm:$0xff] }
 0x30e   :  { %v5403_v15 = vpop.eup %2781  ;;  %v2279_v34 = vmul.f32 %v2780_v30, %v5298_v20  ;;  %vm1868_vm14 = vcmp.eq.f32.partialorder %v5334_v29, inf  ;;  %v5415_v10 = vadd.f32 2.0, %v1588_v45  ;;  %v1587_v62 = vmul.f32 2e-05, %v1523_v46  ;;  %v6931_v30 = vld [vmem:[#allocation88_spill] sm:$0xff]  ;;  %v6933_v45 = vld [vmem:[#allocation89_spill] sm:$0xff] }
 0x30f   :  { %v5409_v11 = vpop.eup %2783  ;;  %v2344_v58 = vmul.f32 %v2280_v48, %v6928_v54  ;;  %v1846_v18 = vmul.f32 %v5403_v15, %v5327_v13  ;;  %2799 = vrsqrt.f32 %v5407_v3  ;;  %v1871_v4 = vand.u32 2147483648, %v5334_v29 }
 0x310   :  { %v2343_v26 = vmul.f32 %v2279_v34, %v6929_v22  ;;  %v1867_v20 = vmul.f32 %v5409_v11, %v5334_v29  ;;  %2801 = vrsqrt.f32 %v5415_v10  ;;  %v1526_v40 = vadd.f32 %v1420_v14, %v5013_v33  ;;  %v6932_v14 = vld [vmem:[#allocation94_spill] sm:$0xff]  ;;  %v1422_v22 = vpop.permute.xlu0 %1421 }
 0x311   :  { %v2786_v0 = vpop.eup %2785  ;;  %2408 = vst [vmem:[#allocation2 + $0x38] sm:$0xff] %v2344_v58  ;;  %v1848_v51 = vsel %vm1847_vm12, %v5327_v13, %v1846_v18  ;;  %vm1870_vm15 = vcmp.eq.f32.partialorder %v5334_v29, 0.0  ;;  %v5436_v48 = vadd.f32 %v6931_v30, %v6930_v7  ;;  %v6934_v13 = vld [vmem:[#allocation27_spill] sm:$0xff]  ;;  %v5444_v34 = vadd.f32 2.0, %v1587_v62 }
 0x312   :  { %v2788_v43 = vpop.eup %2787  ;;  %2407 = vst [vmem:[#allocation2 + $0x30] sm:$0xff] %v2343_v26  ;;  %v2282_v31 = vmul.f32 %v2786_v0, %v5322_v56  ;;  %v1851_v59 = vsel %vm1849_vm13, %v1850_v38, %v1848_v51  ;;  %v1869_v25 = vsel %vm1868_vm14, %v5334_v29, %v1867_v20  ;;  %v5441_v56 = vadd.f32 %v6933_v45, %v6932_v14  ;;  %v6935_v38 = vld [vmem:[#allocation28_spill] sm:$0xff]  ;;  %v1428_v20 = vpop.permute.xlu1 %1427 }
 0x313   :  { %v2281_v36 = vmul.f32 %v2788_v43, %v5329_v12  ;;  %2803 = vrsqrt.f32 %v1851_v59  ;;  %v1872_v33 = vsel %vm1870_vm15, %v1871_v4, %v1869_v25  ;;  %v1590_v29 = vmul.f32 2e-05, %v1526_v40  ;;  %v6936_v43 = vld [vmem:[#allocation32_spill] sm:$0xff]  ;;  %v6937_v25 = vld [vmem:[#allocation34_spill] sm:$0xff] }
 0x314   :  { %v2346_v46 = vmul.f32 %v2282_v31, %v6934_v13  ;;  %2805 = vrsqrt.f32 %v1872_v33  ;;  %v1525_v58 = vadd.f32 %v1418_v32, %v5017_v8  ;;  %v1528_v18 = vadd.f32 %v1424_v47, %v5021_v21  ;;  %v1426_v14 = vpop.permute.xlu0 %1425 }
 0x315   :  { %v2345_v54 = vmul.f32 %v2281_v36, %v6935_v38  ;;  %v2790_v12 = vpop.eup %2789  ;;  %vm1861_vm0 = vcmp.eq.f32.partialorder %v5373_v57, inf  ;;  %vm1863_vm1 = vcmp.eq.f32.partialorder %v5373_v57, 0.0  ;;  %v1864_v26 = vand.u32 2147483648, %v5373_v57 }
 0x316   :  { %2410 = vst [vmem:[#allocation2 + $0x48] sm:$0xff] %v2346_v46  ;;  %2807 = vrsqrt.f32 %v5444_v34  ;;  %v2284_v0 = vmul.f32 %v2790_v12, %v5354_v52  ;;  %v5454_v51 = vadd.f32 2.0, %v1590_v29  ;;  %v1589_v8 = vmul.f32 2e-05, %v1525_v58 }
 0x317   :  { %v2792_v62 = vpop.eup %2791  ;;  %2409 = vst [vmem:[#allocation2 + $0x40] sm:$0xff] %v2345_v54  ;;  %v1592_v21 = vmul.f32 2e-05, %v1528_v18  ;;  %vm1882_vm2 = vcmp.eq.f32.partialorder %v5382_v49, inf  ;;  %vm1884_vm3 = vcmp.eq.f32.partialorder %v5382_v49, 0.0  ;;  %v1527_v4 = vadd.f32 %v1422_v22, %v5029_v39  ;;  %v1432_v22 = vpop.permute.xlu1 %1431 }
 0x318   :  { %v5456_v32 = vpop.eup %2793  ;;  %v2283_v47 = vmul.f32 %v2792_v62, %v5360_v5  ;;  %v2348_v31 = vmul.f32 %v2284_v0, %v6936_v43  ;;  %2809 = vrsqrt.f32 %v5454_v51  ;;  %v1530_v59 = vadd.f32 %v1428_v20, %v5032_v35 }
 0x319   :  { %v5462_v40 = vpop.eup %2795  ;;  %v1860_v52 = vmul.f32 %v5456_v32, %v5373_v57  ;;  %v1885_v30 = vand.u32 2147483648, %v5382_v49  ;;  %vm1875_vm4 = vcmp.eq.f32.partialorder %v5407_v3, inf  ;;  %vm1877_vm5 = vcmp.eq.f32.partialorder %v5407_v3, 0.0 }
 0x31a   :  { %v2347_v7 = vmul.f32 %v2283_v47, %v6937_v25  ;;  %v1881_v5 = vmul.f32 %v5462_v40, %v5382_v49  ;;  %v2798_v39 = vpop.eup %2797  ;;  %2412 = vst [vmem:[#allocation2 + $0x58] sm:$0xff] %v2348_v31  ;;  %v5478_v33 = vadd.f32 2.0, %v1589_v8  ;;  %v5480_v35 = vadd.f32 2.0, %v1592_v21 }
 0x31b   :  { %v1862_v36 = vsel %vm1861_vm0, %v5373_v57, %v1860_v52  ;;  %v2286_v45 = vmul.f32 %v2798_v39, %v5384_v16  ;;  %v1591_v38 = vmul.f32 2e-05, %v1527_v4  ;;  %v1878_v58 = vand.u32 2147483648, %v5407_v3  ;;  %v6938_v16 = vld [vmem:[#allocation36_spill] sm:$0xff] }
 0x31c   :  { %2411 = vst [vmem:[#allocation2 + $0x50] sm:$0xff] %v2347_v7  ;;  %v1865_v13 = vsel %vm1863_vm1, %v1864_v26, %v1862_v36  ;;  %v1883_v46 = vsel %vm1882_vm2, %v5382_v49, %v1881_v5  ;;  %v5488_v54 = vpop.eup %2799  ;;  %v1594_v18 = vmul.f32 2e-05, %v1530_v59  ;;  %vm1896_vm6 = vcmp.eq.f32.partialorder %v5415_v10, inf  ;;  %v1430_v59 = vpop.permute.xlu0 %1429  ;;  %v6939_v5 = vld [vmem:[#allocation38_spill] sm:$0xff]  ;;  %v6940_v39 = vld [vmem:[#allocation44_spill] sm:$0xff] }
 0x31d   :  { %2811 = vrsqrt.f32 %v1865_v13  ;;  %v1886_v29 = vsel %vm1884_vm3, %v1885_v30, %v1883_v46  ;;  %v5493_v12 = vpop.eup %2801  ;;  %v2350_v57 = vmul.f32 %v2286_v45, %v6938_v16  ;;  %v1874_v26 = vmul.f32 %v5488_v54, %v5407_v3  ;;  %v1436_v30 = vpop.permute.xlu1 %1435 }
 0x31e   :  { %2813 = vrsqrt.f32 %v1886_v29  ;;  %v1895_v20 = vmul.f32 %v5493_v12, %v5415_v10  ;;  %vm1898_vm7 = vcmp.eq.f32.partialorder %v5415_v10, 0.0  ;;  %v1899_v49 = vand.u32 2147483648, %v5415_v10 }
 0x31f   :  { %2815 = vrsqrt.f32 %v5478_v33  ;;  %2414 = vst [vmem:[#allocation2 + $0x68] sm:$0xff] %v2350_v57  ;;  %v1876_v0 = vsel %vm1875_vm4, %v5407_v3, %v1874_v26  ;;  %v5508_v8 = vadd.f32 2.0, %v1591_v38  ;;  %v1529_v21 = vadd.f32 %v1426_v14, %v5035_v24 }
 0x320   :  { %v2804_v62 = vpop.eup %2803  ;;  %2817 = vrsqrt.f32 %v5480_v35  ;;  %v1879_v43 = vsel %vm1877_vm5, %v1878_v58, %v1876_v0  ;;  %v1897_v31 = vsel %vm1896_vm6, %v5415_v10, %v1895_v20  ;;  %v5515_v52 = vadd.f32 2.0, %v1594_v18  ;;  %v1434_v26 = vpop.permute.xlu0 %1433 }
 0x321   :  { %v2806_v47 = vpop.eup %2805  ;;  %v2285_v4 = vmul.f32 %v2804_v62, %v5403_v15  ;;  %2819 = vrsqrt.f32 %v1879_v43  ;;  %v1900_v7 = vsel %vm1898_vm7, %v1899_v49, %v1897_v31  ;;  %vm1889_vm8 = vcmp.eq.f32.partialorder %v5444_v34, inf  ;;  %v1440_v31 = vpop.permute.xlu1 %1439 }
 0x322   :  { %v2288_v25 = vmul.f32 %v2806_v47, %v5409_v11  ;;  %2821 = vrsqrt.f32 %v1900_v7  ;;  %vm1891_vm9 = vcmp.eq.f32.partialorder %v5444_v34, 0.0  ;;  %v1892_v3 = vand.u32 2147483648, %v5444_v34 }
 0x323   :  { %v5521_v24 = vpop.eup %2807  ;;  %v2349_v15 = vmul.f32 %v2285_v4, %v6939_v5  ;;  %vm1910_vm10 = vcmp.eq.f32.partialorder %v5454_v51, inf  ;;  %2823 = vrsqrt.f32 %v5508_v8  ;;  %vm1912_vm11 = vcmp.eq.f32.partialorder %v5454_v51, 0.0 }
 0x324   :  { %v2352_v36 = vmul.f32 %v2288_v25, %v6940_v39  ;;  %v1888_v11 = vmul.f32 %v5521_v24, %v5444_v34  ;;  %v1913_v10 = vand.u32 2147483648, %v5454_v51  ;;  %2825 = vrsqrt.f32 %v5515_v52  ;;  %v6941_v25 = vld [vmem:[#allocation48_spill] sm:$0xff] }
 0x325   :  { %2413 = vst [vmem:[#allocation2 + $0x60] sm:$0xff] %v2349_v15  ;;  %v1593_v14 = vmul.f32 2e-05, %v1529_v21  ;;  %v5534_v45 = vpop.eup %2809  ;;  %vm1903_vm12 = vcmp.eq.f32.partialorder %v5478_v33, inf  ;;  %v1532_v46 = vadd.f32 %v1432_v22, %v5038_v44  ;;  %v1531_v38 = vadd.f32 %v1430_v59, %v5041_v63  ;;  %v6942_v15 = vld [vmem:[#allocation56_spill] sm:$0xff] }
 0x326   :  { %2416 = vst [vmem:[#allocation2 + $0x78] sm:$0xff] %v2352_v36  ;;  %v1890_v13 = vsel %vm1889_vm8, %v5444_v34, %v1888_v11  ;;  %v1534_v29 = vadd.f32 %v1436_v30, %v5044_v2  ;;  %v1909_v18 = vmul.f32 %v5534_v45, %v5454_v51  ;;  %vm1905_vm13 = vcmp.eq.f32.partialorder %v5478_v33, 0.0 }
 0x327   :  { %v1893_v58 = vsel %vm1891_vm9, %v1892_v3, %v1890_v13  ;;  %v1906_v16 = vand.u32 2147483648, %v5478_v33  ;;  %v5549_v57 = vadd.f32 2.0, %v1593_v14  ;;  %v1596_v20 = vmul.f32 2e-05, %v1532_v46 }
 0x328   :  { %2827 = vrsqrt.f32 %v1893_v58  ;;  %v1595_v44 = vmul.f32 2e-05, %v1531_v38  ;;  %v1598_v22 = vmul.f32 2e-05, %v1534_v29  ;;  %v1911_v63 = vsel %vm1910_vm10, %v5454_v51, %v1909_v18  ;;  %v1438_v38 = vpop.permute.xlu0 %1437 }
 0x329   :  { %vm1924_vm14 = vcmp.eq.f32.partialorder %v5480_v35, inf  ;;  %vm1926_vm15 = vcmp.eq.f32.partialorder %v5480_v35, 0.0  ;;  %2829 = vrsqrt.f32 %v5549_v57  ;;  %v1914_v34 = vsel %vm1912_vm11, %v1913_v10, %v1911_v63 }
 0x32a   :  { %v2812_v2 = vpop.eup %2811  ;;  %v5559_v49 = vadd.f32 2.0, %v1596_v20  ;;  %v5561_v62 = vadd.f32 2.0, %v1595_v44  ;;  %v1533_v0 = vadd.f32 %v1434_v26, %v5053_v42  ;;  %2831 = vrsqrt.f32 %v1914_v34  ;;  %v6943_v26 = vld [vmem:[#allocation60_spill] sm:$0xff] }
 0x32b   :  { %v2814_v21 = vpop.eup %2813  ;;  %v2287_v47 = vmul.f32 %v2812_v2, %v5456_v32  ;;  %v1927_v4 = vand.u32 2147483648, %v5480_v35  ;;  %v5566_v43 = vadd.f32 2.0, %v1598_v22  ;;  %vm1917_vm0 = vcmp.eq.f32.partialorder %v5508_v8, inf }
 0x32c   :  { %v5568_v59 = vpop.eup %2815  ;;  %v2290_v51 = vmul.f32 %v2814_v21, %v5462_v40  ;;  %vm1919_vm1 = vcmp.eq.f32.partialorder %v5508_v8, 0.0  ;;  %2833 = vrsqrt.f32 %v5559_v49  ;;  %v1920_v5 = vand.u32 2147483648, %v5508_v8 }
 0x32d   :  { %v5574_v42 = vpop.eup %2817  ;;  %v2351_v32 = vmul.f32 %v2287_v47, %v6941_v25  ;;  %v1902_v7 = vmul.f32 %v5568_v59, %v5478_v33  ;;  %2835 = vrsqrt.f32 %v5561_v62  ;;  %vm1938_vm2 = vcmp.eq.f32.partialorder %v5515_v52, inf }
 0x32e   :  { %v2354_v3 = vmul.f32 %v2290_v51, %v6942_v15  ;;  %v1923_v40 = vmul.f32 %v5574_v42, %v5480_v35  ;;  %v1597_v30 = vmul.f32 2e-05, %v1533_v0  ;;  %v2820_v39 = vpop.eup %2819  ;;  %vm1940_vm3 = vcmp.eq.f32.partialorder %v5515_v52, 0.0 }
 0x32f   :  { %2415 = vst [vmem:[#allocation2 + $0x70] sm:$0xff] %v2351_v32  ;;  %v1904_v36 = vsel %vm1903_vm12, %v5478_v33, %v1902_v7  ;;  %v1941_v11 = vand.u32 2147483648, %v5515_v52  ;;  %2837 = vrsqrt.f32 %v5566_v43  ;;  %v2822_v10 = vpop.eup %2821  ;;  %v2289_v14 = vmul.f32 %v2820_v39, %v5488_v54  ;;  %v1444_v54 = vpop.permute.xlu1 %1443 }
 0x330   :  { %2418 = vst [vmem:[#allocation2 + $0x88] sm:$0xff] %v2354_v3  ;;  %v1907_v13 = vsel %vm1905_vm13, %v1906_v16, %v1904_v36  ;;  %v1925_v46 = vsel %vm1924_vm14, %v5480_v35, %v1923_v40  ;;  %vm1931_vm4 = vcmp.eq.f32.partialorder %v5549_v57, inf  ;;  %v5598_v29 = vpop.eup %2823  ;;  %v2292_v58 = vmul.f32 %v2822_v10, %v5493_v12  ;;  %v6944_v12 = vld [vmem:[#allocation68_spill] sm:$0xff]  ;;  %v1442_v7 = vpop.permute.xlu0 %1441 }
 0x331   :  { %2839 = vrsqrt.f32 %v1907_v13  ;;  %v1928_v18 = vsel %vm1926_vm15, %v1927_v4, %v1925_v46  ;;  %vm1933_vm5 = vcmp.eq.f32.partialorder %v5549_v57, 0.0  ;;  %v1934_v33 = vand.u32 2147483648, %v5549_v57  ;;  %v5605_v16 = vpop.eup %2825  ;;  %v6945_v40 = vld [vmem:[#allocation72_spill] sm:$0xff] }
 0x332   :  { %v2353_v20 = vmul.f32 %v2289_v14, %v6943_v26  ;;  %2841 = vrsqrt.f32 %v1928_v18  ;;  %v1916_v44 = vmul.f32 %v5598_v29, %v5508_v8  ;;  %v5610_v22 = vadd.f32 2.0, %v1597_v30 }
 0x333   :  { %v2356_v63 = vmul.f32 %v2292_v58, %v6944_v12  ;;  %v1937_v35 = vmul.f32 %v5605_v16, %v5515_v52  ;;  %v1536_v2 = vadd.f32 %v1440_v31, %v5056_v9  ;;  %v1535_v34 = vadd.f32 %v1438_v38, %v5059_v1  ;;  %v1448_v15 = vpop.permute.xlu1 %1447  ;;  %v6946_v58 = vld [vmem:[#allocation80_spill] sm:$0xff] }
 0x334   :  { %2417 = vst [vmem:[#allocation2 + $0x80] sm:$0xff] %v2353_v20  ;;  %v1918_v0 = vsel %vm1917_vm0, %v5508_v8, %v1916_v44  ;;  %vm1952_vm6 = vcmp.eq.f32.partialorder %v5559_v49, inf  ;;  %vm1954_vm7 = vcmp.eq.f32.partialorder %v5559_v49, 0.0  ;;  %2843 = vrsqrt.f32 %v5610_v22 }
 0x335   :  { %v2828_v21 = vpop.eup %2827  ;;  %2420 = vst [vmem:[#allocation2 + $0x98] sm:$0xff] %v2356_v63  ;;  %v1921_v47 = vsel %vm1919_vm1, %v1920_v5, %v1918_v0  ;;  %v1939_v9 = vsel %vm1938_vm2, %v5515_v52, %v1937_v35  ;;  %v1955_v1 = vand.u32 2147483648, %v5559_v49  ;;  %v1600_v4 = vmul.f32 2e-05, %v1536_v2 }
 0x336   :  { %v5629_v31 = vpop.eup %2829  ;;  %v2291_v51 = vmul.f32 %v2828_v21, %v5521_v24  ;;  %2845 = vrsqrt.f32 %v1921_v47  ;;  %v1942_v25 = vsel %vm1940_vm3, %v1941_v11, %v1939_v9  ;;  %v1599_v32 = vmul.f32 2e-05, %v1535_v34 }
 0x337   :  { %2847 = vrsqrt.f32 %v1942_v25  ;;  %v1930_v8 = vmul.f32 %v5629_v31, %v5549_v57  ;;  %vm1945_vm8 = vcmp.eq.f32.partialorder %v5561_v62, inf  ;;  %v5637_v5 = vadd.f32 2.0, %v1600_v4  ;;  %v2832_v3 = vpop.eup %2831  ;;  %v1452_v34 = vpop.permute.xlu1 %1451  ;;  %v6947_v25 = vld [vmem:[#allocation97_spill] sm:$0xff] }
 0x338   :  { %v2355_v30 = vmul.f32 %v2291_v51, %v6945_v40  ;;  %vm1947_vm9 = vcmp.eq.f32.partialorder %v5561_v62, 0.0  ;;  %v1948_v24 = vand.u32 2147483648, %v5561_v62  ;;  %v5642_v52 = vadd.f32 2.0, %v1599_v32  ;;  %v6952_v40 = vld [vmem:[#allocation92_spill] sm:$0xff] }
 0x339   :  { %v5644_v39 = vpop.eup %2833  ;;  %v2294_v36 = vmul.f32 %v2832_v3, %v5534_v45  ;;  %v1932_v11 = vsel %vm1931_vm4, %v5549_v57, %v1930_v8  ;;  %2849 = vrsqrt.f32 %v5637_v5  ;;  %v1538_v10 = vadd.f32 %v1444_v54, %v5067_v19 }
 0x33a   :  { %v5652_v14 = vpop.eup %2835  ;;  %2419 = vst [vmem:[#allocation2 + $0x90] sm:$0xff] %v2355_v30  ;;  %v1935_v13 = vsel %vm1933_vm5, %v1934_v33, %v1932_v11  ;;  %v1951_v46 = vmul.f32 %v5644_v39, %v5559_v49  ;;  %v1537_v38 = vadd.f32 %v1442_v7, %v5071_v37  ;;  %v1540_v45 = vadd.f32 %v1448_v15, %v5075_v28  ;;  %v1446_v28 = vpop.permute.xlu0 %1445  ;;  %v6949_v7 = vld [vmem:[#allocation82_spill] sm:$0xff]  ;;  %v6950_v15 = vld [vmem:[#allocation84_spill] sm:$0xff] }
 0x33b   :  { %v2358_v18 = vmul.f32 %v2294_v36, %v6946_v58  ;;  %2851 = vrsqrt.f32 %v1935_v13  ;;  %v1944_v26 = vmul.f32 %v5652_v14, %v5561_v62  ;;  %vm1966_vm10 = vcmp.eq.f32.partialorder %v5566_v43, inf }
 0x33c   :  { %v5664_v19 = vpop.eup %2837  ;;  %v1953_v57 = vsel %vm1952_vm6, %v5559_v49, %v1951_v46  ;;  %vm1968_vm11 = vcmp.eq.f32.partialorder %v5566_v43, 0.0  ;;  %v1969_v37 = vand.u32 2147483648, %v5566_v43  ;;  %2853 = vrsqrt.f32 %v5642_v52  ;;  %v1456_v46 = vpop.permute.xlu1 %1455 }
 0x33d   :  { %2422 = vst [vmem:[#allocation2 + $0xa8] sm:$0xff] %v2358_v18  ;;  %v1956_v33 = vsel %vm1954_vm7, %v1955_v1, %v1953_v57  ;;  %v1946_v54 = vsel %vm1945_vm8, %v5561_v62, %v1944_v26  ;;  %v1965_v20 = vmul.f32 %v5664_v19, %v5566_v43  ;;  %v1602_v44 = vmul.f32 2e-05, %v1538_v10  ;;  %v6953_v26 = vld [vmem:[#allocation96_spill] sm:$0xff] }
 0x33e   :  { %v2840_v12 = vpop.eup %2839  ;;  %2855 = vrsqrt.f32 %v1956_v33  ;;  %v1949_v63 = vsel %vm1947_vm9, %v1948_v24, %v1946_v54  ;;  %v1601_v35 = vmul.f32 2e-05, %v1537_v38  ;;  %v1604_v2 = vmul.f32 2e-05, %v1540_v45  ;;  %v1450_v36 = vpop.permute.xlu0 %1449 }
 0x33f   :  { %v2842_v0 = vpop.eup %2841  ;;  %v2293_v49 = vmul.f32 %v2840_v12, %v5568_v59  ;;  %2857 = vrsqrt.f32 %v1949_v63  ;;  %v1967_v21 = vsel %vm1966_vm10, %v5566_v43, %v1965_v20  ;;  %v5685_v47 = vadd.f32 2.0, %v1602_v44  ;;  %v6948_v59 = vld [vmem:[#allocation81_spill] sm:$0xff]  ;;  %v6951_v43 = vld [vmem:[#allocation98_spill] sm:$0xff] }
 0x340   :  { %v2296_v9 = vmul.f32 %v2842_v0, %v5574_v42  ;;  %v1970_v1 = vsel %vm1968_vm11, %v1969_v37, %v1967_v21  ;;  %v5690_v62 = vadd.f32 2.0, %v1601_v35  ;;  %v5692_v4 = vadd.f32 2.0, %v1604_v2  ;;  %v6954_v37 = vld [vmem:[#allocation107_spill] sm:$0xff] }
 0x341   :  { %v5694_v51 = vpop.eup %2843  ;;  %v5698_v32 = vadd.f32 %v6948_v59, %v6947_v25  ;;  %v5702_v8 = vadd.f32 %v6949_v7, %v4951_v55  ;;  %v2357_v3 = vmul.f32 %v2293_v49, %v6950_v15  ;;  %2859 = vrsqrt.f32 %v1970_v1  ;;  %v1460_v15 = vpop.permute.xlu1 %1459 }
 0x342   :  { %v5707_v42 = vadd.f32 %v6951_v43, %v4955_v50  ;;  %v2360_v30 = vmul.f32 %v2296_v9, %v6952_v40  ;;  %v1958_v24 = vmul.f32 %v5694_v51, %v5610_v22  ;;  %2861 = vrsqrt.f32 %v5685_v47  ;;  %v6955_v9 = vld [vmem:[#allocation112_spill] sm:$0xff] }
 0x343   :  { %v2846_v11 = vpop.eup %2845  ;;  %2421 = vst [vmem:[#allocation2 + $0xa0] sm:$0xff] %v2357_v3  ;;  %vm1959_vm12 = vcmp.eq.f32.partialorder %v5610_v22, inf  ;;  %vm1961_vm13 = vcmp.eq.f32.partialorder %v5610_v22, 0.0  ;;  %v1962_v55 = vand.u32 2147483648, %v5610_v22  ;;  %2863 = vrsqrt.f32 %v5690_v62 }
 0x344   :  { %v2848_v50 = vpop.eup %2847  ;;  %2424 = vst [vmem:[#allocation2 + $0xb8] sm:$0xff] %v2360_v30  ;;  %v2295_v10 = vmul.f32 %v2846_v11, %v5598_v29  ;;  %v1960_v13 = vsel %vm1959_vm12, %v5610_v22, %v1958_v24  ;;  %vm1980_vm14 = vcmp.eq.f32.partialorder %v5637_v5, inf  ;;  %2865 = vrsqrt.f32 %v5692_v4  ;;  %v6956_v30 = vld [vmem:[#allocation123_spill] sm:$0xff] }
 0x345   :  { %v2298_v38 = vmul.f32 %v2848_v50, %v5605_v16  ;;  %v1963_v45 = vsel %vm1961_vm13, %v1962_v55, %v1960_v13  ;;  %vm1982_vm15 = vcmp.eq.f32.partialorder %v5637_v5, 0.0  ;;  %v1983_v58 = vand.u32 2147483648, %v5637_v5  ;;  %v6957_v50 = vld [vmem:[#allocation128_spill] sm:$0xff] }
 0x346   :  { %v5724_v18 = vpop.eup %2849  ;;  %v2359_v57 = vmul.f32 %v2295_v10, %v6953_v26  ;;  %2867 = vrsqrt.f32 %v1963_v45  ;;  %v1539_v29 = vadd.f32 %v1446_v28, %v5080_v41  ;;  %v1542_v22 = vadd.f32 %v1452_v34, %v5084_v27  ;;  %v1454_v41 = vpop.permute.xlu0 %1453 }
 0x347   :  { %v2362_v33 = vmul.f32 %v2298_v38, %v6954_v37  ;;  %v1979_v54 = vmul.f32 %v5724_v18, %v5637_v5  ;;  %v1541_v16 = vadd.f32 %v1450_v36, %v5088_v17  ;;  %v1544_v20 = vadd.f32 %v1456_v46, %v5095_v61 }
 0x348   :  { %v2852_v44 = vpop.eup %2851  ;;  %2423 = vst [vmem:[#allocation2 + $0xb0] sm:$0xff] %v2359_v57  ;;  %vm1973_vm0 = vcmp.eq.f32.partialorder %v5642_v52, inf  ;;  %vm1975_vm1 = vcmp.eq.f32.partialorder %v5642_v52, 0.0  ;;  %v1603_v12 = vmul.f32 2e-05, %v1539_v29  ;;  %v1976_v0 = vand.u32 2147483648, %v5642_v52 }
 0x349   :  { %v1606_v63 = vmul.f32 2e-05, %v1542_v22  ;;  %v5736_v28 = vpop.eup %2853  ;;  %2426 = vst [vmem:[#allocation2 + $0xc8] sm:$0xff] %v2362_v33  ;;  %v2297_v27 = vmul.f32 %v2852_v44, %v5629_v31  ;;  %v1981_v17 = vsel %vm1980_vm14, %v5637_v5, %v1979_v54  ;;  %v1605_v35 = vmul.f32 2e-05, %v1541_v16  ;;  %v1464_v22 = vpop.permute.xlu1 %1463 }
 0x34a   :  { %v1608_v61 = vmul.f32 2e-05, %v1544_v20  ;;  %v1984_v2 = vsel %vm1982_vm15, %v1983_v58, %v1981_v17  ;;  %v1972_v34 = vmul.f32 %v5736_v28, %v5642_v52  ;;  %v5747_v49 = vadd.f32 2.0, %v1603_v12  ;;  %v1458_v11 = vpop.permute.xlu0 %1457  ;;  %v6959_v17 = vld [vmem:[#allocation144_spill] sm:$0xff] }
 0x34b   :  { %v2856_v21 = vpop.eup %2855  ;;  %v2361_v1 = vmul.f32 %v2297_v27, %v6955_v9  ;;  %2869 = vrsqrt.f32 %v1984_v2  ;;  %vm1994_vm2 = vcmp.eq.f32.partialorder %v5685_v47, inf  ;;  %v5751_v31 = vadd.f32 2.0, %v1606_v63 }
 0x34c   :  { %v2858_v25 = vpop.eup %2857  ;;  %v2300_v59 = vmul.f32 %v2856_v21, %v5644_v39  ;;  %v1974_v5 = vsel %vm1973_vm0, %v5642_v52, %v1972_v34  ;;  %2871 = vrsqrt.f32 %v5747_v49  ;;  %v5758_v7 = vadd.f32 2.0, %v1605_v35 }
 0x34d   :  { %2425 = vst [vmem:[#allocation2 + $0xc0] sm:$0xff] %v2361_v1  ;;  %v2299_v3 = vmul.f32 %v2858_v25, %v5652_v14  ;;  %v1977_v43 = vsel %vm1975_vm1, %v1976_v0, %v1974_v5  ;;  %vm1996_vm3 = vcmp.eq.f32.partialorder %v5685_v47, 0.0  ;;  %v5764_v40 = vadd.f32 2.0, %v1608_v61  ;;  %v1468_v21 = vpop.permute.xlu1 %1467  ;;  %v6960_v25 = vld [vmem:[#allocation106_spill] sm:$0xff] }
 0x34e   :  { %v2860_v39 = vpop.eup %2859  ;;  %v2364_v24 = vmul.f32 %v2300_v59, %v6956_v30  ;;  %2873 = vrsqrt.f32 %v1977_v43  ;;  %v1997_v36 = vand.u32 2147483648, %v5685_v47  ;;  %vm1987_vm4 = vcmp.eq.f32.partialorder %v5690_v62, inf  ;;  %v1462_v63 = vpop.permute.xlu0 %1461  ;;  %v6962_v30 = vld [vmem:[#allocation109_spill] sm:$0xff] }
 0x34f   :  { %v5769_v55 = vpop.eup %2861  ;;  %v2363_v14 = vmul.f32 %v2299_v3, %v6957_v50  ;;  %v2302_v52 = vmul.f32 %v2860_v39, %v5664_v19  ;;  %2875 = vrsqrt.f32 %v5751_v31  ;;  %v1543_v10 = vadd.f32 %v1454_v41, %v5099_v6  ;;  %v6958_v19 = vld [vmem:[#allocation139_spill] sm:$0xff] }
 0x350   :  { %v5775_v13 = vpop.eup %2863  ;;  %2428 = vst [vmem:[#allocation2 + $0xd8] sm:$0xff] %v2364_v24  ;;  %v1993_v46 = vmul.f32 %v5769_v55, %v5685_v47  ;;  %vm1989_vm5 = vcmp.eq.f32.partialorder %v5690_v62, 0.0  ;;  %v1990_v38 = vand.u32 2147483648, %v5690_v62  ;;  %2877 = vrsqrt.f32 %v5758_v7  ;;  %v6961_v3 = vld [vmem:[#allocation155_spill] sm:$0xff] }
 0x351   :  { %v5782_v45 = vpop.eup %2865  ;;  %2427 = vst [vmem:[#allocation2 + $0xd0] sm:$0xff] %v2363_v14  ;;  %v2366_v58 = vmul.f32 %v2302_v52, %v6958_v19  ;;  %v1986_v6 = vmul.f32 %v5775_v13, %v5690_v62  ;;  %2879 = vrsqrt.f32 %v5764_v40  ;;  %v1546_v26 = vadd.f32 %v1460_v15, %v5103_v53 }
 0x352   :  { %v1995_v57 = vsel %vm1994_vm2, %v5685_v47, %v1993_v46  ;;  %v2007_v29 = vmul.f32 %v5782_v45, %v5692_v4  ;;  %vm2008_vm6 = vcmp.eq.f32.partialorder %v5692_v4, inf  ;;  %vm2010_vm7 = vcmp.eq.f32.partialorder %v5692_v4, 0.0  ;;  %v1466_v5 = vpop.permute.xlu0 %1465 }
 0x353   :  { %v2868_v37 = vpop.eup %2867  ;;  %2430 = vst [vmem:[#allocation2 + $0xe8] sm:$0xff] %v2366_v58  ;;  %v1998_v33 = vsel %vm1996_vm3, %v1997_v36, %v1995_v57  ;;  %v1988_v53 = vsel %vm1987_vm4, %v5690_v62, %v1986_v6  ;;  %v2011_v54 = vand.u32 2147483648, %v5692_v4  ;;  %v1607_v16 = vmul.f32 2e-05, %v1543_v10  ;;  %v6964_v58 = vld [vmem:[#allocation160_spill] sm:$0xff] }
 0x354   :  { %v2301_v20 = vmul.f32 %v2868_v37, %v5694_v51  ;;  %2881 = vrsqrt.f32 %v1998_v33  ;;  %v1991_v44 = vsel %vm1989_vm5, %v1990_v38, %v1988_v53  ;;  %v2009_v12 = vsel %vm2008_vm6, %v5692_v4, %v2007_v29  ;;  %v1472_v29 = vpop.permute.xlu1 %1471 }
 0x355   :  { %2883 = vrsqrt.f32 %v1991_v44  ;;  %v2012_v41 = vsel %vm2010_vm7, %v2011_v54, %v2009_v12  ;;  %v5806_v47 = vadd.f32 2.0, %v1607_v16  ;;  %v1610_v27 = vmul.f32 2e-05, %v1546_v26  ;;  %v6965_v12 = vld [vmem:[#allocation121_spill] sm:$0xff] }
 0x356   :  { %v2365_v35 = vmul.f32 %v2301_v20, %v6959_v17  ;;  %2885 = vrsqrt.f32 %v2012_v41  ;;  %v1545_v61 = vadd.f32 %v1458_v11, %v5115_v23  ;;  %v1548_v2 = vadd.f32 %v1464_v22, %v5119_v60 }
 0x357   :  { %vm2001_vm8 = vcmp.eq.f32.partialorder %v5747_v49, inf  ;;  %vm2003_vm9 = vcmp.eq.f32.partialorder %v5747_v49, 0.0  ;;  %v2004_v62 = vand.u32 2147483648, %v5747_v49  ;;  %2887 = vrsqrt.f32 %v5806_v47 }
 0x358   :  { %v2870_v4 = vpop.eup %2869  ;;  %2429 = vst [vmem:[#allocation2 + $0xe0] sm:$0xff] %v2365_v35  ;;  %vm2022_vm10 = vcmp.eq.f32.partialorder %v5751_v31, inf  ;;  %v5816_v51 = vadd.f32 2.0, %v1610_v27  ;;  %v1609_v34 = vmul.f32 2e-05, %v1545_v61  ;;  %vm2024_vm11 = vcmp.eq.f32.partialorder %v5751_v31, 0.0  ;;  %v1470_v35 = vpop.permute.xlu0 %1469 }
 0x359   :  { %v1612_v0 = vmul.f32 2e-05, %v1548_v2  ;;  %v5818_v23 = vpop.eup %2871  ;;  %v2304_v60 = vmul.f32 %v2870_v4, %v5724_v18  ;;  %v2025_v9 = vand.u32 2147483648, %v5751_v31  ;;  %vm2015_vm12 = vcmp.eq.f32.partialorder %v5758_v7, inf }
 0x35a   :  { %v2000_v1 = vmul.f32 %v5818_v23, %v5747_v49  ;;  %vm2017_vm13 = vcmp.eq.f32.partialorder %v5758_v7, 0.0  ;;  %2889 = vrsqrt.f32 %v5816_v51  ;;  %v1547_v59 = vadd.f32 %v1462_v63, %v6960_v25 }
 0x35b   :  { %v2874_v15 = vpop.eup %2873  ;;  %v2368_v43 = vmul.f32 %v2304_v60, %v6961_v3  ;;  %v5830_v18 = vadd.f32 2.0, %v1609_v34  ;;  %v5832_v39 = vadd.f32 2.0, %v1612_v0  ;;  %v1550_v24 = vadd.f32 %v1468_v21, %v6962_v30 }
 0x35c   :  { %v5835_v36 = vpop.eup %2875  ;;  %v2303_v11 = vmul.f32 %v2874_v15, %v5736_v28  ;;  %v2002_v50 = vsel %vm2001_vm8, %v5747_v49, %v2000_v1  ;;  %v2018_v14 = vand.u32 2147483648, %v5758_v7  ;;  %vm2036_vm14 = vcmp.eq.f32.partialorder %v5764_v40, inf  ;;  %v6963_v28 = vld [vmem:[#allocation118_spill] sm:$0xff]  ;;  %v6968_v1 = vld [vmem:[#allocation11_spill] sm:$0xff] }
 0x35d   :  { %v5843_v52 = vpop.eup %2877  ;;  %2432 = vst [vmem:[#allocation2 + $0xf8] sm:$0xff] %v2368_v43  ;;  %v2005_v10 = vsel %vm2003_vm9, %v2004_v62, %v2002_v50  ;;  %v2021_v46 = vmul.f32 %v5835_v36, %v5751_v31  ;;  %2891 = vrsqrt.f32 %v5830_v18  ;;  %v1549_v38 = vadd.f32 %v1466_v5, %v6963_v28  ;;  %v6970_v50 = vld [vmem:[#allocation108_spill] sm:$0xff] }
 0x35e   :  { %v5851_v19 = vpop.eup %2879  ;;  %v2367_v6 = vmul.f32 %v2303_v11, %v6964_v58  ;;  %2893 = vrsqrt.f32 %v2005_v10  ;;  %v2014_v26 = vmul.f32 %v5843_v52, %v5758_v7  ;;  %v1611_v57 = vmul.f32 2e-05, %v1547_v59  ;;  %v1474_v10 = vpop.permute.xlu0 %1473 }
 0x35f   :  { %v2023_v49 = vsel %vm2022_vm10, %v5751_v31, %v2021_v46  ;;  %v2035_v22 = vmul.f32 %v5851_v19, %v5764_v40  ;;  %2895 = vrsqrt.f32 %v5832_v39  ;;  %v1614_v37 = vmul.f32 2e-05, %v1550_v24  ;;  %v6969_v24 = vld [vmem:[#allocation122_spill] sm:$0xff] }
 0x360   :  { %2431 = vst [vmem:[#allocation2 + $0xf0] sm:$0xff] %v2367_v6  ;;  %v2026_v33 = vsel %vm2024_vm11, %v2025_v9, %v2023_v49  ;;  %v2016_v53 = vsel %vm2015_vm12, %v5758_v7, %v2014_v26  ;;  %vm2038_vm15 = vcmp.eq.f32.partialorder %v5764_v40, 0.0  ;;  %v2039_v54 = vand.u32 2147483648, %v5764_v40  ;;  %v1476_v9 = vpop.permute.xlu1 %1475 }
 0x361   :  { %v2882_v16 = vpop.eup %2881  ;;  %2897 = vrsqrt.f32 %v2026_v33  ;;  %v2019_v20 = vsel %vm2017_vm13, %v2018_v14, %v2016_v53  ;;  %v2037_v44 = vsel %vm2036_vm14, %v5764_v40, %v2035_v22  ;;  %v1552_v31 = vadd.f32 %v1472_v29, %v6965_v12  ;;  %v6966_v40 = vld [vmem:[#allocation6_spill] sm:$0xff] }
 0x362   :  { %v2884_v63 = vpop.eup %2883  ;;  %v2306_v41 = vmul.f32 %v2882_v16, %v5769_v55  ;;  %2899 = vrsqrt.f32 %v2019_v20  ;;  %v2040_v27 = vsel %vm2038_vm15, %v2039_v54, %v2037_v44  ;;  %v5876_v17 = vadd.f32 2.0, %v1611_v57  ;;  %v6967_v55 = vld [vmem:[#allocation8_spill] sm:$0xff] }
 0x363   :  { %v2886_v61 = vpop.eup %2885  ;;  %v2305_v2 = vmul.f32 %v2884_v63, %v5775_v13  ;;  %2901 = vrsqrt.f32 %v2040_v27  ;;  %v5879_v7 = vadd.f32 2.0, %v1614_v37  ;;  %v1613_v62 = vmul.f32 2e-05, %v1549_v38  ;;  %v6971_v37 = vld [vmem:[#allocation113_spill] sm:$0xff]  ;;  %v6972_v44 = vld [vmem:[#allocation12_spill] sm:$0xff] }
 0x364   :  { %v5881_v4 = vpop.eup %2887  ;;  %v2370_v34 = vmul.f32 %v2306_v41, %v6966_v40  ;;  %v2308_v0 = vmul.f32 %v2886_v61, %v5782_v45  ;;  %vm2029_vm0 = vcmp.eq.f32.partialorder %v5806_v47, inf  ;;  %2903 = vrsqrt.f32 %v5876_v17  ;;  %v1480_v53 = vpop.permute.xlu1 %1479 }
 0x365   :  { %v2369_v21 = vmul.f32 %v2305_v2, %v6967_v55  ;;  %v2028_v60 = vmul.f32 %v5881_v4, %v5806_v47  ;;  %vm2031_vm1 = vcmp.eq.f32.partialorder %v5806_v47, 0.0  ;;  %v2032_v13 = vand.u32 2147483648, %v5806_v47  ;;  %v1478_v41 = vpop.permute.xlu0 %1477 }
 0x366   :  { %2434 = vst [vmem:[#allocation2 + $0x108] sm:$0xff] %v2370_v34  ;;  %v2372_v25 = vmul.f32 %v2308_v0, %v6968_v1  ;;  %vm2050_vm2 = vcmp.eq.f32.partialorder %v5816_v51, inf  ;;  %vm2052_vm3 = vcmp.eq.f32.partialorder %v5816_v51, 0.0  ;;  %2905 = vrsqrt.f32 %v5879_v7  ;;  %v6975_v1 = vld [vmem:[#allocation25_spill] sm:$0xff] }
 0x367   :  { %v5896_v45 = vpop.eup %2889  ;;  %2433 = vst [vmem:[#allocation2 + $0x100] sm:$0xff] %v2369_v21  ;;  %v2030_v59 = vsel %vm2029_vm0, %v5806_v47, %v2028_v60  ;;  %v2053_v5 = vand.u32 2147483648, %v5816_v51  ;;  %v5900_v15 = vadd.f32 2.0, %v1613_v62  ;;  %v1616_v3 = vmul.f32 2e-05, %v1552_v31  ;;  %v6974_v21 = vld [vmem:[#allocation20_spill] sm:$0xff] }
 0x368   :  { %2436 = vst [vmem:[#allocation2 + $0x118] sm:$0xff] %v2372_v25  ;;  %v2033_v43 = vsel %vm2031_vm1, %v2032_v13, %v2030_v59  ;;  %v2049_v30 = vmul.f32 %v5896_v45, %v5816_v51  ;;  %v1551_v11 = vadd.f32 %v1470_v35, %v6969_v24  ;;  %v1554_v14 = vadd.f32 %v1476_v9, %v6970_v50  ;;  %v1484_v13 = vpop.permute.xlu1 %1483  ;;  %v6977_v50 = vld [vmem:[#allocation125_spill] sm:$0xff] }
 0x369   :  { %2907 = vrsqrt.f32 %v2033_v43  ;;  %vm2043_vm4 = vcmp.eq.f32.partialorder %v5830_v18, inf  ;;  %vm2045_vm5 = vcmp.eq.f32.partialorder %v5830_v18, 0.0  ;;  %v2046_v47 = vand.u32 2147483648, %v5830_v18  ;;  %v6976_v43 = vld [vmem:[#allocation114_spill] sm:$0xff]  ;;  %v1482_v24 = vpop.permute.xlu0 %1481 }
 0x36a   :  { %v5909_v46 = vpop.eup %2891  ;;  %v2051_v28 = vsel %vm2050_vm2, %v5816_v51, %v2049_v30  ;;  %2909 = vrsqrt.f32 %v5900_v15  ;;  %v5915_v38 = vadd.f32 2.0, %v1616_v3  ;;  %v1615_v58 = vmul.f32 2e-05, %v1551_v11 }
 0x36b   :  { %v2894_v6 = vpop.eup %2893  ;;  %v2054_v26 = vsel %vm2052_vm3, %v2053_v5, %v2051_v28  ;;  %v2042_v57 = vmul.f32 %v5909_v46, %v5830_v18  ;;  %vm2064_vm6 = vcmp.eq.f32.partialorder %v5832_v39, inf  ;;  %v1618_v29 = vmul.f32 2e-05, %v1554_v14 }
 0x36c   :  { %v5922_v49 = vpop.eup %2895  ;;  %v2307_v22 = vmul.f32 %v2894_v6, %v5818_v23  ;;  %2911 = vrsqrt.f32 %v2054_v26  ;;  %vm2066_vm7 = vcmp.eq.f32.partialorder %v5832_v39, 0.0  ;;  %v1553_v33 = vadd.f32 %v1474_v10, %v6971_v37  ;;  %v6978_v10 = vld [vmem:[#allocation119_spill] sm:$0xff] }
 0x36d   :  { %v2044_v51 = vsel %vm2043_vm4, %v5830_v18, %v2042_v57  ;;  %v2063_v54 = vmul.f32 %v5922_v49, %v5832_v39  ;;  %v2067_v16 = vand.u32 2147483648, %v5832_v39  ;;  %2913 = vrsqrt.f32 %v5915_v38 }
 0x36e   :  { %v2898_v20 = vpop.eup %2897  ;;  %v2371_v23 = vmul.f32 %v2307_v22, %v6972_v44  ;;  %v2047_v12 = vsel %vm2045_vm5, %v2046_v47, %v2044_v51  ;;  %v5937_v31 = vadd.f32 2.0, %v1615_v58  ;;  %v5939_v63 = vadd.f32 2.0, %v1618_v29  ;;  %v6979_v29 = vld [vmem:[#allocation124_spill] sm:$0xff]  ;;  %v1488_v51 = vpop.permute.xlu1 %1487 }
 0x36f   :  { %v2900_v27 = vpop.eup %2899  ;;  %v2310_v35 = vmul.f32 %v2898_v20, %v5835_v36  ;;  %2915 = vrsqrt.f32 %v2047_v12  ;;  %v2065_v61 = vsel %vm2064_vm6, %v5832_v39, %v2063_v54  ;;  %vm2057_vm8 = vcmp.eq.f32.partialorder %v5876_v17, inf  ;;  %v6973_v36 = vld [vmem:[#allocation19_spill] sm:$0xff] }
 0x370   :  { %v2902_v2 = vpop.eup %2901  ;;  %2435 = vst [vmem:[#allocation2 + $0x110] sm:$0xff] %v2371_v23  ;;  %v2309_v18 = vmul.f32 %v2900_v27, %v5843_v52  ;;  %v2068_v62 = vsel %vm2066_vm7, %v2067_v16, %v2065_v61  ;;  %2917 = vrsqrt.f32 %v5937_v31  ;;  %v1617_v40 = vmul.f32 2e-05, %v1553_v33  ;;  %v6980_v16 = vld [vmem:[#allocation26_spill] sm:$0xff] }
 0x371   :  { %v5950_v34 = vpop.eup %2903  ;;  %v2374_v0 = vmul.f32 %v2310_v35, %v6973_v36  ;;  %v2312_v55 = vmul.f32 %v2902_v2, %v5851_v19  ;;  %2919 = vrsqrt.f32 %v2068_v62  ;;  %vm2059_vm9 = vcmp.eq.f32.partialorder %v5876_v17, 0.0  ;;  %v1486_v36 = vpop.permute.xlu0 %1485 }
 0x372   :  { %v2373_v60 = vmul.f32 %v2309_v18, %v6974_v21  ;;  %v2056_v52 = vmul.f32 %v5950_v34, %v5876_v17  ;;  %v2060_v39 = vand.u32 2147483648, %v5876_v17  ;;  %2921 = vrsqrt.f32 %v5939_v63 }
 0x373   :  { %v5960_v9 = vpop.eup %2905  ;;  %2438 = vst [vmem:[#allocation2 + $0x128] sm:$0xff] %v2374_v0  ;;  %v2376_v25 = vmul.f32 %v2312_v55, %v6975_v1  ;;  %vm2078_vm10 = vcmp.eq.f32.partialorder %v5879_v7, inf  ;;  %vm2080_vm11 = vcmp.eq.f32.partialorder %v5879_v7, 0.0  ;;  %v2081_v19 = vand.u32 2147483648, %v5879_v7  ;;  %v6982_v1 = vld [vmem:[#allocation31_spill] sm:$0xff] }
 0x374   :  { %2437 = vst [vmem:[#allocation2 + $0x120] sm:$0xff] %v2373_v60  ;;  %v2058_v59 = vsel %vm2057_vm8, %v5876_v17, %v2056_v52  ;;  %v2077_v5 = vmul.f32 %v5960_v9, %v5879_v7  ;;  %v5971_v3 = vadd.f32 2.0, %v1617_v40  ;;  %v1556_v30 = vadd.f32 %v1480_v53, %v6976_v43  ;;  %v6983_v43 = vld [vmem:[#allocation129_spill] sm:$0xff] }
 0x375   :  { %2440 = vst [vmem:[#allocation2 + $0x138] sm:$0xff] %v2376_v25  ;;  %v2061_v11 = vsel %vm2059_vm9, %v2060_v39, %v2058_v59  ;;  %vm2071_vm12 = vcmp.eq.f32.partialorder %v5900_v15, inf  ;;  %v1555_v14 = vadd.f32 %v1478_v41, %v6977_v50  ;;  %v1558_v47 = vadd.f32 %v1484_v13, %v6978_v10  ;;  %v6986_v10 = vld [vmem:[#allocation102_spill] sm:$0xff] }
 0x376   :  { %v2908_v28 = vpop.eup %2907  ;;  %2923 = vrsqrt.f32 %v2061_v11  ;;  %v2079_v58 = vsel %vm2078_vm10, %v5879_v7, %v2077_v5  ;;  %vm2073_vm13 = vcmp.eq.f32.partialorder %v5900_v15, 0.0  ;;  %v2074_v6 = vand.u32 2147483648, %v5900_v15 }
 0x377   :  { %v5984_v26 = vpop.eup %2909  ;;  %v2311_v17 = vmul.f32 %v2908_v28, %v5881_v4  ;;  %v2082_v57 = vsel %vm2080_vm11, %v2081_v19, %v2079_v58  ;;  %2925 = vrsqrt.f32 %v5971_v3  ;;  %v1557_v22 = vadd.f32 %v1482_v24, %v6979_v29  ;;  %v6984_v24 = vld [vmem:[#allocation33_spill] sm:$0xff]  ;;  %v1490_v58 = vpop.permute.xlu0 %1489 }
 0x378   :  { %2927 = vrsqrt.f32 %v2082_v57  ;;  %v2070_v37 = vmul.f32 %v5984_v26, %v5900_v15  ;;  %v1620_v33 = vmul.f32 2e-05, %v1556_v30  ;;  %v1619_v53 = vmul.f32 2e-05, %v1555_v14  ;;  %v6985_v14 = vld [vmem:[#allocation105_spill] sm:$0xff] }
 0x379   :  { %v2912_v54 = vpop.eup %2911  ;;  %v2375_v20 = vmul.f32 %v2311_v17, %v6980_v16  ;;  %vm2092_vm14 = vcmp.eq.f32.partialorder %v5915_v38, inf  ;;  %vm2094_vm15 = vcmp.eq.f32.partialorder %v5915_v38, 0.0  ;;  %v1622_v7 = vmul.f32 2e-05, %v1558_v47 }
 0x37a   :  { %v5996_v4 = vpop.eup %2913  ;;  %v2314_v44 = vmul.f32 %v2912_v54, %v5896_v45  ;;  %v2072_v23 = vsel %vm2071_vm12, %v5900_v15, %v2070_v37  ;;  %v6002_v12 = vadd.f32 2.0, %v1620_v33  ;;  %v6004_v41 = vadd.f32 2.0, %v1619_v53  ;;  %v6981_v45 = vld [vmem:[#allocation30_spill] sm:$0xff] }
 0x37b   :  { %2439 = vst [vmem:[#allocation2 + $0x130] sm:$0xff] %v2375_v20  ;;  %v2075_v27 = vsel %vm2073_vm13, %v2074_v6, %v2072_v23  ;;  %v2091_v35 = vmul.f32 %v5996_v4, %v5915_v38  ;;  %v2095_v61 = vand.u32 2147483648, %v5915_v38  ;;  %v1621_v2 = vmul.f32 2e-05, %v1557_v22  ;;  %v6987_v22 = vld [vmem:[#allocation130_spill] sm:$0xff]  ;;  %v6989_v20 = vld [vmem:[#allocation135_spill] sm:$0xff] }
 0x37c   :  { %v2916_v18 = vpop.eup %2915  ;;  %v2378_v62 = vmul.f32 %v2314_v44, %v6981_v45  ;;  %2929 = vrsqrt.f32 %v2075_v27  ;;  %vm2085_vm0 = vcmp.eq.f32.partialorder %v5937_v31, inf  ;;  %v6013_v40 = vadd.f32 2.0, %v1622_v7  ;;  %v6988_v54 = vld [vmem:[#allocation134_spill] sm:$0xff]  ;;  %v6990_v44 = vld [vmem:[#allocation35_spill] sm:$0xff]  ;;  %v6991_v45 = vld [vmem:[#allocation37_spill] sm:$0xff] }
 0x37d   :  { %v6015_v0 = vpop.eup %2917  ;;  %v2313_v15 = vmul.f32 %v2916_v18, %v5909_v46  ;;  %v2093_v55 = vsel %vm2092_vm14, %v5915_v38, %v2091_v35  ;;  %vm2087_vm1 = vcmp.eq.f32.partialorder %v5937_v31, 0.0  ;;  %2931 = vrsqrt.f32 %v6002_v12  ;;  %v1492_v46 = vpop.permute.xlu1 %1491 }
 0x37e   :  { %v2920_v21 = vpop.eup %2919  ;;  %2442 = vst [vmem:[#allocation2 + $0x148] sm:$0xff] %v2378_v62  ;;  %v2096_v60 = vsel %vm2094_vm15, %v2095_v61, %v2093_v55  ;;  %v2084_v52 = vmul.f32 %v6015_v0, %v5937_v31  ;;  %v2088_v39 = vand.u32 2147483648, %v5937_v31  ;;  %2933 = vrsqrt.f32 %v6004_v41 }
 0x37f   :  { %v6029_v13 = vpop.eup %2921  ;;  %v2377_v25 = vmul.f32 %v2313_v15, %v6982_v1  ;;  %v2316_v19 = vmul.f32 %v2920_v21, %v5922_v49  ;;  %2935 = vrsqrt.f32 %v2096_v60  ;;  %v6033_v59 = vadd.f32 2.0, %v1621_v2  ;;  %v1494_v60 = vpop.permute.xlu0 %1493 }
 0x380   :  { %v2086_v38 = vsel %vm2085_vm0, %v5937_v31, %v2084_v52  ;;  %v2105_v5 = vmul.f32 %v6029_v13, %v5939_v63  ;;  %2937 = vrsqrt.f32 %v6013_v40  ;;  %v1560_v30 = vadd.f32 %v1488_v51, %v6983_v43 }
 0x381   :  { %2441 = vst [vmem:[#allocation2 + $0x140] sm:$0xff] %v2377_v25  ;;  %v2380_v11 = vmul.f32 %v2316_v19, %v6984_v24  ;;  %v2089_v49 = vsel %vm2087_vm1, %v2088_v39, %v2086_v38  ;;  %vm2106_vm2 = vcmp.eq.f32.partialorder %v5939_v63, inf  ;;  %v2109_v50 = vand.u32 2147483648, %v5939_v63  ;;  %v1496_v33 = vpop.permute.xlu1 %1495  ;;  %v6992_v38 = vld [vmem:[#allocation39_spill] sm:$0xff] }
 0x382   :  { %v6049_v47 = vadd.f32 %v6986_v10, %v6985_v14  ;;  %2939 = vrsqrt.f32 %v2089_v49  ;;  %v2107_v28 = vsel %vm2106_vm2, %v5939_v63, %v2105_v5  ;;  %vm2108_vm3 = vcmp.eq.f32.partialorder %v5939_v63, 0.0 }
 0x383   :  { %v2924_v6 = vpop.eup %2923  ;;  %2444 = vst [vmem:[#allocation2 + $0x158] sm:$0xff] %v2380_v11  ;;  %v2110_v17 = vsel %vm2108_vm3, %v2109_v50, %v2107_v28  ;;  %vm2099_vm4 = vcmp.eq.f32.partialorder %v5971_v3, inf  ;;  %vm2101_vm5 = vcmp.eq.f32.partialorder %v5971_v3, 0.0  ;;  %2941 = vrsqrt.f32 %v6033_v59 }
 0x384   :  { %v6056_v31 = vpop.eup %2925  ;;  %v2315_v57 = vmul.f32 %v2924_v6, %v5950_v34  ;;  %2943 = vrsqrt.f32 %v2110_v17  ;;  %v1624_v29 = vmul.f32 2e-05, %v1560_v30  ;;  %v1559_v37 = vadd.f32 %v1486_v36, %v6987_v22 }
 0x385   :  { %v2928_v63 = vpop.eup %2927  ;;  %v2098_v53 = vmul.f32 %v6056_v31, %v5971_v3  ;;  %v2102_v51 = vand.u32 2147483648, %v5971_v3  ;;  %v1562_v16 = vadd.f32 %v1492_v46, %v6988_v54  ;;  %v1561_v7 = vadd.f32 %v1490_v58, %v6989_v20  ;;  %v1500_v10 = vpop.permute.xlu1 %1499  ;;  %v6993_v58 = vld [vmem:[#allocation47_spill] sm:$0xff] }
 0x386   :  { %v2379_v23 = vmul.f32 %v2315_v57, %v6990_v44  ;;  %v2318_v27 = vmul.f32 %v2928_v63, %v5960_v9  ;;  %v6067_v34 = vadd.f32 2.0, %v1624_v29  ;;  %v1623_v35 = vmul.f32 2e-05, %v1559_v37 }
 0x387   :  { %v2100_v61 = vsel %vm2099_vm4, %v5971_v3, %v2098_v53  ;;  %vm2120_vm6 = vcmp.eq.f32.partialorder %v6002_v12, inf  ;;  %v1626_v2 = vmul.f32 2e-05, %v1562_v16  ;;  %v1564_v18 = vadd.f32 %v1496_v33, %v5436_v48 }
 0x388   :  { %2443 = vst [vmem:[#allocation2 + $0x150] sm:$0xff] %v2379_v23  ;;  %v2382_v62 = vmul.f32 %v2318_v27, %v6991_v45  ;;  %v2103_v36 = vsel %vm2101_vm5, %v2102_v51, %v2100_v61  ;;  %vm2122_vm7 = vcmp.eq.f32.partialorder %v6002_v12, 0.0  ;;  %2945 = vrsqrt.f32 %v6067_v34 }
 0x389   :  { %v2930_v9 = vpop.eup %2929  ;;  %2947 = vrsqrt.f32 %v2103_v36  ;;  %v2123_v15 = vand.u32 2147483648, %v6002_v12  ;;  %v6080_v55 = vadd.f32 2.0, %v1623_v35  ;;  %v1625_v21 = vmul.f32 2e-05, %v1561_v7 }
 0x38a   :  { %v6082_v52 = vpop.eup %2931  ;;  %2446 = vst [vmem:[#allocation2 + $0x168] sm:$0xff] %v2382_v62  ;;  %v2317_v48 = vmul.f32 %v2930_v9, %v5984_v26  ;;  %vm2113_vm8 = vcmp.eq.f32.partialorder %v6004_v41, inf  ;;  %vm2115_vm9 = vcmp.eq.f32.partialorder %v6004_v41, 0.0  ;;  %v6087_v3 = vadd.f32 2.0, %v1626_v2 }
 0x38b   :  { %v6089_v39 = vpop.eup %2933  ;;  %v2119_v46 = vmul.f32 %v6082_v52, %v6002_v12  ;;  %v2116_v1 = vand.u32 2147483648, %v6004_v41  ;;  %2949 = vrsqrt.f32 %v6080_v55  ;;  %v1628_v25 = vmul.f32 2e-05, %v1564_v18 }
 0x38c   :  { %v2936_v19 = vpop.eup %2935  ;;  %v2381_v5 = vmul.f32 %v2317_v48, %v6992_v38  ;;  %v2112_v26 = vmul.f32 %v6089_v39, %v6004_v41  ;;  %vm2134_vm10 = vcmp.eq.f32.partialorder %v6013_v40, inf  ;;  %2951 = vrsqrt.f32 %v6087_v3 }
 0x38d   :  { %v6100_v43 = vpop.eup %2937  ;;  %v2320_v30 = vmul.f32 %v2936_v19, %v5996_v4  ;;  %v2121_v24 = vsel %vm2120_vm6, %v6002_v12, %v2119_v46  ;;  %vm2136_vm11 = vcmp.eq.f32.partialorder %v6013_v40, 0.0  ;;  %v6107_v11 = vadd.f32 2.0, %v1625_v21  ;;  %v1498_v12 = vpop.permute.xlu0 %1497 }
 0x38e   :  { %2445 = vst [vmem:[#allocation2 + $0x160] sm:$0xff] %v2381_v5  ;;  %v2124_v49 = vsel %vm2122_vm7, %v2123_v15, %v2121_v24  ;;  %v2114_v50 = vsel %vm2113_vm8, %v6004_v41, %v2112_v26  ;;  %v2133_v14 = vmul.f32 %v6100_v43, %v6013_v40  ;;  %v2137_v4 = vand.u32 2147483648, %v6013_v40 }
 0x38f   :  { %v2940_v28 = vpop.eup %2939  ;;  %v2384_v6 = vmul.f32 %v2320_v30, %v6993_v58  ;;  %2953 = vrsqrt.f32 %v2124_v49  ;;  %v2117_v17 = vsel %vm2115_vm9, %v2116_v1, %v2114_v50  ;;  %v6120_v57 = vadd.f32 2.0, %v1628_v25 }
 0x390   :  { %v6122_v29 = vpop.eup %2941  ;;  %v2319_v22 = vmul.f32 %v2940_v28, %v6015_v0  ;;  %2955 = vrsqrt.f32 %v2117_v17  ;;  %v2135_v37 = vsel %vm2134_vm10, %v6013_v40, %v2133_v14  ;;  %vm2127_vm12 = vcmp.eq.f32.partialorder %v6033_v59, inf  ;;  %v6994_v0 = vld [vmem:[#allocation51_spill] sm:$0xff] }
 0x391   :  { %v2944_v33 = vpop.eup %2943  ;;  %2448 = vst [vmem:[#allocation2 + $0x178] sm:$0xff] %v2384_v6  ;;  %v2138_v41 = vsel %vm2136_vm11, %v2137_v4, %v2135_v37  ;;  %v2126_v63 = vmul.f32 %v6122_v29, %v6033_v59  ;;  %vm2129_vm13 = vcmp.eq.f32.partialorder %v6033_v59, 0.0  ;;  %2957 = vrsqrt.f32 %v6107_v11  ;;  %v6995_v40 = vld [vmem:[#allocation59_spill] sm:$0xff]  ;;  %v1502_v61 = vpop.permute.xlu0 %1501 }
 0x392   :  { %v2383_v53 = vmul.f32 %v2319_v22, %v6994_v0  ;;  %v2322_v51 = vmul.f32 %v2944_v33, %v6029_v13  ;;  %2959 = vrsqrt.f32 %v2138_v41  ;;  %v2130_v54 = vand.u32 2147483648, %v6033_v59  ;;  %v1504_v13 = vpop.permute.xlu1 %1503 }
 0x393   :  { %v2128_v16 = vsel %vm2127_vm12, %v6033_v59, %v2126_v63  ;;  %vm2148_vm14 = vcmp.eq.f32.partialorder %v6067_v34, inf  ;;  %vm2150_vm15 = vcmp.eq.f32.partialorder %v6067_v34, 0.0  ;;  %2961 = vrsqrt.f32 %v6120_v57 }
 0x394   :  { %2447 = vst [vmem:[#allocation2 + $0x170] sm:$0xff] %v2383_v53  ;;  %v2386_v20 = vmul.f32 %v2322_v51, %v6995_v40  ;;  %v2131_v7 = vsel %vm2129_vm13, %v2130_v54, %v2128_v16  ;;  %v1563_v44 = vadd.f32 %v1494_v60, %v5441_v56  ;;  %v1566_v23 = vadd.f32 %v1500_v10, %v5698_v32  ;;  %v6999_v53 = vld [vmem:[#allocation83_spill] sm:$0xff] }
 0x395   :  { %v6145_v27 = vpop.eup %2945  ;;  %2963 = vrsqrt.f32 %v2131_v7  ;;  %v2151_v59 = vand.u32 2147483648, %v6067_v34  ;;  %vm2141_vm0 = vcmp.eq.f32.partialorder %v6080_v55, inf  ;;  %v1565_v35 = vadd.f32 %v1498_v12, %v5702_v8  ;;  %v6998_v12 = vld [vmem:[#allocation75_spill] sm:$0xff] }
 0x396   :  { %v2948_v2 = vpop.eup %2947  ;;  %2450 = vst [vmem:[#allocation2 + $0x188] sm:$0xff] %v2386_v20  ;;  %v2147_v18 = vmul.f32 %v6145_v27, %v6067_v34  ;;  %vm2143_vm1 = vcmp.eq.f32.partialorder %v6080_v55, 0.0  ;;  %v1627_v56 = vmul.f32 2e-05, %v1563_v44  ;;  %v1630_v32 = vmul.f32 2e-05, %v1566_v23 }
 0x397   :  { %v2321_v45 = vmul.f32 %v2948_v2, %v6056_v31  ;;  %v2144_v62 = vand.u32 2147483648, %v6080_v55  ;;  %v1629_v36 = vmul.f32 2e-05, %v1565_v35  ;;  %v1568_v9 = vadd.f32 %v1504_v13, %v5707_v42  ;;  %v6996_v31 = vld [vmem:[#allocation63_spill] sm:$0xff] }
 0x398   :  { %v6156_v15 = vpop.eup %2949  ;;  %v2149_v8 = vsel %vm2148_vm14, %v6067_v34, %v2147_v18  ;;  %v6161_v21 = vadd.f32 2.0, %v1627_v56  ;;  %v6163_v60 = vadd.f32 2.0, %v1630_v32  ;;  %v1567_v48 = vadd.f32 %v1502_v61, %v6049_v47  ;;  %v7000_v20 = vld [vmem:[#allocation87_spill] sm:$0xff] }
 0x399   :  { %v6166_v46 = vpop.eup %2951  ;;  %v2385_v1 = vmul.f32 %v2321_v45, %v6996_v31  ;;  %v2152_v25 = vsel %vm2150_vm15, %v2151_v59, %v2149_v8  ;;  %v2140_v42 = vmul.f32 %v6156_v15, %v6080_v55  ;;  %vm2162_vm2 = vcmp.eq.f32.partialorder %v6087_v3, inf  ;;  %v7001_v61 = vld [vmem:[#allocation95_spill] sm:$0xff] }
 0x39a   :  { %2965 = vrsqrt.f32 %v2152_v25  ;;  %v2161_v19 = vmul.f32 %v6166_v46, %v6087_v3  ;;  %vm2164_vm3 = vcmp.eq.f32.partialorder %v6087_v3, 0.0  ;;  %v2165_v47 = vand.u32 2147483648, %v6087_v3 }
 0x39b   :  { %2449 = vst [vmem:[#allocation2 + $0x180] sm:$0xff] %v2385_v1  ;;  %v2142_v38 = vsel %vm2141_vm0, %v6080_v55, %v2140_v42  ;;  %2967 = vrsqrt.f32 %v6161_v21  ;;  %v6182_v34 = vadd.f32 2.0, %v1629_v36  ;;  %v1632_v5 = vmul.f32 2e-05, %v1568_v9  ;;  %v6997_v55 = vld [vmem:[#allocation71_spill] sm:$0xff] }
 0x39c   :  { %v2954_v26 = vpop.eup %2953  ;;  %v2145_v30 = vsel %vm2143_vm1, %v2144_v62, %v2142_v38  ;;  %v2163_v24 = vsel %vm2162_vm2, %v6087_v3, %v2161_v19  ;;  %2969 = vrsqrt.f32 %v6163_v60  ;;  %v1631_v49 = vmul.f32 2e-05, %v1567_v48  ;;  %v7002_v48 = vld [vmem:[#allocation101_spill] sm:$0xff] }
 0x39d   :  { %v2956_v50 = vpop.eup %2955  ;;  %v2324_v14 = vmul.f32 %v2954_v26, %v6082_v52  ;;  %2971 = vrsqrt.f32 %v2145_v30  ;;  %v2166_v4 = vsel %vm2164_vm3, %v2165_v47, %v2163_v24  ;;  %vm2155_vm4 = vcmp.eq.f32.partialorder %v6107_v11, inf }
 0x39e   :  { %v6189_v10 = vpop.eup %2957  ;;  %v2323_v28 = vmul.f32 %v2956_v50, %v6089_v39  ;;  %2973 = vrsqrt.f32 %v2166_v4  ;;  %v2158_v17 = vand.u32 2147483648, %v6107_v11  ;;  %v6202_v39 = vadd.f32 2.0, %v1632_v5  ;;  %v7004_v50 = vld [vmem:[#allocation117_spill] sm:$0xff] }
 0x39f   :  { %v2960_v58 = vpop.eup %2959  ;;  %v2388_v6 = vmul.f32 %v2324_v14, %v6997_v55  ;;  %v2154_v3 = vmul.f32 %v6189_v10, %v6107_v11  ;;  %2975 = vrsqrt.f32 %v6182_v34  ;;  %v6204_v33 = vadd.f32 2.0, %v1631_v49  ;;  %v7005_v55 = vld [vmem:[#allocation127_spill] sm:$0xff] }
 0x3a0   :  { %v6198_v52 = vpop.eup %2961  ;;  %v2387_v22 = vmul.f32 %v2323_v28, %v6998_v12  ;;  %v2326_v37 = vmul.f32 %v2960_v58, %v6100_v43  ;;  %vm2157_vm5 = vcmp.eq.f32.partialorder %v6107_v11, 0.0  ;;  %vm2176_vm6 = vcmp.eq.f32.partialorder %v6120_v57, inf }
 0x3a1   :  { %2452 = vst [vmem:[#allocation2 + $0x198] sm:$0xff] %v2388_v6  ;;  %v2156_v41 = vsel %vm2155_vm4, %v6107_v11, %v2154_v3  ;;  %v2175_v63 = vmul.f32 %v6198_v52, %v6120_v57  ;;  %v2179_v43 = vand.u32 2147483648, %v6120_v57  ;;  %2977 = vrsqrt.f32 %v6202_v39 }
 0x3a2   :  { %v2964_v0 = vpop.eup %2963  ;;  %2451 = vst [vmem:[#allocation2 + $0x190] sm:$0xff] %v2387_v22  ;;  %v2390_v51 = vmul.f32 %v2326_v37, %v6999_v53  ;;  %v2159_v54 = vsel %vm2157_vm5, %v2158_v17, %v2156_v41  ;;  %vm2178_vm7 = vcmp.eq.f32.partialorder %v6120_v57, 0.0  ;;  %vm2169_vm8 = vcmp.eq.f32.partialorder %v6161_v21, inf }
 0x3a3   :  { %v2325_v16 = vmul.f32 %v2964_v0, %v6122_v29  ;;  %2979 = vrsqrt.f32 %v2159_v54  ;;  %v2177_v40 = vsel %vm2176_vm6, %v6120_v57, %v2175_v63  ;;  %vm2171_vm9 = vcmp.eq.f32.partialorder %v6161_v21, 0.0  ;;  %v7007_v63 = vld [vmem:[#allocation143_spill] sm:$0xff] }
 0x3a4   :  { %2454 = vst [vmem:[#allocation2 + $0x1a8] sm:$0xff] %v2390_v51  ;;  %v2180_v11 = vsel %vm2178_vm7, %v2179_v43, %v2177_v40  ;;  %2981 = vrsqrt.f32 %v6204_v33  ;;  %v2172_v2 = vand.u32 2147483648, %v6161_v21  ;;  %vm2190_vm10 = vcmp.eq.f32.partialorder %v6163_v60, inf  ;;  %v7009_v40 = vld [vmem:[#allocation159_spill] sm:$0xff] }
 0x3a5   :  { %v2389_v7 = vmul.f32 %v2325_v16, %v7000_v20  ;;  %2983 = vrsqrt.f32 %v2180_v11  ;;  %vm2192_vm11 = vcmp.eq.f32.partialorder %v6163_v60, 0.0  ;;  %vm2183_vm12 = vcmp.eq.f32.partialorder %v6182_v34, inf }
 0x3a6   :  { %v2186_v42 = vand.u32 2147483648, %v6182_v34  ;;  %vm2185_vm13 = vcmp.eq.f32.partialorder %v6182_v34, 0.0  ;;  %vm2204_vm14 = vcmp.eq.f32.partialorder %v6202_v39, inf  ;;  %v2207_v30 = vand.u32 2147483648, %v6202_v39 }
 0x3a7   :  { %v2966_v44 = vpop.eup %2965  ;;  %2453 = vst [vmem:[#allocation2 + $0x1a0] sm:$0xff] %v2389_v7  ;;  %vm2206_vm15 = vcmp.eq.f32.partialorder %v6202_v39, 0.0  ;;  %vm2197_vm0 = vcmp.eq.f32.partialorder %v6204_v33, inf  ;;  %vm2199_vm1 = vcmp.eq.f32.partialorder %v6204_v33, 0.0  ;;  %v7010_v7 = vld [vmem:[#allocation164_spill] sm:$0xff] }
 0x3a8   :  { %v2968_v23 = vpop.eup %2967  ;;  %v2328_v13 = vmul.f32 %v2966_v44, %v6145_v27  ;;  %v2193_v27 = vand.u32 2147483648, %v6163_v60 }
 0x3a9   :  { %v2970_v59 = vpop.eup %2969  ;;  %v2168_v29 = vmul.f32 %v2968_v23, %v6161_v21 }
 0x3aa   :  { %v2972_v35 = vpop.eup %2971  ;;  %v2392_v57 = vmul.f32 %v2328_v13, %v7001_v61  ;;  %v2189_v18 = vmul.f32 %v2970_v59, %v6163_v60 }
 0x3ab   :  { %v2974_v56 = vpop.eup %2973  ;;  %v2327_v32 = vmul.f32 %v2972_v35, %v6156_v15  ;;  %v2170_v45 = vsel %vm2169_vm8, %v6161_v21, %v2168_v29  ;;  %v7003_v21 = vld [vmem:[#allocation111_spill] sm:$0xff] }
 0x3ac   :  { %v2976_v62 = vpop.eup %2975  ;;  %2456 = vst [vmem:[#allocation2 + $0x1b8] sm:$0xff] %v2392_v57  ;;  %v2330_v36 = vmul.f32 %v2974_v56, %v6166_v46  ;;  %v2173_v9 = vsel %vm2171_vm9, %v2172_v2, %v2170_v45  ;;  %v2191_v8 = vsel %vm2190_vm10, %v6163_v60, %v2189_v18 }
 0x3ad   :  { %v2391_v31 = vmul.f32 %v2327_v32, %v7002_v48  ;;  %2985 = vrsqrt.f32 %v2173_v9  ;;  %v2194_v1 = vsel %vm2192_vm11, %v2193_v27, %v2191_v8  ;;  %v2182_v15 = vmul.f32 %v2976_v62, %v6182_v34 }
 0x3ae   :  { %v2394_v25 = vmul.f32 %v2330_v36, %v7003_v21  ;;  %2987 = vrsqrt.f32 %v2194_v1  ;;  %v2978_v19 = vpop.eup %2977 }
 0x3af   :  { %2455 = vst [vmem:[#allocation2 + $0x1b0] sm:$0xff] %v2391_v31  ;;  %v2184_v46 = vsel %vm2183_vm12, %v6182_v34, %v2182_v15  ;;  %v2203_v38 = vmul.f32 %v2978_v19, %v6202_v39 }
 0x3b0   :  { %v2980_v60 = vpop.eup %2979  ;;  %2458 = vst [vmem:[#allocation2 + $0x1c8] sm:$0xff] %v2394_v25  ;;  %v2187_v47 = vsel %vm2185_vm13, %v2186_v42, %v2184_v46 }
 0x3b1   :  { %v2982_v5 = vpop.eup %2981  ;;  %v2329_v26 = vmul.f32 %v2980_v60, %v6189_v10  ;;  %2989 = vrsqrt.f32 %v2187_v47  ;;  %v2205_v49 = vsel %vm2204_vm14, %v6202_v39, %v2203_v38  ;;  %v2200_v10 = vand.u32 2147483648, %v6204_v33  ;;  %v7006_v39 = vld [vmem:[#allocation133_spill] sm:$0xff] }
 0x3b2   :  { %v2984_v24 = vpop.eup %2983  ;;  %v2196_v34 = vmul.f32 %v2982_v5, %v6204_v33  ;;  %v2208_v28 = vsel %vm2206_vm15, %v2207_v30, %v2205_v49 }
 0x3b3   :  { %v2393_v14 = vmul.f32 %v2329_v26, %v7004_v50  ;;  %v2332_v4 = vmul.f32 %v2984_v24, %v6198_v52  ;;  %2991 = vrsqrt.f32 %v2208_v28 }
 0x3b4   :  { %v2198_v58 = vsel %vm2197_vm0, %v6204_v33, %v2196_v34  ;;  %v7008_v33 = vld [vmem:[#allocation149_spill] sm:$0xff] }
 0x3b5   :  { %2457 = vst [vmem:[#allocation2 + $0x1c0] sm:$0xff] %v2393_v14  ;;  %v2396_v6 = vmul.f32 %v2332_v4, %v7005_v55  ;;  %v2201_v3 = vsel %vm2199_vm1, %v2200_v10, %v2198_v58 }
 0x3b6   :  { %2993 = vrsqrt.f32 %v2201_v3 }
 0x3b7   :  { %2460 = vst [vmem:[#allocation2 + $0x1d8] sm:$0xff] %v2396_v6 }
 0x3ba   :  { %v2986_v17 = vpop.eup %2985 }
 0x3bb   :  { %v2988_v12 = vpop.eup %2987  ;;  %v2331_v22 = vmul.f32 %v2986_v17, %v2968_v23 }
 0x3bc   :  { %v2334_v37 = vmul.f32 %v2988_v12, %v2970_v59 }
 0x3bd   :  { %v2395_v52 = vmul.f32 %v2331_v22, %v7006_v39 }
 0x3be   :  { %v2990_v41 = vpop.eup %2989  ;;  %v2398_v0 = vmul.f32 %v2334_v37, %v7007_v63 }
 0x3bf   :  { %2459 = vst [vmem:[#allocation2 + $0x1d0] sm:$0xff] %v2395_v52  ;;  %v2333_v53 = vmul.f32 %v2990_v41, %v2976_v62 }
 0x3c0   :  { %2462 = vst [vmem:[#allocation2 + $0x1e8] sm:$0xff] %v2398_v0  ;;  %v2992_v51 = vpop.eup %2991 }
 0x3c1   :  { %v2397_v54 = vmul.f32 %v2333_v53, %v7008_v33  ;;  %v2336_v43 = vmul.f32 %v2992_v51, %v2978_v19 }
 0x3c3   :  { %v2994_v16 = vpop.eup %2993  ;;  %2461 = vst [vmem:[#allocation2 + $0x1e0] sm:$0xff] %v2397_v54  ;;  %v2400_v11 = vmul.f32 %v2336_v43, %v7009_v40 }
 0x3c4   :  { %v2335_v20 = vmul.f32 %v2994_v16, %v2982_v5 }
 0x3c5   :  { %2464 = vst [vmem:[#allocation2 + $0x1f8] sm:$0xff] %v2400_v11 }
 0x3c6   :  { %v2399_v44 = vmul.f32 %v2335_v20, %v7010_v7 }
 0x3c8   :  { %2463 = vst [vmem:[#allocation2 + $0x1f0] sm:$0xff] %v2399_v44 }
 0x3c9   :  { %3006 = shalt.err (!%p3003_p4)
}
 0x3ca   :  { %s3022_s17 = smov 128   ;;  %s3023_s18 = smov 8  }
 0x3cb   :  { %2476 = dma.vmem_to_hbm [thread:$0]  %s2471_s15, 8192, %s6265_s3, [#allocation3], %s3022_s17, %s3022_s17, %s3023_s18  }
 0x3cc   :  { %3015 = dma.done.wait [#allocation3], 8192  }
 0x3cd   :  { %3016 = vsyncadd [#allocation3], 4294959104 }
 0x3ce   :  { %2480 = vsyncpa [#allocation3], 1 }

</bundles_post_ra>
